<compile_context>
chip_gen: v7x
topology: tpu7x:2x2x1
jax: 0.10.0
libtpu: 0.0.40
codegen_flags: <defaults>
</compile_context>

<pallas_src>
import math

import jax
import jax.numpy as jnp
from jax import lax
from jax.experimental import pallas as pl
from jax.experimental.pallas import tpu as pltpu

# ----------------------------- tiny BERT config -----------------------------
VOCAB = 100
TYPE_VOCAB = 2
MAX_POS = 16
HIDDEN = 128            # lane-dense (multiple of 128) per perf review
NUM_HEADS = 4
HEAD_DIM = HIDDEN // NUM_HEADS
INTERMEDIATE = 256      # lane-dense (multiple of 128)
NUM_LAYERS = 2
LN_EPS = 1e-12          # BERT default layer_norm_eps
MAX_LENGTH = 8          # stand-in for TransformerEncoder.max_length (default 512)
                        # multiple of 8 -> clean sublane tiling of the seq dim


# ------------------------------ kernel helpers ------------------------------
def _layernorm(x, gamma, beta):
    mu = jnp.mean(x, axis=-1, keepdims=True)
    var = jnp.mean((x - mu) ** 2, axis=-1, keepdims=True)
    return (x - mu) * lax.rsqrt(var + LN_EPS) * gamma + beta


def _gelu_exact(x):
    # HF BERT uses exact (erf-based) GELU.
    return 0.5 * x * (1.0 + lax.erf(x * 0.7071067811865476))


# ------------------------------ fused kernel --------------------------------
def fused_encoder_kernel(
    emb_ref, mask_ref, eg_ref, eb_ref,
    wqkv_ref, bqkv_ref, wo_ref, bo_ref, ln1g_ref, ln1b_ref,
    w1_ref, b1_ref, w2_ref, b2_ref, ln2g_ref, ln2b_ref,
    wp_ref, bp_ref,
    o_ref,
):
    """One batch element per grid step: embeddings-LN -> N layers -> pooler."""
    S = emb_ref.shape[0]
    scale = 1.0 / math.sqrt(HEAD_DIM)

    # embedding LayerNorm (f32)
    x = _layernorm(emb_ref[...], eg_ref[...], eb_ref[...])          # (S, H)
    # additive key-mask bias, hoisted out of the layer loop: (1, 1, S)
    mask_b = mask_ref[...][None, :, :]

    def layer(l, x):
        xb = x.astype(jnp.bfloat16)

        # ---- fused QKV projection: (S, H) @ (H, 3H), bf16 MXU, f32 acc ----
        qkv = jnp.dot(xb, wqkv_ref[l],
                      preferred_element_type=jnp.float32) + bqkv_ref[l]
        q = qkv[:, 0 * HIDDEN:1 * HIDDEN].reshape(S, NUM_HEADS, HEAD_DIM)
        k = qkv[:, 1 * HIDDEN:2 * HIDDEN].reshape(S, NUM_HEADS, HEAD_DIM)
        v = qkv[:, 2 * HIDDEN:3 * HIDDEN].reshape(S, NUM_HEADS, HEAD_DIM)

        # ---- all heads at once (no per-head Python loop / concat) ----
        s = jnp.einsum("qhd,khd->hqk",
                       q.astype(jnp.bfloat16), k.astype(jnp.bfloat16),
                       preferred_element_type=jnp.float32) * scale   # (h, S, S)
        s = s + mask_b                                               # mask padded keys
        m = jnp.max(s, axis=-1, keepdims=True)
        e = jnp.exp(s - m)
        denom = jnp.maximum(jnp.sum(e, axis=-1, keepdims=True), 1e-20)
        p = e * pl.reciprocal(denom, approx=True)                    # EUP, not VALU div
        ctx = jnp.einsum("hqk,khd->qhd",
                         p.astype(jnp.bfloat16), v.astype(jnp.bfloat16),
                         preferred_element_type=jnp.float32).reshape(S, HIDDEN)

        attn = jnp.dot(ctx.astype(jnp.bfloat16), wo_ref[l],
                       preferred_element_type=jnp.float32) + bo_ref[l]
        x = _layernorm(x + attn, ln1g_ref[l], ln1b_ref[l])

        # ---- feed-forward (bf16 matmuls, f32 elementwise) ----
        h = _gelu_exact(jnp.dot(x.astype(jnp.bfloat16), w1_ref[l],
                                preferred_element_type=jnp.float32) + b1_ref[l])
        ffn = jnp.dot(h.astype(jnp.bfloat16), w2_ref[l],
                      preferred_element_type=jnp.float32) + b2_ref[l]
        return _layernorm(x + ffn, ln2g_ref[l], ln2b_ref[l])

    x = lax.fori_loop(0, NUM_LAYERS, layer, x, unroll=True)

    # ---- BERT pooler: tanh(CLS @ W_p + b_p) ----
    cls = x[0:1, :]                                                  # (1, H)
    o_ref[...] = jnp.tanh(jnp.dot(cls.astype(jnp.bfloat16), wp_ref[...],
                                  preferred_element_type=jnp.float32) + bp_ref[...])


# ------------------------------ Pallas wrapper -------------------------------
def _rep_spec(shape):
    """Full-array, grid-invariant BlockSpec (weights resident in VMEM)."""
    n = len(shape)
    return pl.BlockSpec(shape, lambda b, n=n: (0,) * n)


def fused_encoder(emb, mask_bias, p):
    B, S, H = emb.shape
    args = (
        emb, mask_bias,
        p["emb_ln_g"], p["emb_ln_b"],
        p["wqkv"], p["bqkv"], p["wo"], p["bo"], p["ln1_g"], p["ln1_b"],
        p["w1"], p["b1"], p["w2"], p["b2"], p["ln2_g"], p["ln2_b"],
        p["pooler_w"], p["pooler_b"],
    )
    in_specs = [
        pl.BlockSpec((None, S, H), lambda b: (b, 0, 0)),   # emb, per batch element
        pl.BlockSpec((None, 1, S), lambda b: (b, 0, 0)),   # mask bias, per batch element
    ] + [_rep_spec(a.shape) for a in args[2:]]

    out = pl.pallas_call(
        fused_encoder_kernel,
        out_shape=jax.ShapeDtypeStruct((B, 1, H), jnp.float32),
        grid_spec=pltpu.PrefetchScalarGridSpec(
            num_scalar_prefetch=0,
            grid=(B,),
            in_specs=in_specs,
            out_specs=pl.BlockSpec((None, 1, H), lambda b: (b, 0, 0)),
        ),
        compiler_params=pltpu.CompilerParams(
            dimension_semantics=("parallel",)),   # shard batch across TCs on v7x
    )(*args)
    return out.reshape(B, H)


# ------------------------------ parameter init -------------------------------
def init_params(key):
    def normal(k, shape, std=0.02, dtype=jnp.bfloat16):
        # weights stored bf16 (MXU operands); biases / LN params stay f32
        return (std * jax.random.normal(k, shape, dtype=jnp.float32)).astype(dtype)

    keys = jax.random.split(key, 8)
    L, H, I = NUM_LAYERS, HIDDEN, INTERMEDIATE
    return {
        "tok_emb": normal(keys[0], (VOCAB, H), dtype=jnp.float32),
        "pos_emb": normal(keys[1], (MAX_POS, H), dtype=jnp.float32),
        "type_emb": normal(keys[2], (TYPE_VOCAB, H), dtype=jnp.float32),
        "emb_ln_g": jnp.ones((1, H), jnp.float32),
        "emb_ln_b": jnp.zeros((1, H), jnp.float32),
        # stacked per-layer weights -> single fused kernel loops over them
        "wqkv": normal(keys[3], (L, H, 3 * H)),
        "bqkv": jnp.zeros((L, 1, 3 * H), jnp.float32),
        "wo": normal(keys[4], (L, H, H)),
        "bo": jnp.zeros((L, 1, H), jnp.float32),
        "ln1_g": jnp.ones((L, 1, H), jnp.float32),
        "ln1_b": jnp.zeros((L, 1, H), jnp.float32),
        "w1": normal(keys[5], (L, H, I)),
        "b1": jnp.zeros((L, 1, I), jnp.float32),
        "w2": normal(keys[6], (L, I, H)),
        "b2": jnp.zeros((L, 1, H), jnp.float32),
        "ln2_g": jnp.ones((L, 1, H), jnp.float32),
        "ln2_b": jnp.zeros((L, 1, H), jnp.float32),
        "pooler_w": normal(keys[7], (H, H)),
        "pooler_b": jnp.zeros((1, H), jnp.float32),
    }


# --------------------------- toy tokenizer (glue) ----------------------------
def toy_tokenize(labels, max_length):
    # TODO(synk): the HuggingFace AutoTokenizer (string -> ids) has no Pallas/JAX
    # equivalent; replaced by a deterministic toy word-hash tokenizer.
    PAD, CLS, SEP = 0, 1, 2
    input_ids, attn_mask = [], []
    for lab in labels:
        word_ids = [3 + (sum(ord(c) for c in w) % (VOCAB - 3)) for w in lab.split()]
        toks = [CLS] + word_ids[: max_length - 2] + [SEP]
        pad = max_length - len(toks)
        input_ids.append(toks + [PAD] * pad)
        attn_mask.append([1.0] * len(toks) + [0.0] * pad)
    return (jnp.asarray(input_ids, jnp.int32),
            jnp.asarray(attn_mask, jnp.float32))


# ------------------------------- full forward --------------------------------
def transformer_encoder_forward(labels, params):
    """Mirrors TransformerEncoder.forward: tokenize -> model(...) -> pooler_output."""
    if isinstance(labels, str):
        labels = [labels]
    input_ids, attn_mask = toy_tokenize(labels, MAX_LENGTH)
    B, S = input_ids.shape

    # embeddings (gathers are glue), token_type_ids default to 0
    emb = (params["tok_emb"][input_ids]
           + params["pos_emb"][:S][None, :, :]
           + params["type_emb"][0][None, None, :]).astype(jnp.float32)

    # additive attention-mask bias over keys, shaped (B, 1, S)
    mask_bias = ((1.0 - attn_mask) * jnp.float32(-1e9)).reshape(B, 1, S)

    return fused_encoder(emb, mask_bias, params)


# ------------------------------------ main -----------------------------------
if __name__ == "__main__":
    key = jax.random.PRNGKey(0)
    params = init_params(key)

    labels = [
        "hello world from pykeen",
        "knowledge graph embedding models are great",
    ]
    pooled = transformer_encoder_forward(labels, params)
    pooled = jax.block_until_ready(pooled)

    assert pooled.shape == (len(labels), HIDDEN)
    assert pooled.dtype == jnp.float32
    assert bool(jnp.all(jnp.isfinite(pooled)))
    print("KERNEL_OK")
</pallas_src>

<mosaic_0001>
module attributes {stable_mosaic.version = 11 : i64} {
  func.func @fused_encoder_kernel(%arg0: i32, %arg1: memref<1x8x128xf32, #tpu.memory_space<vmem>>, %arg2: memref<1x1x8xf32, #tpu.memory_space<vmem>>, %arg3: memref<1x128xf32, #tpu.memory_space<vmem>>, %arg4: memref<1x128xf32, #tpu.memory_space<vmem>>, %arg5: memref<2x128x384xbf16, #tpu.memory_space<vmem>>, %arg6: memref<2x1x384xf32, #tpu.memory_space<vmem>>, %arg7: memref<2x128x128xbf16, #tpu.memory_space<vmem>>, %arg8: memref<2x1x128xf32, #tpu.memory_space<vmem>>, %arg9: memref<2x1x128xf32, #tpu.memory_space<vmem>>, %arg10: memref<2x1x128xf32, #tpu.memory_space<vmem>>, %arg11: memref<2x128x256xbf16, #tpu.memory_space<vmem>>, %arg12: memref<2x1x256xf32, #tpu.memory_space<vmem>>, %arg13: memref<2x256x128xbf16, #tpu.memory_space<vmem>>, %arg14: memref<2x1x128xf32, #tpu.memory_space<vmem>>, %arg15: memref<2x1x128xf32, #tpu.memory_space<vmem>>, %arg16: memref<2x1x128xf32, #tpu.memory_space<vmem>>, %arg17: memref<128x128xbf16, #tpu.memory_space<vmem>>, %arg18: memref<1x128xf32, #tpu.memory_space<vmem>>, %arg19: memref<1x1x128xf32, #tpu.memory_space<vmem>>) attributes {dimension_semantics = [#tpu.dimension_semantics<parallel>], iteration_bounds = array<i64: 2>, scalar_prefetch = 0 : i64, scratch_operands = 0 : i64, tpu.core_type = #tpu.core_type<tc>, window_params = [{transform_indices = @transform_0, window_bounds = array<i64: 1, 8, 128>}, {transform_indices = @transform_1, window_bounds = array<i64: 1, 1, 8>}, {pipeline_mode = #tpu.pipeline_mode<synchronous>, transform_indices = @transform_2, window_bounds = array<i64: 1, 128>}, {pipeline_mode = #tpu.pipeline_mode<synchronous>, transform_indices = @transform_3, window_bounds = array<i64: 1, 128>}, {pipeline_mode = #tpu.pipeline_mode<synchronous>, transform_indices = @transform_4, window_bounds = array<i64: 2, 128, 384>}, {pipeline_mode = #tpu.pipeline_mode<synchronous>, transform_indices = @transform_5, window_bounds = array<i64: 2, 1, 384>}, {pipeline_mode = #tpu.pipeline_mode<synchronous>, transform_indices = @transform_6, window_bounds = array<i64: 2, 128, 128>}, {pipeline_mode = #tpu.pipeline_mode<synchronous>, transform_indices = @transform_7, window_bounds = array<i64: 2, 1, 128>}, {pipeline_mode = #tpu.pipeline_mode<synchronous>, transform_indices = @transform_8, window_bounds = array<i64: 2, 1, 128>}, {pipeline_mode = #tpu.pipeline_mode<synchronous>, transform_indices = @transform_9, window_bounds = array<i64: 2, 1, 128>}, {pipeline_mode = #tpu.pipeline_mode<synchronous>, transform_indices = @transform_10, window_bounds = array<i64: 2, 128, 256>}, {pipeline_mode = #tpu.pipeline_mode<synchronous>, transform_indices = @transform_11, window_bounds = array<i64: 2, 1, 256>}, {pipeline_mode = #tpu.pipeline_mode<synchronous>, transform_indices = @transform_12, window_bounds = array<i64: 2, 256, 128>}, {pipeline_mode = #tpu.pipeline_mode<synchronous>, transform_indices = @transform_13, window_bounds = array<i64: 2, 1, 128>}, {pipeline_mode = #tpu.pipeline_mode<synchronous>, transform_indices = @transform_14, window_bounds = array<i64: 2, 1, 128>}, {pipeline_mode = #tpu.pipeline_mode<synchronous>, transform_indices = @transform_15, window_bounds = array<i64: 2, 1, 128>}, {pipeline_mode = #tpu.pipeline_mode<synchronous>, transform_indices = @transform_16, window_bounds = array<i64: 128, 128>}, {pipeline_mode = #tpu.pipeline_mode<synchronous>, transform_indices = @transform_17, window_bounds = array<i64: 1, 128>}, {transform_indices = @transform_18, window_bounds = array<i64: 1, 1, 128>}]} {
    %c0 = arith.constant 0 : index
    %c0_0 = arith.constant 0 : index
    %c0_1 = arith.constant 0 : index
    %0 = vector.load %arg1[%c0, %c0_0, %c0_1] : memref<1x8x128xf32, #tpu.memory_space<vmem>>, vector<1x8x128xf32>
    %1 = vector.shape_cast %0 : vector<1x8x128xf32> to vector<8x128xf32>
    %c0_2 = arith.constant 0 : index
    %c0_3 = arith.constant 0 : index
    %2 = vector.load %arg3[%c0_2, %c0_3] : memref<1x128xf32, #tpu.memory_space<vmem>>, vector<1x128xf32>
    %c0_4 = arith.constant 0 : index
    %c0_5 = arith.constant 0 : index
    %3 = vector.load %arg4[%c0_4, %c0_5] : memref<1x128xf32, #tpu.memory_space<vmem>>, vector<1x128xf32>
    %cst = arith.constant dense<0.000000e+00> : vector<8xf32>
    %4 = vector.multi_reduction <add>, %1, %cst [1] : vector<8x128xf32> to vector<8xf32>
    %5 = vector.shape_cast %4 : vector<8xf32> to vector<8x1xf32>
    %cst_6 = arith.constant 1.280000e+02 : f32
    %6 = vector.broadcast %cst_6 : f32 to vector<8x1xf32>
    %7 = arith.divf %5, %6 : vector<8x1xf32>
    %8 = vector.broadcast %7 : vector<8x1xf32> to vector<8x128xf32>
    %9 = arith.subf %1, %8 : vector<8x128xf32>
    %10 = arith.mulf %9, %9 : vector<8x128xf32>
    %cst_7 = arith.constant dense<0.000000e+00> : vector<8xf32>
    %11 = vector.multi_reduction <add>, %10, %cst_7 [1] : vector<8x128xf32> to vector<8xf32>
    %12 = vector.shape_cast %11 : vector<8xf32> to vector<8x1xf32>
    %cst_8 = arith.constant 1.280000e+02 : f32
    %13 = vector.broadcast %cst_8 : f32 to vector<8x1xf32>
    %14 = arith.divf %12, %13 : vector<8x1xf32>
    %15 = vector.broadcast %7 : vector<8x1xf32> to vector<8x128xf32>
    %16 = arith.subf %1, %15 : vector<8x128xf32>
    %cst_9 = arith.constant 9.99999996E-13 : f32
    %17 = vector.broadcast %cst_9 : f32 to vector<8x1xf32>
    %18 = arith.addf %14, %17 : vector<8x1xf32>
    %19 = math.rsqrt %18 : vector<8x1xf32>
    %20 = vector.broadcast %19 : vector<8x1xf32> to vector<8x128xf32>
    %21 = arith.mulf %16, %20 : vector<8x128xf32>
    %22 = vector.broadcast %2 : vector<1x128xf32> to vector<8x128xf32>
    %23 = arith.mulf %21, %22 : vector<8x128xf32>
    %24 = vector.broadcast %3 : vector<1x128xf32> to vector<8x128xf32>
    %25 = arith.addf %23, %24 : vector<8x128xf32>
    %c0_10 = arith.constant 0 : index
    %c0_11 = arith.constant 0 : index
    %c0_12 = arith.constant 0 : index
    %26 = vector.load %arg2[%c0_10, %c0_11, %c0_12] : memref<1x1x8xf32, #tpu.memory_space<vmem>>, vector<1x1x8xf32>
    %27 = vector.shape_cast %26 : vector<1x1x8xf32> to vector<1x8xf32>
    %28 = vector.shape_cast %27 : vector<1x8xf32> to vector<1x1x8xf32>
    %c0_i32 = arith.constant 0 : i32
    %29 = arith.truncf %25 : vector<8x128xf32> to vector<8x128xbf16>
    %30 = arith.index_cast %c0_i32 : i32 to index
    %c0_13 = arith.constant 0 : index
    %c0_14 = arith.constant 0 : index
    %31 = vector.load %arg5[%30, %c0_13, %c0_14] : memref<2x128x384xbf16, #tpu.memory_space<vmem>>, vector<1x128x384xbf16>
    %32 = vector.shape_cast %31 : vector<1x128x384xbf16> to vector<128x384xbf16>
    %cst_15 = arith.constant dense<0.000000e+00> : vector<8x384xf32>
    %33 = tpu.matmul %29, %32, %cst_15 {dimension_numbers = #tpu.dot_dimension_numbers<[1], [0], [0], [1], [0, 0, 1, 1], [], []>} : vector<8x128xbf16>, vector<128x384xbf16>, vector<8x384xf32> -> vector<8x384xf32>
    %34 = arith.index_cast %c0_i32 : i32 to index
    %c0_16 = arith.constant 0 : index
    %c0_17 = arith.constant 0 : index
    %35 = vector.load %arg6[%34, %c0_16, %c0_17] : memref<2x1x384xf32, #tpu.memory_space<vmem>>, vector<1x1x384xf32>
    %36 = vector.shape_cast %35 : vector<1x1x384xf32> to vector<1x384xf32>
    %37 = vector.broadcast %36 : vector<1x384xf32> to vector<8x384xf32>
    %38 = arith.addf %33, %37 : vector<8x384xf32>
    %39 = vector.extract_strided_slice %38 {offsets = [0, 0], sizes = [8, 128], strides = [1, 1]} : vector<8x384xf32> to vector<8x128xf32>
    %40 = vector.shape_cast %39 : vector<8x128xf32> to vector<8x4x32xf32>
    %41 = vector.extract_strided_slice %38 {offsets = [0, 128], sizes = [8, 128], strides = [1, 1]} : vector<8x384xf32> to vector<8x128xf32>
    %42 = vector.shape_cast %41 : vector<8x128xf32> to vector<8x4x32xf32>
    %43 = vector.extract_strided_slice %38 {offsets = [0, 256], sizes = [8, 128], strides = [1, 1]} : vector<8x384xf32> to vector<8x128xf32>
    %44 = vector.shape_cast %43 : vector<8x128xf32> to vector<8x4x32xf32>
    %45 = arith.truncf %40 : vector<8x4x32xf32> to vector<8x4x32xbf16>
    %46 = arith.truncf %42 : vector<8x4x32xf32> to vector<8x4x32xbf16>
    "tpu.trace_start"() <{level = 10 : i32, message = "qhd,khd->hqk"}> : () -> ()
    %cst_18 = arith.constant dense<0.000000e+00> : vector<4x8x8xf32>
    %47 = tpu.matmul %45, %46, %cst_18 {dimension_numbers = #tpu.dot_dimension_numbers<[2], [2], [0], [0], [0, 1, 0, 0, 1, 0], [1], [1]>} : vector<8x4x32xbf16>, vector<8x4x32xbf16>, vector<4x8x8xf32> -> vector<4x8x8xf32>
    "tpu.trace_stop"() : () -> ()
    %cst_19 = arith.constant 0.176776692 : f32
    %48 = vector.broadcast %cst_19 : f32 to vector<4x8x8xf32>
    %49 = arith.mulf %47, %48 : vector<4x8x8xf32>
    %50 = vector.broadcast %28 : vector<1x1x8xf32> to vector<4x8x8xf32>
    %51 = arith.addf %49, %50 : vector<4x8x8xf32>
    %cst_20 = arith.constant dense<0xFF800000> : vector<4x8xf32>
    %52 = vector.multi_reduction <maximumf>, %51, %cst_20 [2] : vector<4x8x8xf32> to vector<4x8xf32>
    %53 = vector.shape_cast %52 : vector<4x8xf32> to vector<4x8x1xf32>
    %54 = vector.broadcast %53 : vector<4x8x1xf32> to vector<4x8x8xf32>
    %55 = arith.subf %51, %54 : vector<4x8x8xf32>
    %56 = math.exp %55 : vector<4x8x8xf32>
    %cst_21 = arith.constant dense<0.000000e+00> : vector<4x8xf32>
    %57 = vector.multi_reduction <add>, %56, %cst_21 [2] : vector<4x8x8xf32> to vector<4x8xf32>
    %58 = vector.shape_cast %57 : vector<4x8xf32> to vector<4x8x1xf32>
    %cst_22 = arith.constant 9.99999968E-21 : f32
    %59 = vector.broadcast %cst_22 : f32 to vector<4x8x1xf32>
    %60 = arith.maximumf %58, %59 : vector<4x8x1xf32>
    %61 = tpu.reciprocal %60 {approx = true} : vector<4x8x1xf32> -> vector<4x8x1xf32>
    %62 = vector.broadcast %61 : vector<4x8x1xf32> to vector<4x8x8xf32>
    %63 = arith.mulf %56, %62 : vector<4x8x8xf32>
    %64 = arith.truncf %63 : vector<4x8x8xf32> to vector<4x8x8xbf16>
    %65 = arith.truncf %44 : vector<8x4x32xf32> to vector<8x4x32xbf16>
    "tpu.trace_start"() <{level = 10 : i32, message = "hqk,khd->qhd"}> : () -> ()
    %cst_23 = arith.constant dense<0.000000e+00> : vector<4x32x8xf32>
    %66 = tpu.matmul %65, %64, %cst_23 {dimension_numbers = #tpu.dot_dimension_numbers<[0], [2], [2], [1], [0, 1, 0, 2, 1, 1], [1], [0]>} : vector<8x4x32xbf16>, vector<4x8x8xbf16>, vector<4x32x8xf32> -> vector<4x32x8xf32>
    %67 = tpu.transpose %66, [2, 0, 1] : vector<4x32x8xf32> -> vector<8x4x32xf32>
    "tpu.trace_stop"() : () -> ()
    %68 = vector.shape_cast %67 : vector<8x4x32xf32> to vector<8x128xf32>
    %69 = arith.truncf %68 : vector<8x128xf32> to vector<8x128xbf16>
    %70 = arith.index_cast %c0_i32 : i32 to index
    %c0_24 = arith.constant 0 : index
    %c0_25 = arith.constant 0 : index
    %71 = vector.load %arg7[%70, %c0_24, %c0_25] : memref<2x128x128xbf16, #tpu.memory_space<vmem>>, vector<1x128x128xbf16>
    %72 = vector.shape_cast %71 : vector<1x128x128xbf16> to vector<128x128xbf16>
    %cst_26 = arith.constant dense<0.000000e+00> : vector<8x128xf32>
    %73 = tpu.matmul %69, %72, %cst_26 {dimension_numbers = #tpu.dot_dimension_numbers<[1], [0], [0], [1], [0, 0, 1, 1], [], []>} : vector<8x128xbf16>, vector<128x128xbf16>, vector<8x128xf32> -> vector<8x128xf32>
    %74 = arith.index_cast %c0_i32 : i32 to index
    %c0_27 = arith.constant 0 : index
    %c0_28 = arith.constant 0 : index
    %75 = vector.load %arg8[%74, %c0_27, %c0_28] : memref<2x1x128xf32, #tpu.memory_space<vmem>>, vector<1x1x128xf32>
    %76 = vector.shape_cast %75 : vector<1x1x128xf32> to vector<1x128xf32>
    %77 = vector.broadcast %76 : vector<1x128xf32> to vector<8x128xf32>
    %78 = arith.addf %73, %77 : vector<8x128xf32>
    %79 = arith.addf %25, %78 : vector<8x128xf32>
    %80 = arith.index_cast %c0_i32 : i32 to index
    %c0_29 = arith.constant 0 : index
    %c0_30 = arith.constant 0 : index
    %81 = vector.load %arg9[%80, %c0_29, %c0_30] : memref<2x1x128xf32, #tpu.memory_space<vmem>>, vector<1x1x128xf32>
    %82 = vector.shape_cast %81 : vector<1x1x128xf32> to vector<1x128xf32>
    %83 = arith.index_cast %c0_i32 : i32 to index
    %c0_31 = arith.constant 0 : index
    %c0_32 = arith.constant 0 : index
    %84 = vector.load %arg10[%83, %c0_31, %c0_32] : memref<2x1x128xf32, #tpu.memory_space<vmem>>, vector<1x1x128xf32>
    %85 = vector.shape_cast %84 : vector<1x1x128xf32> to vector<1x128xf32>
    %cst_33 = arith.constant dense<0.000000e+00> : vector<8xf32>
    %86 = vector.multi_reduction <add>, %79, %cst_33 [1] : vector<8x128xf32> to vector<8xf32>
    %87 = vector.shape_cast %86 : vector<8xf32> to vector<8x1xf32>
    %cst_34 = arith.constant 1.280000e+02 : f32
    %88 = vector.broadcast %cst_34 : f32 to vector<8x1xf32>
    %89 = arith.divf %87, %88 : vector<8x1xf32>
    %90 = vector.broadcast %89 : vector<8x1xf32> to vector<8x128xf32>
    %91 = arith.subf %79, %90 : vector<8x128xf32>
    %92 = arith.mulf %91, %91 : vector<8x128xf32>
    %cst_35 = arith.constant dense<0.000000e+00> : vector<8xf32>
    %93 = vector.multi_reduction <add>, %92, %cst_35 [1] : vector<8x128xf32> to vector<8xf32>
    %94 = vector.shape_cast %93 : vector<8xf32> to vector<8x1xf32>
    %cst_36 = arith.constant 1.280000e+02 : f32
    %95 = vector.broadcast %cst_36 : f32 to vector<8x1xf32>
    %96 = arith.divf %94, %95 : vector<8x1xf32>
    %97 = vector.broadcast %89 : vector<8x1xf32> to vector<8x128xf32>
    %98 = arith.subf %79, %97 : vector<8x128xf32>
    %cst_37 = arith.constant 9.99999996E-13 : f32
    %99 = vector.broadcast %cst_37 : f32 to vector<8x1xf32>
    %100 = arith.addf %96, %99 : vector<8x1xf32>
    %101 = math.rsqrt %100 : vector<8x1xf32>
    %102 = vector.broadcast %101 : vector<8x1xf32> to vector<8x128xf32>
    %103 = arith.mulf %98, %102 : vector<8x128xf32>
    %104 = vector.broadcast %82 : vector<1x128xf32> to vector<8x128xf32>
    %105 = arith.mulf %103, %104 : vector<8x128xf32>
    %106 = vector.broadcast %85 : vector<1x128xf32> to vector<8x128xf32>
    %107 = arith.addf %105, %106 : vector<8x128xf32>
    %108 = arith.truncf %107 : vector<8x128xf32> to vector<8x128xbf16>
    %109 = arith.index_cast %c0_i32 : i32 to index
    %c0_38 = arith.constant 0 : index
    %c0_39 = arith.constant 0 : index
    %110 = vector.load %arg11[%109, %c0_38, %c0_39] : memref<2x128x256xbf16, #tpu.memory_space<vmem>>, vector<1x128x256xbf16>
    %111 = vector.shape_cast %110 : vector<1x128x256xbf16> to vector<128x256xbf16>
    %cst_40 = arith.constant dense<0.000000e+00> : vector<8x256xf32>
    %112 = tpu.matmul %108, %111, %cst_40 {dimension_numbers = #tpu.dot_dimension_numbers<[1], [0], [0], [1], [0, 0, 1, 1], [], []>} : vector<8x128xbf16>, vector<128x256xbf16>, vector<8x256xf32> -> vector<8x256xf32>
    %113 = arith.index_cast %c0_i32 : i32 to index
    %c0_41 = arith.constant 0 : index
    %c0_42 = arith.constant 0 : index
    %114 = vector.load %arg12[%113, %c0_41, %c0_42] : memref<2x1x256xf32, #tpu.memory_space<vmem>>, vector<1x1x256xf32>
    %115 = vector.shape_cast %114 : vector<1x1x256xf32> to vector<1x256xf32>
    %116 = vector.broadcast %115 : vector<1x256xf32> to vector<8x256xf32>
    %117 = arith.addf %112, %116 : vector<8x256xf32>
    %cst_43 = arith.constant 5.000000e-01 : f32
    %118 = vector.broadcast %cst_43 : f32 to vector<8x256xf32>
    %119 = arith.mulf %118, %117 : vector<8x256xf32>
    %cst_44 = arith.constant 0.707106769 : f32
    %120 = vector.broadcast %cst_44 : f32 to vector<8x256xf32>
    %121 = arith.mulf %117, %120 : vector<8x256xf32>
    %122 = math.erf %121 : vector<8x256xf32>
    %cst_45 = arith.constant 1.000000e+00 : f32
    %123 = vector.broadcast %cst_45 : f32 to vector<8x256xf32>
    %124 = arith.addf %123, %122 : vector<8x256xf32>
    %125 = arith.mulf %119, %124 : vector<8x256xf32>
    %126 = arith.truncf %125 : vector<8x256xf32> to vector<8x256xbf16>
    %127 = arith.index_cast %c0_i32 : i32 to index
    %c0_46 = arith.constant 0 : index
    %c0_47 = arith.constant 0 : index
    %128 = vector.load %arg13[%127, %c0_46, %c0_47] : memref<2x256x128xbf16, #tpu.memory_space<vmem>>, vector<1x256x128xbf16>
    %129 = vector.shape_cast %128 : vector<1x256x128xbf16> to vector<256x128xbf16>
    %cst_48 = arith.constant dense<0.000000e+00> : vector<8x128xf32>
    %130 = tpu.matmul %126, %129, %cst_48 {dimension_numbers = #tpu.dot_dimension_numbers<[1], [0], [0], [1], [0, 0, 1, 1], [], []>} : vector<8x256xbf16>, vector<256x128xbf16>, vector<8x128xf32> -> vector<8x128xf32>
    %131 = arith.index_cast %c0_i32 : i32 to index
    %c0_49 = arith.constant 0 : index
    %c0_50 = arith.constant 0 : index
    %132 = vector.load %arg14[%131, %c0_49, %c0_50] : memref<2x1x128xf32, #tpu.memory_space<vmem>>, vector<1x1x128xf32>
    %133 = vector.shape_cast %132 : vector<1x1x128xf32> to vector<1x128xf32>
    %134 = vector.broadcast %133 : vector<1x128xf32> to vector<8x128xf32>
    %135 = arith.addf %130, %134 : vector<8x128xf32>
    %136 = arith.addf %107, %135 : vector<8x128xf32>
    %137 = arith.index_cast %c0_i32 : i32 to index
    %c0_51 = arith.constant 0 : index
    %c0_52 = arith.constant 0 : index
    %138 = vector.load %arg15[%137, %c0_51, %c0_52] : memref<2x1x128xf32, #tpu.memory_space<vmem>>, vector<1x1x128xf32>
    %139 = vector.shape_cast %138 : vector<1x1x128xf32> to vector<1x128xf32>
    %140 = arith.index_cast %c0_i32 : i32 to index
    %c0_53 = arith.constant 0 : index
    %c0_54 = arith.constant 0 : index
    %141 = vector.load %arg16[%140, %c0_53, %c0_54] : memref<2x1x128xf32, #tpu.memory_space<vmem>>, vector<1x1x128xf32>
    %142 = vector.shape_cast %141 : vector<1x1x128xf32> to vector<1x128xf32>
    %cst_55 = arith.constant dense<0.000000e+00> : vector<8xf32>
    %143 = vector.multi_reduction <add>, %136, %cst_55 [1] : vector<8x128xf32> to vector<8xf32>
    %144 = vector.shape_cast %143 : vector<8xf32> to vector<8x1xf32>
    %cst_56 = arith.constant 1.280000e+02 : f32
    %145 = vector.broadcast %cst_56 : f32 to vector<8x1xf32>
    %146 = arith.divf %144, %145 : vector<8x1xf32>
    %147 = vector.broadcast %146 : vector<8x1xf32> to vector<8x128xf32>
    %148 = arith.subf %136, %147 : vector<8x128xf32>
    %149 = arith.mulf %148, %148 : vector<8x128xf32>
    %cst_57 = arith.constant dense<0.000000e+00> : vector<8xf32>
    %150 = vector.multi_reduction <add>, %149, %cst_57 [1] : vector<8x128xf32> to vector<8xf32>
    %151 = vector.shape_cast %150 : vector<8xf32> to vector<8x1xf32>
    %cst_58 = arith.constant 1.280000e+02 : f32
    %152 = vector.broadcast %cst_58 : f32 to vector<8x1xf32>
    %153 = arith.divf %151, %152 : vector<8x1xf32>
    %154 = vector.broadcast %146 : vector<8x1xf32> to vector<8x128xf32>
    %155 = arith.subf %136, %154 : vector<8x128xf32>
    %cst_59 = arith.constant 9.99999996E-13 : f32
    %156 = vector.broadcast %cst_59 : f32 to vector<8x1xf32>
    %157 = arith.addf %153, %156 : vector<8x1xf32>
    %158 = math.rsqrt %157 : vector<8x1xf32>
    %159 = vector.broadcast %158 : vector<8x1xf32> to vector<8x128xf32>
    %160 = arith.mulf %155, %159 : vector<8x128xf32>
    %161 = vector.broadcast %139 : vector<1x128xf32> to vector<8x128xf32>
    %162 = arith.mulf %160, %161 : vector<8x128xf32>
    %163 = vector.broadcast %142 : vector<1x128xf32> to vector<8x128xf32>
    %164 = arith.addf %162, %163 : vector<8x128xf32>
    %c1_i32 = arith.constant 1 : i32
    %165 = arith.truncf %164 : vector<8x128xf32> to vector<8x128xbf16>
    %166 = arith.index_cast %c1_i32 : i32 to index
    %c0_60 = arith.constant 0 : index
    %c0_61 = arith.constant 0 : index
    %167 = vector.load %arg5[%166, %c0_60, %c0_61] : memref<2x128x384xbf16, #tpu.memory_space<vmem>>, vector<1x128x384xbf16>
    %168 = vector.shape_cast %167 : vector<1x128x384xbf16> to vector<128x384xbf16>
    %cst_62 = arith.constant dense<0.000000e+00> : vector<8x384xf32>
    %169 = tpu.matmul %165, %168, %cst_62 {dimension_numbers = #tpu.dot_dimension_numbers<[1], [0], [0], [1], [0, 0, 1, 1], [], []>} : vector<8x128xbf16>, vector<128x384xbf16>, vector<8x384xf32> -> vector<8x384xf32>
    %170 = arith.index_cast %c1_i32 : i32 to index
    %c0_63 = arith.constant 0 : index
    %c0_64 = arith.constant 0 : index
    %171 = vector.load %arg6[%170, %c0_63, %c0_64] : memref<2x1x384xf32, #tpu.memory_space<vmem>>, vector<1x1x384xf32>
    %172 = vector.shape_cast %171 : vector<1x1x384xf32> to vector<1x384xf32>
    %173 = vector.broadcast %172 : vector<1x384xf32> to vector<8x384xf32>
    %174 = arith.addf %169, %173 : vector<8x384xf32>
    %175 = vector.extract_strided_slice %174 {offsets = [0, 0], sizes = [8, 128], strides = [1, 1]} : vector<8x384xf32> to vector<8x128xf32>
    %176 = vector.shape_cast %175 : vector<8x128xf32> to vector<8x4x32xf32>
    %177 = vector.extract_strided_slice %174 {offsets = [0, 128], sizes = [8, 128], strides = [1, 1]} : vector<8x384xf32> to vector<8x128xf32>
    %178 = vector.shape_cast %177 : vector<8x128xf32> to vector<8x4x32xf32>
    %179 = vector.extract_strided_slice %174 {offsets = [0, 256], sizes = [8, 128], strides = [1, 1]} : vector<8x384xf32> to vector<8x128xf32>
    %180 = vector.shape_cast %179 : vector<8x128xf32> to vector<8x4x32xf32>
    %181 = arith.truncf %176 : vector<8x4x32xf32> to vector<8x4x32xbf16>
    %182 = arith.truncf %178 : vector<8x4x32xf32> to vector<8x4x32xbf16>
    "tpu.trace_start"() <{level = 10 : i32, message = "qhd,khd->hqk"}> : () -> ()
    %cst_65 = arith.constant dense<0.000000e+00> : vector<4x8x8xf32>
    %183 = tpu.matmul %181, %182, %cst_65 {dimension_numbers = #tpu.dot_dimension_numbers<[2], [2], [0], [0], [0, 1, 0, 0, 1, 0], [1], [1]>} : vector<8x4x32xbf16>, vector<8x4x32xbf16>, vector<4x8x8xf32> -> vector<4x8x8xf32>
    "tpu.trace_stop"() : () -> ()
    %cst_66 = arith.constant 0.176776692 : f32
    %184 = vector.broadcast %cst_66 : f32 to vector<4x8x8xf32>
    %185 = arith.mulf %183, %184 : vector<4x8x8xf32>
    %186 = vector.broadcast %28 : vector<1x1x8xf32> to vector<4x8x8xf32>
    %187 = arith.addf %185, %186 : vector<4x8x8xf32>
    %cst_67 = arith.constant dense<0xFF800000> : vector<4x8xf32>
    %188 = vector.multi_reduction <maximumf>, %187, %cst_67 [2] : vector<4x8x8xf32> to vector<4x8xf32>
    %189 = vector.shape_cast %188 : vector<4x8xf32> to vector<4x8x1xf32>
    %190 = vector.broadcast %189 : vector<4x8x1xf32> to vector<4x8x8xf32>
    %191 = arith.subf %187, %190 : vector<4x8x8xf32>
    %192 = math.exp %191 : vector<4x8x8xf32>
    %cst_68 = arith.constant dense<0.000000e+00> : vector<4x8xf32>
    %193 = vector.multi_reduction <add>, %192, %cst_68 [2] : vector<4x8x8xf32> to vector<4x8xf32>
    %194 = vector.shape_cast %193 : vector<4x8xf32> to vector<4x8x1xf32>
    %cst_69 = arith.constant 9.99999968E-21 : f32
    %195 = vector.broadcast %cst_69 : f32 to vector<4x8x1xf32>
    %196 = arith.maximumf %194, %195 : vector<4x8x1xf32>
    %197 = tpu.reciprocal %196 {approx = true} : vector<4x8x1xf32> -> vector<4x8x1xf32>
    %198 = vector.broadcast %197 : vector<4x8x1xf32> to vector<4x8x8xf32>
    %199 = arith.mulf %192, %198 : vector<4x8x8xf32>
    %200 = arith.truncf %199 : vector<4x8x8xf32> to vector<4x8x8xbf16>
    %201 = arith.truncf %180 : vector<8x4x32xf32> to vector<8x4x32xbf16>
    "tpu.trace_start"() <{level = 10 : i32, message = "hqk,khd->qhd"}> : () -> ()
    %cst_70 = arith.constant dense<0.000000e+00> : vector<4x32x8xf32>
    %202 = tpu.matmul %201, %200, %cst_70 {dimension_numbers = #tpu.dot_dimension_numbers<[0], [2], [2], [1], [0, 1, 0, 2, 1, 1], [1], [0]>} : vector<8x4x32xbf16>, vector<4x8x8xbf16>, vector<4x32x8xf32> -> vector<4x32x8xf32>
    %203 = tpu.transpose %202, [2, 0, 1] : vector<4x32x8xf32> -> vector<8x4x32xf32>
    "tpu.trace_stop"() : () -> ()
    %204 = vector.shape_cast %203 : vector<8x4x32xf32> to vector<8x128xf32>
    %205 = arith.truncf %204 : vector<8x128xf32> to vector<8x128xbf16>
    %206 = arith.index_cast %c1_i32 : i32 to index
    %c0_71 = arith.constant 0 : index
    %c0_72 = arith.constant 0 : index
    %207 = vector.load %arg7[%206, %c0_71, %c0_72] : memref<2x128x128xbf16, #tpu.memory_space<vmem>>, vector<1x128x128xbf16>
    %208 = vector.shape_cast %207 : vector<1x128x128xbf16> to vector<128x128xbf16>
    %cst_73 = arith.constant dense<0.000000e+00> : vector<8x128xf32>
    %209 = tpu.matmul %205, %208, %cst_73 {dimension_numbers = #tpu.dot_dimension_numbers<[1], [0], [0], [1], [0, 0, 1, 1], [], []>} : vector<8x128xbf16>, vector<128x128xbf16>, vector<8x128xf32> -> vector<8x128xf32>
    %210 = arith.index_cast %c1_i32 : i32 to index
    %c0_74 = arith.constant 0 : index
    %c0_75 = arith.constant 0 : index
    %211 = vector.load %arg8[%210, %c0_74, %c0_75] : memref<2x1x128xf32, #tpu.memory_space<vmem>>, vector<1x1x128xf32>
    %212 = vector.shape_cast %211 : vector<1x1x128xf32> to vector<1x128xf32>
    %213 = vector.broadcast %212 : vector<1x128xf32> to vector<8x128xf32>
    %214 = arith.addf %209, %213 : vector<8x128xf32>
    %215 = arith.addf %164, %214 : vector<8x128xf32>
    %216 = arith.index_cast %c1_i32 : i32 to index
    %c0_76 = arith.constant 0 : index
    %c0_77 = arith.constant 0 : index
    %217 = vector.load %arg9[%216, %c0_76, %c0_77] : memref<2x1x128xf32, #tpu.memory_space<vmem>>, vector<1x1x128xf32>
    %218 = vector.shape_cast %217 : vector<1x1x128xf32> to vector<1x128xf32>
    %219 = arith.index_cast %c1_i32 : i32 to index
    %c0_78 = arith.constant 0 : index
    %c0_79 = arith.constant 0 : index
    %220 = vector.load %arg10[%219, %c0_78, %c0_79] : memref<2x1x128xf32, #tpu.memory_space<vmem>>, vector<1x1x128xf32>
    %221 = vector.shape_cast %220 : vector<1x1x128xf32> to vector<1x128xf32>
    %cst_80 = arith.constant dense<0.000000e+00> : vector<8xf32>
    %222 = vector.multi_reduction <add>, %215, %cst_80 [1] : vector<8x128xf32> to vector<8xf32>
    %223 = vector.shape_cast %222 : vector<8xf32> to vector<8x1xf32>
    %cst_81 = arith.constant 1.280000e+02 : f32
    %224 = vector.broadcast %cst_81 : f32 to vector<8x1xf32>
    %225 = arith.divf %223, %224 : vector<8x1xf32>
    %226 = vector.broadcast %225 : vector<8x1xf32> to vector<8x128xf32>
    %227 = arith.subf %215, %226 : vector<8x128xf32>
    %228 = arith.mulf %227, %227 : vector<8x128xf32>
    %cst_82 = arith.constant dense<0.000000e+00> : vector<8xf32>
    %229 = vector.multi_reduction <add>, %228, %cst_82 [1] : vector<8x128xf32> to vector<8xf32>
    %230 = vector.shape_cast %229 : vector<8xf32> to vector<8x1xf32>
    %cst_83 = arith.constant 1.280000e+02 : f32
    %231 = vector.broadcast %cst_83 : f32 to vector<8x1xf32>
    %232 = arith.divf %230, %231 : vector<8x1xf32>
    %233 = vector.broadcast %225 : vector<8x1xf32> to vector<8x128xf32>
    %234 = arith.subf %215, %233 : vector<8x128xf32>
    %cst_84 = arith.constant 9.99999996E-13 : f32
    %235 = vector.broadcast %cst_84 : f32 to vector<8x1xf32>
    %236 = arith.addf %232, %235 : vector<8x1xf32>
    %237 = math.rsqrt %236 : vector<8x1xf32>
    %238 = vector.broadcast %237 : vector<8x1xf32> to vector<8x128xf32>
    %239 = arith.mulf %234, %238 : vector<8x128xf32>
    %240 = vector.broadcast %218 : vector<1x128xf32> to vector<8x128xf32>
    %241 = arith.mulf %239, %240 : vector<8x128xf32>
    %242 = vector.broadcast %221 : vector<1x128xf32> to vector<8x128xf32>
    %243 = arith.addf %241, %242 : vector<8x128xf32>
    %244 = arith.truncf %243 : vector<8x128xf32> to vector<8x128xbf16>
    %245 = arith.index_cast %c1_i32 : i32 to index
    %c0_85 = arith.constant 0 : index
    %c0_86 = arith.constant 0 : index
    %246 = vector.load %arg11[%245, %c0_85, %c0_86] : memref<2x128x256xbf16, #tpu.memory_space<vmem>>, vector<1x128x256xbf16>
    %247 = vector.shape_cast %246 : vector<1x128x256xbf16> to vector<128x256xbf16>
    %cst_87 = arith.constant dense<0.000000e+00> : vector<8x256xf32>
    %248 = tpu.matmul %244, %247, %cst_87 {dimension_numbers = #tpu.dot_dimension_numbers<[1], [0], [0], [1], [0, 0, 1, 1], [], []>} : vector<8x128xbf16>, vector<128x256xbf16>, vector<8x256xf32> -> vector<8x256xf32>
    %249 = arith.index_cast %c1_i32 : i32 to index
    %c0_88 = arith.constant 0 : index
    %c0_89 = arith.constant 0 : index
    %250 = vector.load %arg12[%249, %c0_88, %c0_89] : memref<2x1x256xf32, #tpu.memory_space<vmem>>, vector<1x1x256xf32>
    %251 = vector.shape_cast %250 : vector<1x1x256xf32> to vector<1x256xf32>
    %252 = vector.broadcast %251 : vector<1x256xf32> to vector<8x256xf32>
    %253 = arith.addf %248, %252 : vector<8x256xf32>
    %cst_90 = arith.constant 5.000000e-01 : f32
    %254 = vector.broadcast %cst_90 : f32 to vector<8x256xf32>
    %255 = arith.mulf %254, %253 : vector<8x256xf32>
    %cst_91 = arith.constant 0.707106769 : f32
    %256 = vector.broadcast %cst_91 : f32 to vector<8x256xf32>
    %257 = arith.mulf %253, %256 : vector<8x256xf32>
    %258 = math.erf %257 : vector<8x256xf32>
    %cst_92 = arith.constant 1.000000e+00 : f32
    %259 = vector.broadcast %cst_92 : f32 to vector<8x256xf32>
    %260 = arith.addf %259, %258 : vector<8x256xf32>
    %261 = arith.mulf %255, %260 : vector<8x256xf32>
    %262 = arith.truncf %261 : vector<8x256xf32> to vector<8x256xbf16>
    %263 = arith.index_cast %c1_i32 : i32 to index
    %c0_93 = arith.constant 0 : index
    %c0_94 = arith.constant 0 : index
    %264 = vector.load %arg13[%263, %c0_93, %c0_94] : memref<2x256x128xbf16, #tpu.memory_space<vmem>>, vector<1x256x128xbf16>
    %265 = vector.shape_cast %264 : vector<1x256x128xbf16> to vector<256x128xbf16>
    %cst_95 = arith.constant dense<0.000000e+00> : vector<8x128xf32>
    %266 = tpu.matmul %262, %265, %cst_95 {dimension_numbers = #tpu.dot_dimension_numbers<[1], [0], [0], [1], [0, 0, 1, 1], [], []>} : vector<8x256xbf16>, vector<256x128xbf16>, vector<8x128xf32> -> vector<8x128xf32>
    %267 = arith.index_cast %c1_i32 : i32 to index
    %c0_96 = arith.constant 0 : index
    %c0_97 = arith.constant 0 : index
    %268 = vector.load %arg14[%267, %c0_96, %c0_97] : memref<2x1x128xf32, #tpu.memory_space<vmem>>, vector<1x1x128xf32>
    %269 = vector.shape_cast %268 : vector<1x1x128xf32> to vector<1x128xf32>
    %270 = vector.broadcast %269 : vector<1x128xf32> to vector<8x128xf32>
    %271 = arith.addf %266, %270 : vector<8x128xf32>
    %272 = arith.addf %243, %271 : vector<8x128xf32>
    %273 = arith.index_cast %c1_i32 : i32 to index
    %c0_98 = arith.constant 0 : index
    %c0_99 = arith.constant 0 : index
    %274 = vector.load %arg15[%273, %c0_98, %c0_99] : memref<2x1x128xf32, #tpu.memory_space<vmem>>, vector<1x1x128xf32>
    %275 = vector.shape_cast %274 : vector<1x1x128xf32> to vector<1x128xf32>
    %276 = arith.index_cast %c1_i32 : i32 to index
    %c0_100 = arith.constant 0 : index
    %c0_101 = arith.constant 0 : index
    %277 = vector.load %arg16[%276, %c0_100, %c0_101] : memref<2x1x128xf32, #tpu.memory_space<vmem>>, vector<1x1x128xf32>
    %278 = vector.shape_cast %277 : vector<1x1x128xf32> to vector<1x128xf32>
    %cst_102 = arith.constant dense<0.000000e+00> : vector<8xf32>
    %279 = vector.multi_reduction <add>, %272, %cst_102 [1] : vector<8x128xf32> to vector<8xf32>
    %280 = vector.shape_cast %279 : vector<8xf32> to vector<8x1xf32>
    %cst_103 = arith.constant 1.280000e+02 : f32
    %281 = vector.broadcast %cst_103 : f32 to vector<8x1xf32>
    %282 = arith.divf %280, %281 : vector<8x1xf32>
    %283 = vector.broadcast %282 : vector<8x1xf32> to vector<8x128xf32>
    %284 = arith.subf %272, %283 : vector<8x128xf32>
    %285 = arith.mulf %284, %284 : vector<8x128xf32>
    %cst_104 = arith.constant dense<0.000000e+00> : vector<8xf32>
    %286 = vector.multi_reduction <add>, %285, %cst_104 [1] : vector<8x128xf32> to vector<8xf32>
    %287 = vector.shape_cast %286 : vector<8xf32> to vector<8x1xf32>
    %cst_105 = arith.constant 1.280000e+02 : f32
    %288 = vector.broadcast %cst_105 : f32 to vector<8x1xf32>
    %289 = arith.divf %287, %288 : vector<8x1xf32>
    %290 = vector.broadcast %282 : vector<8x1xf32> to vector<8x128xf32>
    %291 = arith.subf %272, %290 : vector<8x128xf32>
    %cst_106 = arith.constant 9.99999996E-13 : f32
    %292 = vector.broadcast %cst_106 : f32 to vector<8x1xf32>
    %293 = arith.addf %289, %292 : vector<8x1xf32>
    %294 = math.rsqrt %293 : vector<8x1xf32>
    %295 = vector.broadcast %294 : vector<8x1xf32> to vector<8x128xf32>
    %296 = arith.mulf %291, %295 : vector<8x128xf32>
    %297 = vector.broadcast %275 : vector<1x128xf32> to vector<8x128xf32>
    %298 = arith.mulf %296, %297 : vector<8x128xf32>
    %299 = vector.broadcast %278 : vector<1x128xf32> to vector<8x128xf32>
    %300 = arith.addf %298, %299 : vector<8x128xf32>
    %c2_i32 = arith.constant 2 : i32
    %301 = vector.extract_strided_slice %300 {offsets = [0, 0], sizes = [1, 128], strides = [1, 1]} : vector<8x128xf32> to vector<1x128xf32>
    %302 = arith.truncf %301 : vector<1x128xf32> to vector<1x128xbf16>
    %c0_107 = arith.constant 0 : index
    %c0_108 = arith.constant 0 : index
    %303 = vector.load %arg17[%c0_107, %c0_108] : memref<128x128xbf16, #tpu.memory_space<vmem>>, vector<128x128xbf16>
    %cst_109 = arith.constant dense<0.000000e+00> : vector<1x128xf32>
    %304 = tpu.matmul %302, %303, %cst_109 {dimension_numbers = #tpu.dot_dimension_numbers<[1], [0], [0], [1], [0, 0, 1, 1], [], []>} : vector<1x128xbf16>, vector<128x128xbf16>, vector<1x128xf32> -> vector<1x128xf32>
    %c0_110 = arith.constant 0 : index
    %c0_111 = arith.constant 0 : index
    %305 = vector.load %arg18[%c0_110, %c0_111] : memref<1x128xf32, #tpu.memory_space<vmem>>, vector<1x128xf32>
    %306 = arith.addf %304, %305 : vector<1x128xf32>
    %307 = math.tanh %306 : vector<1x128xf32>
    %c0_112 = arith.constant 0 : index
    %c0_113 = arith.constant 0 : index
    %c0_114 = arith.constant 0 : index
    %308 = vector.load %arg19[%c0_112, %c0_113, %c0_114] : memref<1x1x128xf32, #tpu.memory_space<vmem>>, vector<1x1x128xf32>
    %309 = vector.shape_cast %308 : vector<1x1x128xf32> to vector<1x128xf32>
    %310 = vector.shape_cast %307 : vector<1x128xf32> to vector<1x1x128xf32>
    tpu.vector_store %arg19[%c0_112, %c0_113, %c0_114], %310 {strides = array<i32>} : memref<1x1x128xf32, #tpu.memory_space<vmem>>, vector<1x1x128xf32>,
    return
  }
  func.func @transform_0(%arg0: i32) -> (i32, i32, i32) {
    %c0_i32 = arith.constant 0 : i32
    %c0_i32_0 = arith.constant 0 : i32
    %c0_i32_1 = arith.constant 0 : i32
    return %arg0, %c0_i32, %c0_i32_0 : i32, i32, i32
  }
  func.func @transform_1(%arg0: i32) -> (i32, i32, i32) {
    %c0_i32 = arith.constant 0 : i32
    %c0_i32_0 = arith.constant 0 : i32
    %c0_i32_1 = arith.constant 0 : i32
    return %arg0, %c0_i32, %c0_i32_0 : i32, i32, i32
  }
  func.func @transform_2(%arg0: i32) -> (i32, i32) {
    %c0_i32 = arith.constant 0 : i32
    %c0_i32_0 = arith.constant 0 : i32
    %c0_i32_1 = arith.constant 0 : i32
    return %c0_i32, %c0_i32_0 : i32, i32
  }
  func.func @transform_3(%arg0: i32) -> (i32, i32) {
    %c0_i32 = arith.constant 0 : i32
    %c0_i32_0 = arith.constant 0 : i32
    %c0_i32_1 = arith.constant 0 : i32
    return %c0_i32, %c0_i32_0 : i32, i32
  }
  func.func @transform_4(%arg0: i32) -> (i32, i32, i32) {
    %c0_i32 = arith.constant 0 : i32
    %c0_i32_0 = arith.constant 0 : i32
    %c0_i32_1 = arith.constant 0 : i32
    %c0_i32_2 = arith.constant 0 : i32
    return %c0_i32, %c0_i32_0, %c0_i32_1 : i32, i32, i32
  }
  func.func @transform_5(%arg0: i32) -> (i32, i32, i32) {
    %c0_i32 = arith.constant 0 : i32
    %c0_i32_0 = arith.constant 0 : i32
    %c0_i32_1 = arith.constant 0 : i32
    %c0_i32_2 = arith.constant 0 : i32
    return %c0_i32, %c0_i32_0, %c0_i32_1 : i32, i32, i32
  }
  func.func @transform_6(%arg0: i32) -> (i32, i32, i32) {
    %c0_i32 = arith.constant 0 : i32
    %c0_i32_0 = arith.constant 0 : i32
    %c0_i32_1 = arith.constant 0 : i32
    %c0_i32_2 = arith.constant 0 : i32
    return %c0_i32, %c0_i32_0, %c0_i32_1 : i32, i32, i32
  }
  func.func @transform_7(%arg0: i32) -> (i32, i32, i32) {
    %c0_i32 = arith.constant 0 : i32
    %c0_i32_0 = arith.constant 0 : i32
    %c0_i32_1 = arith.constant 0 : i32
    %c0_i32_2 = arith.constant 0 : i32
    return %c0_i32, %c0_i32_0, %c0_i32_1 : i32, i32, i32
  }
  func.func @transform_8(%arg0: i32) -> (i32, i32, i32) {
    %c0_i32 = arith.constant 0 : i32
    %c0_i32_0 = arith.constant 0 : i32
    %c0_i32_1 = arith.constant 0 : i32
    %c0_i32_2 = arith.constant 0 : i32
    return %c0_i32, %c0_i32_0, %c0_i32_1 : i32, i32, i32
  }
  func.func @transform_9(%arg0: i32) -> (i32, i32, i32) {
    %c0_i32 = arith.constant 0 : i32
    %c0_i32_0 = arith.constant 0 : i32
    %c0_i32_1 = arith.constant 0 : i32
    %c0_i32_2 = arith.constant 0 : i32
    return %c0_i32, %c0_i32_0, %c0_i32_1 : i32, i32, i32
  }
  func.func @transform_10(%arg0: i32) -> (i32, i32, i32) {
    %c0_i32 = arith.constant 0 : i32
    %c0_i32_0 = arith.constant 0 : i32
    %c0_i32_1 = arith.constant 0 : i32
    %c0_i32_2 = arith.constant 0 : i32
    return %c0_i32, %c0_i32_0, %c0_i32_1 : i32, i32, i32
  }
  func.func @transform_11(%arg0: i32) -> (i32, i32, i32) {
    %c0_i32 = arith.constant 0 : i32
    %c0_i32_0 = arith.constant 0 : i32
    %c0_i32_1 = arith.constant 0 : i32
    %c0_i32_2 = arith.constant 0 : i32
    return %c0_i32, %c0_i32_0, %c0_i32_1 : i32, i32, i32
  }
  func.func @transform_12(%arg0: i32) -> (i32, i32, i32) {
    %c0_i32 = arith.constant 0 : i32
    %c0_i32_0 = arith.constant 0 : i32
    %c0_i32_1 = arith.constant 0 : i32
    %c0_i32_2 = arith.constant 0 : i32
    return %c0_i32, %c0_i32_0, %c0_i32_1 : i32, i32, i32
  }
  func.func @transform_13(%arg0: i32) -> (i32, i32, i32) {
    %c0_i32 = arith.constant 0 : i32
    %c0_i32_0 = arith.constant 0 : i32
    %c0_i32_1 = arith.constant 0 : i32
    %c0_i32_2 = arith.constant 0 : i32
    return %c0_i32, %c0_i32_0, %c0_i32_1 : i32, i32, i32
  }
  func.func @transform_14(%arg0: i32) -> (i32, i32, i32) {
    %c0_i32 = arith.constant 0 : i32
    %c0_i32_0 = arith.constant 0 : i32
    %c0_i32_1 = arith.constant 0 : i32
    %c0_i32_2 = arith.constant 0 : i32
    return %c0_i32, %c0_i32_0, %c0_i32_1 : i32, i32, i32
  }
  func.func @transform_15(%arg0: i32) -> (i32, i32, i32) {
    %c0_i32 = arith.constant 0 : i32
    %c0_i32_0 = arith.constant 0 : i32
    %c0_i32_1 = arith.constant 0 : i32
    %c0_i32_2 = arith.constant 0 : i32
    return %c0_i32, %c0_i32_0, %c0_i32_1 : i32, i32, i32
  }
  func.func @transform_16(%arg0: i32) -> (i32, i32) {
    %c0_i32 = arith.constant 0 : i32
    %c0_i32_0 = arith.constant 0 : i32
    %c0_i32_1 = arith.constant 0 : i32
    return %c0_i32, %c0_i32_0 : i32, i32
  }
  func.func @transform_17(%arg0: i32) -> (i32, i32) {
    %c0_i32 = arith.constant 0 : i32
    %c0_i32_0 = arith.constant 0 : i32
    %c0_i32_1 = arith.constant 0 : i32
    return %c0_i32, %c0_i32_0 : i32, i32
  }
  func.func @transform_18(%arg0: i32) -> (i32, i32, i32) {
    %c0_i32 = arith.constant 0 : i32
    %c0_i32_0 = arith.constant 0 : i32
    %c0_i32_1 = arith.constant 0 : i32
    return %arg0, %c0_i32, %c0_i32_0 : i32, i32, i32
  }
}

</mosaic_0001>

<bundles_post_ra>
// kernel: tpu_custom_call.1
= control target key start
LH: loop header
LB: loop body
LE: loop exit
PB: predicated region body
PF: predicated region fallthrough
CT: control target
= control target key end

     0   :  { %s12409_s0 = inlined_call_operand.hbm [shape: f32[2,8,128], index: 0, kind: input, shape index: {}]   ;;  %s12410_s1 = inlined_call_operand.hbm [shape: f32[2,1,8], index: 1, kind: input, shape index: {}]   ;;  %s12411_s2 = inlined_call_operand.hbm [shape: f32[1,128], index: 2, kind: input, shape index: {}]   ;;  %s12412_s3 = inlined_call_operand.hbm [shape: f32[1,128], index: 3, kind: input, shape index: {}]   ;;  %s12413_s4 = inlined_call_operand.hbm [shape: bf16[2,128,384], index: 4, kind: input, shape index: {}]   ;;  %s12414_s5 = inlined_call_operand.vmem [shape: f32[2,1,384], index: 5, kind: input, shape index: {}]   ;;  %s12415_s6 = inlined_call_operand.hbm [shape: bf16[2,128,128], index: 6, kind: input, shape index: {}]   ;;  %s12416_s7 = inlined_call_operand.vmem [shape: f32[2,1,128], index: 7, kind: input, shape index: {}]   ;;  %s12417_s8 = inlined_call_operand.vmem [shape: f32[2,1,128], index: 8, kind: input, shape index: {}]   ;;  %s12418_s9 = inlined_call_operand.vmem [shape: f32[2,1,128], index: 9, kind: input, shape index: {}]   ;;  %s12419_s10 = inlined_call_operand.hbm [shape: bf16[2,128,256], index: 10, kind: input, shape index: {}]   ;;  %s12420_s11 = inlined_call_operand.vmem [shape: f32[2,1,256], index: 11, kind: input, shape index: {}]   ;;  %s12421_s12 = inlined_call_operand.hbm [shape: bf16[2,256,128], index: 12, kind: input, shape index: {}]   ;;  %s12422_s13 = inlined_call_operand.vmem [shape: f32[2,1,128], index: 13, kind: input, shape index: {}]   ;;  %s12423_s14 = inlined_call_operand.vmem [shape: f32[2,1,128], index: 14, kind: input, shape index: {}]   ;;  %s12424_s15 = inlined_call_operand.vmem [shape: f32[2,1,128], index: 15, kind: input, shape index: {}]   ;;  %s12425_s16 = inlined_call_operand.hbm [shape: bf16[128,128], index: 16, kind: input, shape index: {}]   ;;  %s12426_s17 = inlined_call_operand.vmem [shape: f32[1,128], index: 17, kind: input, shape index: {}]   ;;  %s12427_s18 = inlined_call_operand.hbm [shape: f32[2,1,128], index: 18, kind: output, shape index: {}]  }
   0x1   :  { %12446 = sst [smem:[#allocation25_spill]] %s12409_s0 }
   0x2   :  { %12447 = sst [smem:[#allocation26_spill]] %s12410_s1 }
   0x3   :  { %12448 = sst [smem:[#allocation27_spill]] %s12411_s2 }
   0x4   :  { %12449 = sst [smem:[#allocation28_spill]] %s12412_s3 }
   0x5   :  { %12450 = sst [smem:[#allocation29_spill]] %s12413_s4 }
   0x6   :  { %12451 = sst [smem:[#allocation30_spill]] %s12415_s6 }
   0x7   :  { %12452 = sst [smem:[#allocation31_spill]] %s12417_s8 }
   0x8   :  { %12453 = sst [smem:[#allocation32_spill]] %s12418_s9 }
   0x9   :  { %12454 = sst [smem:[#allocation33_spill]] %s12419_s10 }
   0xa   :  { %12455 = sst [smem:[#allocation34_spill]] %s12420_s11 }
   0xb   :  { %12456 = sst [smem:[#allocation35_spill]] %s12422_s13 }
   0xc   :  { %12457 = sst [smem:[#allocation36_spill]] %s12423_s14 }
   0xd   :  { %12458 = sst [smem:[#allocation37_spill]] %s12424_s15 }
   0xe   :  { %12459 = sst [smem:[#allocation38_spill]] %s12426_s17 }
   0xf   :  { %12460 = sst [smem:[#allocation39_spill]] %s12427_s18 }
  0x10   :  { %23 = vsyncpa [#allocation3], 0 }
  0x11   :  { %25 = vsyncpa [#allocation3 + $0x1], 0 }
  0x12   :  { %26 = vsyncpa [#allocation6], 0 }
  0x13   :  { %28 = vsyncpa [#allocation6 + $0x1], 0 }
  0x14   :  { %29 = vsyncpa [#allocation9], 0 }
  0x15   :  { %30 = vsyncpa [#allocation12], 0 }
  0x16   :  { %31 = vsyncpa [#allocation15], 0 }
  0x17   :  { %32 = vsyncpa [#allocation4], 0 }
  0x18   :  { %34 = vsyncpa [#allocation4 + $0x1], 0  ;;  %s10914_s27 = smov 0   ;;  %s10916_s28 = smov 0  }
  0x19   :  { %s10918_s29 = smov 0   ;;  %s10920_s30 = smov 0  }
  0x1a LB: > { %s10795_s0 = smov [#allocation7]   ;;  %s10935_s1 = sadd.s32 4294967295, %s10793_s30   ;;  %s10793_s30 = sphi %s10920_s30, %s12502_s30   ;;  %s10789_s29 = sphi %s10918_s29, %s12501_s29   ;;  %s10785_s28 = sphi %s10916_s28, %s12500_s28   ;;  %s10781_s27 = sphi %s10914_s27, %s12499_s27  }
  0x1b   : > { %s472_s19 = sshll.u32 %s10795_s0, 4  ;;  %p9518_p0 = scmp.ge.s32.totalorder %s10793_s30, 1  ;;  %s10940_s19 = int_to_ptr.vmem [resolvable:$true] %s472_s19 }
  0x1c   : > { %p12439_p1 = scmp.eq.s32.totalorder %s10935_s1, 0  ;;  %p459_p2 = scmp.lt.s32.totalorder %s10793_s30, 3 }
  0x1d   : > { %s10796_s21 = smov [#allocation8]   ;;  %s10797_s2 = smov [#allocation11]  }
  0x1e   : > { %p10942_p3 = pnand %p9518_p0, %p459_p2  ;;  %s483_s22 = sshll.u32 %s10796_s21, 4  ;;  %s10949_s22 = int_to_ptr.vmem [resolvable:$true] %s483_s22 }
  0x1f   : > { %s509_s23 = sshll.u32 %s10797_s2, 4  ;;  %s12463_s0 = sld [smem:[#allocation27_spill]]  ;;  %s10957_s23 = int_to_ptr.vmem [resolvable:$true] %s509_s23 }
  0x20   : > { %s12461_s20 = scalar_select %p10942_p3, 1, 0 }
  0x21   : > { %p10128_p5 = pneg %p10942_p3 }
  0x23   : > { %p10953_p6 = pnand %p10128_p5, %p12439_p1 }
  0x25   : > { %s10451_s18 = scalar_lea.hbm %s12463_s0, 16  ;;  %p10967_p8 = pneg %p10953_p6 }
  0x26   : > { %p10452_p7 = scmp.ne.s32.totalorder %s12463_s0, %s10451_s18  ;;  %p10458_p11 = scmp.lt.u32.totalorder %s10451_s18, %s12463_s0 }
  0x28   : > { %p10454_p9 = pnand %p10967_p8, %p10452_p7 }
  0x2a   : > { %p10455_p10 = pneg %p10454_p9 }
  0x2c   : > { %p10460_p12 = pnand %p10458_p11, %p10455_p10 }
  0x2e   : > { %10463 = shalt.err (!%p10460_p12)
}
  0x2f   : > { %s10464_s15 = scalar_lea.vmem %s10940_s19, 16  ;;  %s10471_s17 = scalar_lea.vmem %s10940_s19, 32 }
  0x30   : > { %p10465_p13 = scmp.ne.s32.totalorder %s10940_s19, %s10464_s15  ;;  %p10472_p5 = scmp.lt.s32.totalorder %s10940_s19, %s10940_s19 }
  0x31   : > { %p10473_p7 = scmp.lt.s32.totalorder %s10471_s17, %s10464_s15 }
  0x32   : > { %p10467_p0 = pnand %p10465_p13, %p10967_p8 }
  0x33   : > { %p10474_p9 = por %p10473_p7, %p10472_p5 }
  0x34   : > { %p10468_p2 = pneg %p10467_p0 }
  0x36   : > { %p10475_p4 = pnand %p10474_p9, %p10468_p2 }
  0x38   : > { %10478 = shalt.err (!%p10475_p4)
}
  0x39   : > { %10131 = dma.hbm_to_vmem [thread:$0]  (!%p10953_p6), %s12463_s0, 16, %s10940_s19, [#allocation6]  }
  0x3a   : > { %s12465_s3 = sld [smem:[#allocation28_spill]] }
  0x40   : > { %s10479_s2 = scalar_lea.hbm %s12465_s3, 16 }
  0x41   : > { %p10480_p10 = scmp.ne.s32.totalorder %s12465_s3, %s10479_s2  ;;  %p10486_p4 = scmp.lt.u32.totalorder %s10479_s2, %s12465_s3 }
  0x43   : > { %p10482_p11 = pnand %p10480_p10, %p10967_p8 }
  0x45   : > { %p10483_p12 = pneg %p10482_p11 }
  0x47   : > { %p10488_p13 = pnand %p10486_p4, %p10483_p12 }
  0x49   : > { %10491 = shalt.err (!%p10488_p13)
}
  0x4a   : > { %s10492_s19 = scalar_lea.vmem %s10949_s22, 16  ;;  %s10499_s11 = scalar_lea.vmem %s10949_s22, 32 }
  0x4b   : > { %p10493_p0 = scmp.ne.s32.totalorder %s10949_s22, %s10492_s19  ;;  %p10500_p7 = scmp.lt.s32.totalorder %s10949_s22, %s10949_s22 }
  0x4c   : > { %p10501_p9 = scmp.lt.s32.totalorder %s10499_s11, %s10492_s19 }
  0x4d   : > { %p10495_p2 = pnand %p10493_p0, %p10967_p8 }
  0x4e   : > { %p10502_p10 = por %p10501_p9, %p10500_p7 }
  0x4f   : > { %p10496_p5 = pneg %p10495_p2 }
  0x51   : > { %p10503_p11 = pnand %p10502_p10, %p10496_p5 }
  0x53   : > { %10506 = shalt.err (!%p10503_p11)
}
  0x54   : > { %10134 = dma.hbm_to_vmem [thread:$0]  (!%p10953_p6), %s12465_s3, 16, %s10949_s22, [#allocation9]  }
  0x55   : > { %s12466_s6 = sld [smem:[#allocation30_spill]] }
  0x5b   : > { %s10507_s26 = scalar_lea.hbm %s12466_s6, 2048 }
  0x5c   : > { %p10508_p12 = scmp.ne.s32.totalorder %s12466_s6, %s10507_s26  ;;  %p10514_p0 = scmp.lt.u32.totalorder %s10507_s26, %s12466_s6 }
  0x5e   : > { %p10510_p4 = pnand %p10508_p12, %p10967_p8 }
  0x60   : > { %p10511_p13 = pneg %p10510_p4 }
  0x62   : > { %p10516_p2 = pnand %p10514_p0, %p10511_p13 }
  0x64   : > { %10519 = shalt.err (!%p10516_p2)
}
  0x65   : > { %s10520_s22 = scalar_lea.vmem %s10957_s23, 2048  ;;  %p10528_p10 = scmp.lt.s32.totalorder %s10957_s23, %s10957_s23 }
  0x66   : > { %p10521_p5 = scmp.ne.s32.totalorder %s10957_s23, %s10520_s22  ;;  %p10529_p11 = scmp.lt.s32.totalorder %s10520_s22, %s10520_s22 }
  0x68   : > { %p10523_p7 = pnand %p10521_p5, %p10967_p8  ;;  %p10530_p12 = por %p10529_p11, %p10528_p10 }
  0x6a   : > { %p10524_p9 = pneg %p10523_p7 }
  0x6c   : > { %p10531_p4 = pnand %p10530_p12, %p10524_p9 }
  0x6e   : > { %10534 = shalt.err (!%p10531_p4)
}
  0x6f   : > { %s10798_s11 = smov 64   ;;  %s10799_s13 = smov 4  }
  0x70   : > { %10140 = dma.hbm_to_vmem [thread:$0]  (!%p10953_p6), %s12466_s6, 2048, %s10957_s23, [#allocation12], %s10798_s11, %s10798_s11, %s10799_s13  }
  0x71   : > { %s10800_s25 = smov [#allocation14]   ;;  %s10801_s2 = smov [#allocation10]  }
  0x72   : > { %s547_s26 = sshll.u32 %s10800_s25, 4  ;;  %s493_s15 = sshll.u32 %s10801_s2, 4  ;;  %s548_s26 = int_to_ptr.vmem [resolvable:$true] %s547_s26  ;;  %s494_s15 = int_to_ptr.vmem [resolvable:$true] %s493_s15 }
  0x73   : > { %s10535_s22 = scalar_lea.hbm %s12421_s12, 4096 }
  0x74   : > { %p10536_p13 = scmp.ne.s32.totalorder %s12421_s12, %s10535_s22  ;;  %p10542_p5 = scmp.lt.u32.totalorder %s10535_s22, %s12421_s12 }
  0x76   : > { %p10538_p0 = pnand %p10536_p13, %p10967_p8 }
  0x78   : > { %p10539_p2 = pneg %p10538_p0 }
  0x7a   : > { %p10544_p7 = pnand %p10542_p5, %p10539_p2 }
  0x7c   : > { %10547 = shalt.err (!%p10544_p7)
}
  0x7d   : > { %s10548_s23 = scalar_lea.vmem %s548_s26, 4096  ;;  %p10556_p12 = scmp.lt.s32.totalorder %s548_s26, %s548_s26 }
  0x7e   : > { %p10549_p9 = scmp.ne.s32.totalorder %s548_s26, %s10548_s23  ;;  %p10557_p4 = scmp.lt.s32.totalorder %s10548_s23, %s10548_s23 }
  0x80   : > { %p10551_p10 = pnand %p10549_p9, %p10967_p8  ;;  %p10558_p1 = por %p10557_p4, %p10556_p12 }
  0x82   : > { %p10552_p11 = pneg %p10551_p10 }
  0x84   : > { %p10559_p3 = pnand %p10558_p1, %p10552_p11 }
  0x86   : > { %10562 = shalt.err (!%p10559_p3)
}
  0x87   : > { %10146 = dma.hbm_to_vmem [thread:$0]  (!%p10953_p6), %s12421_s12, 4096, %s548_s26, [#allocation15], %s10798_s11, %s10798_s11, %s10799_s13  }
  0x88   : > { %s12467_s4 = sld [smem:[#allocation29_spill]] }
  0x8e   : > { %s10563_s14 = scalar_lea.hbm %s12467_s4, 6144 }
  0x8f   : > { %p10564_p1 = scmp.ne.s32.totalorder %s12467_s4, %s10563_s14  ;;  %p10570_p0 = scmp.lt.u32.totalorder %s10563_s14, %s12467_s4 }
  0x91   : > { %p10566_p3 = pnand %p10564_p1, %p10967_p8 }
  0x93   : > { %p10567_p13 = pneg %p10566_p3 }
  0x95   : > { %p10572_p2 = pnand %p10570_p0, %p10567_p13 }
  0x97   : > { %10575 = shalt.err (!%p10572_p2)
}
  0x98   : > { %s10576_s19 = scalar_lea.vmem %s494_s15, 6144  ;;  %p10584_p10 = scmp.lt.s32.totalorder %s494_s15, %s494_s15 }
  0x99   : > { %p10577_p5 = scmp.ne.s32.totalorder %s494_s15, %s10576_s19  ;;  %p10585_p11 = scmp.lt.s32.totalorder %s10576_s19, %s10576_s19 }
  0x9b   : > { %p10579_p7 = pnand %p10577_p5, %p10967_p8  ;;  %p10586_p12 = por %p10585_p11, %p10584_p10 }
  0x9d   : > { %p10580_p9 = pneg %p10579_p7 }
  0x9f   : > { %p10587_p4 = pnand %p10586_p12, %p10580_p9 }
  0xa1   : > { %10590 = shalt.err (!%p10587_p4)
}
  0xa2   : > { %s10802_s26 = smov 192   ;;  %s10803_s22 = smov 12  }
  0xa3   : > { %10137 = dma.hbm_to_vmem [thread:$0]  (!%p10953_p6), %s12467_s4, 6144, %s494_s15, [#allocation9], %s10802_s26, %s10802_s26, %s10803_s22  }
  0xa4   : > { %s10804_s8 = smov [#allocation13]   ;;  %s12468_s10 = sld [smem:[#allocation33_spill]] }
  0xa5   : > { %s531_s9 = sshll.u32 %s10804_s8, 4  ;;  %s532_s9 = int_to_ptr.vmem [resolvable:$true] %s531_s9 }
  0xaa   : > { %s10591_s18 = scalar_lea.hbm %s12468_s10, 4096 }
  0xab   : > { %p10592_p1 = scmp.ne.s32.totalorder %s12468_s10, %s10591_s18  ;;  %p10598_p0 = scmp.lt.u32.totalorder %s10591_s18, %s12468_s10 }
  0xad   : > { %p10594_p3 = pnand %p10592_p1, %p10967_p8 }
  0xaf   : > { %p10595_p13 = pneg %p10594_p3 }
  0xb1   : > { %p10600_p2 = pnand %p10598_p0, %p10595_p13 }
  0xb3   : > { %10603 = shalt.err (!%p10600_p2)
}
  0xb4   : > { %s10604_s15 = scalar_lea.vmem %s532_s9, 4096  ;;  %p10612_p10 = scmp.lt.s32.totalorder %s532_s9, %s532_s9 }
  0xb5   : > { %p10605_p5 = scmp.ne.s32.totalorder %s532_s9, %s10604_s15  ;;  %p10613_p11 = scmp.lt.s32.totalorder %s10604_s15, %s10604_s15 }
  0xb7   : > { %p10607_p7 = pnand %p10605_p5, %p10967_p8  ;;  %p10614_p12 = por %p10613_p11, %p10612_p10 }
  0xb9   : > { %p10608_p9 = pneg %p10607_p7 }
  0xbb   : > { %p10615_p4 = pnand %p10614_p12, %p10608_p9 }
  0xbd   : > { %10618 = shalt.err (!%p10615_p4)
}
  0xbe   : > { %s10805_s26 = smov 128   ;;  %s10806_s22 = smov 8  }
  0xbf   : > { %10143 = dma.hbm_to_vmem [thread:$0]  (!%p10953_p6), %s12468_s10, 4096, %s532_s9, [#allocation12], %s10805_s26, %s10805_s26, %s10806_s22  }
  0xc0   : > { %s10807_s8 = smov [#allocation16]   ;;  %s10619_s25 = scalar_lea.hbm %s12425_s16, 1024 }
  0xc1   : > { %s569_s0 = sshll.u32 %s10807_s8, 4  ;;  %p10620_p1 = scmp.ne.s32.totalorder %s12425_s16, %s10619_s25  ;;  %s570_s0 = int_to_ptr.vmem [resolvable:$true] %s569_s0 }
  0xc2   : > { %p10626_p0 = scmp.lt.u32.totalorder %s10619_s25, %s12425_s16 }
  0xc3   : > { %p10622_p3 = pnand %p10620_p1, %p10967_p8 }
  0xc5   : > { %p10623_p13 = pneg %p10622_p3 }
  0xc7   : > { %p10628_p2 = pnand %p10626_p0, %p10623_p13 }
  0xc9   : > { %10631 = shalt.err (!%p10628_p2)
}
  0xca   : > { %s10632_s9 = scalar_lea.vmem %s570_s0, 1024  ;;  %p10640_p10 = scmp.lt.s32.totalorder %s570_s0, %s570_s0 }
  0xcb   : > { %p10633_p5 = scmp.ne.s32.totalorder %s570_s0, %s10632_s9  ;;  %p10641_p11 = scmp.lt.s32.totalorder %s10632_s9, %s10632_s9 }
  0xcd   : > { %p10635_p7 = pnand %p10633_p5, %p10967_p8  ;;  %p10642_p12 = por %p10641_p11, %p10640_p10 }
  0xcf   : > { %p10636_p9 = pneg %p10635_p7 }
  0xd1   : > { %p10643_p4 = pnand %p10642_p12, %p10636_p9 }
  0xd3   : > { %10646 = shalt.err (!%p10643_p4)
}
  0xd4   : > { %10149 = dma.hbm_to_vmem [thread:$0]  (!%p10953_p6), %s12425_s16, 1024, %s570_s0, [#allocation15], %s10798_s11, %s10798_s11, %s10799_s13  }
  0xd5   : > { %s9517_s24 = sadd.s32 4294967294, %s10793_s30   ;;  %s11119_s21 = sadd.s32 1, %s10793_s30  }
  0xd6   : > { %s47_s23 = sadd.s32 1, %s10789_s29  ;;  %s44_s3 = ssub.s32 %s10793_s30, %s11119_s21 }
  0xd7   : > { %p54_p8 = scmp.ne.s32.totalorder %s10789_s29, %s10785_s28  ;;  %p45_p1 = scmp.eq.s32.totalorder %s44_s3, 0 }
  0xd8   : > { %p55_p3 = scmp.eq.s32.totalorder %s10793_s30, 0  ;;  %p60_p13 = scmp.ne.s32.totalorder %s10785_s28, %s10781_s27 }
  0xd9   : > { %p446_p0 = scmp.eq.s32.totalorder %s10935_s1, 1  ;;  %p12469_p5 = scmp.eq.s32.totalorder %s10935_s1, 0 }
  0xda   : > { %s11131_s8 = scalar_select %p45_p1, %s10789_s29, %s47_s23  }
  0xdb   : > { %p56_p2 = por %p55_p3, %p54_p8  ;;  %p11135_p7 = por %p12469_p5, %p60_p13 }
  0xdc   : > { %p11139_p6 = por %p446_p0, %p54_p8  ;;  %p452_p9 = scmp.eq.s32.totalorder %s9517_s24, 1 }
  0xdd   : > { %s12470_s11 = scalar_select %p11135_p7, 1, 0 }
  0xde   : > { %s12471_s13 = scalar_select %p11139_p6, 1, 0 }
  0xdf   : > { %p10168_p10 = scmp.lt.s32.totalorder %s10793_s30, 2  ;;  %s11145_s0 = sand.u32 1, %s10789_s29  }
  0xe0   : > { %p11147_p11 = por %p452_p9, %p60_p13  ;;  %s9527_s18 = sshll.u32 %s11145_s0, 3 }
  0xe1   : > { %s9528_s25 = sshll.u32 %s10793_s30, 7  ;;  %s12473_s19 = sld [smem:[#allocation25_spill]] }
  0xe2   : > { %s12472_s14 = scalar_select %p11147_p11, 1, 0 }
  0xe3   : > { %s590_s9 = scalar_lea.vmem [#allocation2], %s9527_s18  ;;  %p11158_p12 = pnand %p10168_p10, %p56_p2 }
  0xe4   : > { %s597_s26 = sshll.u32 %s590_s9, 4  ;;  %s587_s23 = scalar_lea.sflag [#allocation3], %s11145_s0  ;;  %s11162_s26 = int_to_ptr.vmem [resolvable:$true] %s597_s26 }
  0xe5   : > { %p10649_p8 = pneg %p11158_p12 }
  0xe7   : > { %s11156_s15 = scalar_lea.hbm %s12473_s19, %s9528_s25  ;;  %s10652_s2 = scalar_lea.hbm %s12473_s19, 256 }
  0xe8   : > { %s10647_s3 = scalar_lea.hbm %s11156_s15, 128  ;;  %p10653_p13 = scmp.lt.u32.totalorder %s11156_s15, %s12473_s19 }
  0xe9   : > { %p10648_p4 = scmp.ne.s32.totalorder %s11156_s15, %s10647_s3  ;;  %p10654_p0 = scmp.lt.u32.totalorder %s10652_s2, %s10647_s3 }
  0xea   : > { %p10656_p5 = scmp.lt.u32.totalorder %s10647_s3, %s11156_s15 }
  0xeb   : > { %p10650_p1 = pnand %p10649_p8, %p10648_p4  ;;  %p10655_p2 = por %p10654_p0, %p10653_p13 }
  0xed   : > { %p10651_p3 = pneg %p10650_p1  ;;  %p10657_p9 = por %p10656_p5, %p10655_p2 }
  0xef   : > { %p10658_p10 = pnand %p10657_p9, %p10651_p3 }
  0xf1   : > { %10661 = shalt.err (!%p10658_p10)
}
  0xf2   : > { %s10662_s24 = scalar_lea.vmem %s11162_s26, 128  ;;  %s10808_s18 = smov [#allocation2]  }
  0xf3   : > { %p10663_p4 = scmp.ne.s32.totalorder %s11162_s26, %s10662_s24  ;;  %s10667_s25 = sshll.u32 %s10808_s18, 4  ;;  %s10668_s25 = int_to_ptr.vmem [resolvable:$false] %s10667_s25 }
  0xf4   : > { %s10669_s17 = scalar_lea.vmem %s10668_s25, 256  ;;  %p10670_p6 = scmp.lt.s32.totalorder %s11162_s26, %s10668_s25 }
  0xf5   : > { %p10665_p1 = pnand %p10663_p4, %p10649_p8  ;;  %p10671_p13 = scmp.lt.s32.totalorder %s10669_s17, %s10662_s24 }
  0xf7   : > { %p10666_p11 = pneg %p10665_p1  ;;  %p10672_p0 = por %p10671_p13, %p10670_p6 }
  0xf9   : > { %p10673_p2 = pnand %p10672_p0, %p10666_p11 }
  0xfb   : > { %10676 = shalt.err (!%p10673_p2)
}
  0xfc   : > { %10153 = dma.hbm_to_vmem [thread:$0]  (!%p11158_p12), %s11156_s15, 128, %s11162_s26, %s587_s23  }
  0xfd   : > { %s9529_s3 = sshll.u32 %s10793_s30, 4  ;;  %s12475_s18 = sld [smem:[#allocation26_spill]] }
  0xfe   : > { %s607_s24 = scalar_lea.vmem [#allocation5], %s11145_s0  ;;  %s12476_s17 = sand.u32 1, %s10793_s30  }
  0xff   : > { %s614_s25 = sshll.u32 %s607_s24, 4  ;;  %s605_s6 = scalar_lea.sflag [#allocation6], %s12476_s17  ;;  %s615_s25 = int_to_ptr.vmem [resolvable:$true] %s614_s25 }
 0x103   : > { %s11195_s4 = scalar_lea.hbm %s12475_s18, %s9529_s3  ;;  %s10682_s23 = scalar_lea.hbm %s12475_s18, 32 }
 0x104   : > { %s10677_s10 = scalar_lea.hbm %s11195_s4, 16  ;;  %p10683_p5 = scmp.lt.u32.totalorder %s11195_s4, %s12475_s18 }
 0x105   : > { %p10678_p6 = scmp.ne.s32.totalorder %s11195_s4, %s10677_s10  ;;  %p10684_p9 = scmp.lt.u32.totalorder %s10682_s23, %s10677_s10 }
 0x106   : > { %p10686_p4 = scmp.lt.u32.totalorder %s10677_s10, %s11195_s4 }
 0x107   : > { %p10680_p11 = pnand %p10678_p6, %p10649_p8  ;;  %p10685_p10 = por %p10684_p9, %p10683_p5 }
 0x109   : > { %p10681_p3 = pneg %p10680_p11  ;;  %p10687_p1 = por %p10686_p4, %p10685_p10 }
 0x10b   : > { %p10688_p13 = pnand %p10687_p1, %p10681_p3 }
 0x10d   : > { %10691 = shalt.err (!%p10688_p13)
}
 0x10e   : > { %s10692_s0 = scalar_lea.vmem %s615_s25, 16  ;;  %s10809_s9 = smov [#allocation5]  }
 0x10f   : > { %p10693_p0 = scmp.ne.s32.totalorder %s615_s25, %s10692_s0  ;;  %s10697_s24 = sshll.u32 %s10809_s9, 4  ;;  %s10698_s24 = int_to_ptr.vmem [resolvable:$false] %s10697_s24 }
 0x110   : > { %s10699_s17 = scalar_lea.vmem %s10698_s24, 32  ;;  %p10700_p11 = scmp.lt.s32.totalorder %s615_s25, %s10698_s24 }
 0x111   : > { %p10695_p2 = pnand %p10693_p0, %p10649_p8  ;;  %p10701_p7 = scmp.lt.s32.totalorder %s10699_s17, %s10692_s0 }
 0x113   : > { %p10696_p6 = pneg %p10695_p2  ;;  %p10702_p5 = por %p10701_p7, %p10700_p11 }
 0x115   : > { %p10703_p9 = pnand %p10702_p5, %p10696_p6 }
 0x117   : > { %10706 = shalt.err (!%p10703_p9)
}
 0x118   : > { %10156 = dma.hbm_to_vmem [thread:$0]  (!%p11158_p12), %s11195_s4, 16, %s615_s25, %s605_s6  }
 0x119   : > { %p12477_p3 = scmp.ne.s32.totalorder %s12461_s20, 0 }
 0x11a   : > { %s11222_s10 = sand.u32 (!%p12477_p3), 1, %s10785_s28   ;;  %p12478_p8 = scmp.ne.s32.totalorder (!%p12477_p3), %s12470_s11, 0 }
 0x11b   : > { %623 = sbr.rel (%p12477_p3) target bundleno = 6990 (0x1b4e), region = 92  ;;  %s9531_s15 = sshll.u32 (!%p12477_p3), %s11222_s10, 3 }
 0x11c   : > { %s626_s26 = scalar_lea.sflag (!%p12477_p3), [#allocation3], %s11222_s10  ;;  %s629_s23 = scalar_lea.vmem (!%p12477_p3), [#allocation2], %s9531_s15 }
 0x122   : > { %10752 = dma.done.wait (%p12478_p8), %s626_s26, 128  }
 0x123   : > { %10754 = vsyncadd (%p12478_p8), %s626_s26, 4294967168  ;;  %s634_s4 = sand.u32 1, %s10935_s1   ;;  %s12443_s20 = scalar_lea.vmem [#allocation5], %s11222_s10 }
 0x124   : > { %s635_s6 = scalar_lea.sflag [#allocation6], %s634_s4 }
 0x125   : > { %10756 = dma.done.wait (%p12478_p8), %s635_s6, 16  }
 0x126   : > { %10758 = vsyncadd (%p12478_p8), %s635_s6, 4294967280  ;;  %p12479_p7 = scmp.eq.s32.totalorder %s10935_s1, 0 }
 0x128   : > { %10760 = dma.done.wait (%p12479_p7), [#allocation6], 16   ;;  %p12480_p12 = pmov %p12479_p7 }
 0x129   : > { %p12481_p10 = pmov %p12479_p7 }
 0x12a   : > { %10762 = vsyncadd (%p12480_p12), [#allocation6], 4294967280 }
 0x12b   : > { %10764 = dma.done.wait (%p12481_p10), [#allocation9], 6160   ;;  %p12482_p4 = pmov %p12479_p7 }
 0x12d   : > { %10766 = vsyncadd (%p12482_p4), [#allocation9], 4294961136  ;;  %p12483_p1 = pmov %p12482_p4 }
 0x12f   : > { %10768 = dma.done.wait (%p12483_p1), [#allocation12], 6144   ;;  %p12484_p13 = pmov %p12483_p1 }
 0x130   : > { %p12485_p0 = pmov %p12483_p1 }
 0x131   : > { %10770 = vsyncadd (%p12484_p13), [#allocation12], 4294961152 }
 0x132   : > { %10772 = dma.done.wait (%p12485_p0), [#allocation15], 5120   ;;  %p12486_p2 = pmov %p12485_p0 }
 0x133   : > { %v722_v0 = vld [vmem:[%s629_s23] sm:$0xff]  ;;  %v10810_v3 = vmov 0.0   ;;  %v10811_v25 = vmov 0   ;;  %vm10812_vm0 = vmmov 0   ;;  %v9539_v35 = vld [vmem:[#allocation7] ss:$0 sm:$0xff]  ;;  %v787_v41 = vlaneseq }
 0x134   : > { %10774 = vsyncadd (%p12486_p2), [#allocation15], 4294962176  ;;  %725 = vadd.xlane.f32.xlu0 %v722_v0  ;;  %v10230_v1 = vld [vmem:[#allocation10 + $0x4] ss:$12 sps:$4 sm:$0xff]   ;;  %v10232_v2 = vld [vmem:[#allocation10] ss:$12 sps:$4 sm:$0xff]   ;;  %9874 = vmatprep.subr.bf16.mxu1 %v10810_v3 }
 0x135   : > { %v10233_v4 = vld [vmem:[#allocation10 + $0x8] ss:$12 sps:$4 sm:$0xff]   ;;  %v10236_v6 = vld [vmem:[#allocation10 + $0x18] ss:$12 sps:$4 sm:$0xff]   ;;  %930 = vmatprep.subr.bf16.mxu0 %v10230_v1  ;;  %v10237_v7 = vld [vmem:[#allocation10 + $0x20] ss:$12 sps:$4 sm:$0xff]   ;;  %962 = vmatprep.mubr.bf16.mxu0 %v10811_v25 }
 0x136   : > { %v10234_v5 = vld [vmem:[#allocation10 + $0x1c] ss:$12 sps:$4 sm:$0xff]   ;;  %v10238_v8 = vld [vmem:[#allocation10 + $0x34] ss:$12 sps:$4 sm:$0xff]   ;;  %931 = vmatpush1.bf16.msra.mxu0 %v10232_v2  ;;  %9875 = vmatpush3.bf16.msra.mxu1 %v10233_v4  ;;  %v10241_v14 = vld [vmem:[#allocation10 + $0x38] ss:$12 sps:$4 sm:$0xff]  }
 0x137   : > { %932 = vmatprep.subr.bf16.mxu0 %v10234_v5  ;;  %9876 = vmatprep.subr.bf16.mxu1 %v10810_v3  ;;  %v10240_v13 = vld [vmem:[#allocation10 + $0x30] ss:$12 sps:$4 sm:$0xff]   ;;  %v10242_v15 = vld [vmem:[#allocation10 + $0x4c] ss:$12 sps:$4 sm:$0xff]   ;;  %v10244_v16 = vld [vmem:[#allocation10 + $0x48] ss:$12 sps:$4 sm:$0xff]  }
 0x138   : > { %v10245_v17 = vld [vmem:[#allocation10 + $0x50] ss:$12 sps:$4 sm:$0xff]   ;;  %v10248_v19 = vld [vmem:[#allocation10 + $0x60] ss:$12 sps:$4 sm:$0xff]   ;;  %v10249_v20 = vld [vmem:[#allocation10 + $0x68] ss:$12 sps:$4 sm:$0xff]   ;;  %9890 = vmatprep.mubr.msk.bf16.mxu1 %vm10812_vm0, %v10810_v3 }
 0x139   : > { %v10246_v18 = vld [vmem:[#allocation10 + $0x64] ss:$12 sps:$4 sm:$0xff]   ;;  %v10250_v21 = vld [vmem:[#allocation10 + $0x7c] ss:$12 sps:$4 sm:$0xff]   ;;  %v10253_v23 = vld [vmem:[#allocation10 + $0x80] ss:$12 sps:$4 sm:$0xff]  }
 0x13a   : > { %933 = vmatpush1.bf16.msra.mxu0 %v10236_v6  ;;  %9877 = vmatpush3.bf16.msra.mxu1 %v10237_v7  ;;  %v10252_v22 = vld [vmem:[#allocation10 + $0x78] ss:$12 sps:$4 sm:$0xff]   ;;  %v10254_v24 = vld [vmem:[#allocation10 + $0x94] ss:$12 sps:$4 sm:$0xff]   ;;  %v10256_v26 = vld [vmem:[#allocation10 + $0x90] ss:$12 sps:$4 sm:$0xff]  }
 0x13b   : > { %934 = vmatprep.subr.bf16.mxu0 %v10238_v8  ;;  %9878 = vmatprep.subr.bf16.mxu1 %v10810_v3  ;;  %v10257_v27 = vld [vmem:[#allocation10 + $0x98] ss:$12 sps:$4 sm:$0xff]   ;;  %v10260_v29 = vld [vmem:[#allocation10 + $0xa8] ss:$12 sps:$4 sm:$0xff]   ;;  %v10261_v30 = vld [vmem:[#allocation10 + $0xb0] ss:$12 sps:$4 sm:$0xff]  }
 0x13c   : > { %v10258_v28 = vld [vmem:[#allocation10 + $0xac] ss:$12 sps:$4 sm:$0xff]   ;;  %v9540_v37 = vld [vmem:[#allocation8] ss:$0 sm:$0xff]  ;;  %v11273_v42 = vshrl.u32 %v787_v41, 7  ;;  %s10813_s25 = smov 32  }
 0x13d   : > { %v11281_v44 = vld [vmem:[%s12414_s5] sm:$0x7]  ;;  %s10814_s3 = smov 96   ;;  %s10815_s2 = smov 64   ;;  %v10816_v58 = vmov 1983009808  }
 0x13e   : > { %935 = vmatpush1.bf16.msra.mxu0 %v10240_v13  ;;  %9879 = vmatpush3.bf16.msra.mxu1 %v10241_v14  ;;  %v11276_v43 = vsub.s32 1, %v11273_v42  ;;  %v11284_v45 = vsub.s32 0, %v11273_v42  ;;  %v1024_v59 = vunpack.c.l.s4 %v10816_v58  ;;  %v10817_v60 = vmov 1934713408   ;;  %s12487_s15 = sld [smem:[#allocation31_spill]]  ;;  %s12488_s4 = sld [smem:[#allocation32_spill]] }
 0x13f   : > { %9880 = vmatprep.subr.bf16.mxu1 %v10810_v3  ;;  %936 = vmatprep.subr.bf16.mxu0 %v10242_v15  ;;  %v1056_v61 = vunpack.c.l.s4 %v10817_v60  ;;  %vm2531_vm1 = vcmask 261120   ;;  %vm2718_vm2 = vcmask 64512   ;;  %vm4488_vm3 = vcmask 523264   ;;  %s12489_s22 = sld [smem:[#allocation34_spill]]  ;;  %s12490_s24 = sld [smem:[#allocation35_spill]] }
 0x140   : > { %v794_v46 = vrot.slane %v11281_v44, %v11276_v43  ;;  %v790_v51 = vrot.slane %v11281_v44, %v11284_v45  ;;  %v1025_v62 = vunpack.c.0.s8 %v1024_v59  ;;  %vm4490_vm4 = vcmask 785408   ;;  %s12491_s23 = sld [smem:[#allocation36_spill]]  ;;  %s12492_s0 = sld [smem:[#allocation37_spill]] }
 0x141   : > { %v1057_v1 = vunpack.c.0.s8 %v1056_v61  ;;  %s12494_s9 = sld [smem:[#allocation38_spill]]  ;;  %s720_s17 = scalar_lea.vmem [#allocation17], %s11222_s10 }
 0x142   : > { %937 = vmatpush1.bf16.msra.mxu0 %v10244_v16  ;;  %9881 = vmatpush3.bf16.msra.mxu1 %v10245_v17  ;;  %v11304_v2 = vsub.s32 %v1025_v62, %v11273_v42  ;;  %s9365_s26 = sshll.u32 %s720_s17, 4  ;;  %s9353_s6 = scalar_lea.sflag [#allocation4], %s11222_s10  ;;  %s12367_s26 = int_to_ptr.vmem [resolvable:$true] %s9365_s26 }
 0x143   : > { %9882 = vmatprep.subr.bf16.mxu1 %v10810_v3  ;;  %938 = vmatprep.subr.bf16.mxu0 %v10246_v18  ;;  %s10707_s11 = scalar_lea.vmem %s12367_s26, 16  ;;  %p12496_p11 = scmp.ne.s32.totalorder %s12471_s13, 0 }
 0x144   : > { %p10708_p6 = scmp.ne.s32.totalorder %s12367_s26, %s10707_s11 }
 0x146   : > { %939 = vmatpush1.bf16.msra.mxu0 %v10248_v19  ;;  %9883 = vmatpush3.bf16.msra.mxu1 %v10249_v20  ;;  %p10709_p5 = pnand %p10708_p6, %p12496_p11 }
 0x147   : > { %940 = vmatprep.subr.bf16.mxu0 %v10250_v21  ;;  %9884 = vmatprep.subr.bf16.mxu1 %v10810_v3 }
 0x148   : > { %p10710_p9 = pneg %p10709_p5 }
 0x14a   : > { %941 = vmatpush1.bf16.msra.mxu0 %v10252_v22  ;;  %9885 = vmatpush3.bf16.msra.mxu1 %v10253_v23 }
 0x14b   : > { %942 = vmatprep.subr.bf16.mxu0 %v10254_v24  ;;  %9886 = vmatprep.subr.bf16.mxu1 %v10810_v3 }
 0x14e   : > { %943 = vmatpush1.bf16.msra.mxu0 %v10256_v26  ;;  %9887 = vmatpush3.bf16.msra.mxu1 %v10257_v27 }
 0x14f   : > { %944 = vmatprep.subr.bf16.mxu0 %v10258_v28  ;;  %9888 = vmatprep.subr.bf16.mxu1 %v10810_v3 }
 0x152   : > { %945 = vmatpush1.bf16.msra.mxu0 %v10260_v29  ;;  %9889 = vmatpush3.bf16.msra.mxu1 %v10261_v30 }
 0x153   : > { %9894 = vmatprep.subr.bf16.mxu0 %v10810_v3  ;;  %9902 = vmatprep.subr.bf16.mxu1 %v10810_v3 }
 0x1c1   : > { %v726_v9 = vpop.xlane.xlu0 %725 }
 0x1c2   : > { %v728_v10 = vmul.f32 0.0078125, %v726_v9  ;;  %v11307_v9 = vsub.s32 %v1057_v1, %v11273_v42 }
 0x1c4   : > { %v729_v11 = vsub.f32 %v722_v0, %v728_v10 }
 0x1c6   : > { %v730_v12 = vmul.f32 %v729_v11, %v729_v11 }
 0x1c8   : > { %731 = vadd.xlane.f32.xlu0 %v730_v12 }
 0x255   : > { %v732_v31 = vpop.xlane.xlu0 %731 }
 0x256   : > { %v733_v32 = vmul.f32 0.0078125, %v732_v31 }
 0x258   : > { %v734_v33 = vadd.f32 1e-12, %v733_v32 }
 0x25a   : > { %10398 = vrsqrt.f32 %v734_v33 }
 0x264   : > { %v10399_v34 = vpop.eup %10398 }
 0x265   : > { %v736_v36 = vmul.f32 %v10399_v34, %v729_v11 }
 0x267   : > { %v743_v38 = vmul.f32 %v9539_v35, %v736_v36 }
 0x269   : > { %v11265_v39 = vadd.f32 %v9540_v37, %v743_v38 }
 0x26b   : > { %v752_v40 = vpack.c.bf16 %v11265_v39, %v11265_v39 }
 0x26d   : > { %963 = vmatmul.mubr.bf16.vlgmr.msra.gmra.mrb[0].mxu0 %v752_v40  ;;  %9891 = vmatmul.mubr.bf16.vlgmr.msra.gmra.mrb[0].mxu1 %v752_v40 }
 0x26e   : > { %9898 = vmatprep.mubr.msk.bf16.mxu0 %vm10812_vm0, %v10810_v3  ;;  %9906 = vmatprep.mubr.msk.bf16.mxu1 %vm10812_vm0, %v10810_v3 }
 0x340   : > { %v964_v47 = vpop.f32.mrb[0].mxu0  ;;  %v11288_v48 = vpop.f32.mrb[0].mxu1 }
 0x341   : > { %v966_v49 = vpop.f32.mrb[1].mxu0  ;;  %v9892_v50 = vpop.f32.mrb[1].mxu1  ;;  %v11294_v57 = vadd.f32 %v964_v47, %v790_v51 }
 0x342   : > { %v967_v52 = vadd.f32 %v966_v49, %v794_v46  ;;  %v968_v53 = vpop.f32.mrb[2].mxu0  ;;  %v1008_v54 = vpop.f32.mrb[2].mxu1 }
 0x343   : > { %v969_v55 = vpop.f32.mrb[3].mxu0  ;;  %v9893_v56 = vpop.f32.mrb[3].mxu1 }
 0x344   : > { %1096 = vrot.lane.b32.xlu0 %v967_v52, %s10813_s25  ;;  %1090 = vrot.lane.b32.xlu1 %v967_v52, %s10814_s3 }
 0x348   : > { %1093 = vrot.lane.b32.xlu1 %v967_v52, %s10815_s2  ;;  %1012 = vrot.lane.b32.xlu0 %v11294_v57, %s10814_s3 }
 0x34c   : > { %1015 = vrot.lane.b32.xlu1 %v11294_v57, %s10815_s2 }
 0x350   : > { %1018 = vrot.lane.b32.xlu1 %v11294_v57, %s10813_s25 }
 0x3b6   : > { %v1097_v63 = vpop.permute.xlu0 %1096  ;;  %v1091_v0 = vpop.permute.xlu1 %1090 }
 0x3b7   : > { %v1115_v4 = vcombine.low %v1091_v0, %v1097_v63  ;;  %v1116_v5 = vcombine.high %v1091_v0, %v1097_v63 }
 0x3b9   : > { %v1123_v10 = vrot.slane %v1115_v4, %v11304_v2  ;;  %v1130_v11 = vrot.slane %v1116_v5, %v11304_v2 }
 0x3ba   : > { %v1094_v6 = vpop.permute.xlu1 %1093  ;;  %v11329_v47 = vpop.permute.xlu0 %1012 }
 0x3bb   : > { %v1099_v7 = vcombine.low %v967_v52, %v1094_v6  ;;  %v1100_v8 = vcombine.high %v967_v52, %v1094_v6 }
 0x3bd   : > { %v1107_v12 = vrot.slane %v1099_v7, %v11304_v2  ;;  %v1114_v13 = vrot.slane %v1100_v8, %v11304_v2 }
 0x3be   : > { %v11321_v35 = vpop.permute.xlu1 %1015 }
 0x3bf   : > { %v1131_v14 = vcombine.low %v1107_v12, %v1123_v10  ;;  %v1148_v15 = vcombine.high %v1114_v13, %v1130_v11  ;;  %v1132_v16 = vcombine.high %v1107_v12, %v1123_v10  ;;  %v1147_v23 = vcombine.low %v1114_v13, %v1130_v11 }
 0x3c1   : > { %v1139_v17 = vrot.slane %v1131_v14, %v11307_v9  ;;  %v1162_v18 = vrot.slane %v1148_v15, %v11307_v9  ;;  %v1146_v21 = vrot.slane %v1132_v16, %v11307_v9  ;;  %v1155_v27 = vrot.slane %v1147_v23, %v11307_v9 }
 0x3c2   : > { %v11323_v36 = vpop.permute.xlu1 %1018 }
 0x3c3   : > { %v1253_v19 = vpack.c.bf16 %v1139_v17, %v1139_v17  ;;  %v1259_v20 = vpack.c.bf16 %v1162_v18, %v1162_v18  ;;  %v1163_v22 = vcombine.high %v1139_v17, %v10810_v3  ;;  %v1255_v24 = vpack.c.bf16 %v1146_v21, %v1146_v21 }
 0x3c4   : > { %v1257_v28 = vpack.c.bf16 %v1155_v27, %v1155_v27  ;;  %v1164_v29 = vcombine.high %v1146_v21, %v10810_v3  ;;  %v1165_v31 = vcombine.high %v1155_v27, %v10810_v3  ;;  %v1166_v33 = vcombine.high %v1162_v18, %v10810_v3 }
 0x3c5   : > { %1323 = vxpose.xlu1.c.b16.start.end [1/1] (short) (narrow) %v1253_v19, 32  ;;  %1419 = vxpose.xlu0.c.b16.start.end [1/1] (short) (narrow) %v1259_v20, 32  ;;  %v1254_v26 = vpack.c.bf16 %v1163_v22, %v1163_v22 }
 0x3c6   : > { %v1256_v30 = vpack.c.bf16 %v1164_v29, %v1164_v29  ;;  %v1258_v32 = vpack.c.bf16 %v1165_v31, %v1165_v31  ;;  %v1260_v34 = vpack.c.bf16 %v1166_v33, %v1166_v33 }
 0x3ca   : > { %1355 = vxpose.xlu1.c.b16.start.end [1/1] (short) (narrow) %v1255_v24, 32  ;;  %1339 = vxpose.xlu0.c.b16.start.end [1/1] (short) (narrow) %v1254_v26, 32 }
 0x3cf   : > { %1387 = vxpose.xlu1.c.b16.start.end [1/1] (short) (narrow) %v1257_v28, 32 }
 0x3d4   : > { %1371 = vxpose.xlu1.c.b16.start.end [1/1] (short) (narrow) %v1256_v30, 32 }
 0x3d9   : > { %1403 = vxpose.xlu1.c.b16.start.end [1/1] (short) (narrow) %v1258_v32, 32 }
 0x3de   : > { %1435 = vxpose.xlu1.c.b16.start.end [1/1] (short) (narrow) %v1260_v34, 32 }
 0x42b   : > { %v1331_v37 = vpop.trf.xlu1  ;;  %v1427_v50 = vpop.trf.xlu0 }
 0x42c   : > { %v1479_v60 = vshrl.u32 %v1427_v50, 16  ;;  %v1455_v14 = vshrl.u32 %v1331_v37, 16 }
 0x42f   : > { %v11325_v38 = vpop.trf.xlu1  ;;  %v11335_v53 = vpop.trf.xlu0 }
 0x433   : > { %v1363_v40 = vpop.trf.xlu1  ;;  %v1347_v55 = vpop.trf.xlu0 }
 0x434   : > { %v1453_v59 = vpack.i.b16 %v1347_v55, %v1331_v37  ;;  %v1463_v6 = vshrl.u32 %v1363_v40, 16  ;;  %v1456_v7 = vshrl.u32 %v1347_v55, 16 }
 0x436   : > { %v1457_v20 = vpack.i.b16 %v1456_v7, %v1455_v14 }
 0x437   : > { %v11327_v41 = vpop.trf.xlu1 }
 0x43b   : > { %v1395_v46 = vpop.trf.xlu1 }
 0x43c   : > { %v1471_v8 = vshrl.u32 %v1395_v46, 16 }
 0x43f   : > { %v11331_v49 = vpop.trf.xlu1 }
 0x443   : > { %v1379_v51 = vpop.trf.xlu1 }
 0x444   : > { %v1464_v61 = vshrl.u32 %v1379_v51, 16  ;;  %v1461_v0 = vpack.i.b16 %v1379_v51, %v1363_v40 }
 0x446   : > { %v1465_v15 = vpack.i.b16 %v1464_v61, %v1463_v6 }
 0x447   : > { %v11333_v52 = vpop.trf.xlu1 }
 0x448   : > { %v1496_v14 = vshrl.u32 %v11333_v52, 16 }
 0x44b   : > { %v1411_v54 = vpop.trf.xlu1 }
 0x44c   : > { %v1469_v58 = vpack.i.b16 %v1411_v54, %v1395_v46  ;;  %v1472_v62 = vshrl.u32 %v1411_v54, 16 }
 0x44e   : > { %v1515_v1 = vcombine.low %v1453_v59, %v1469_v58  ;;  %v1516_v10 = vcombine.high %v1453_v59, %v1469_v58  ;;  %v1473_v16 = vpack.i.b16 %v1472_v62, %v1471_v8 }
 0x44f   : > { %v11337_v56 = vpop.trf.xlu1 }
 0x450   : > { %v1523_v17 = vrot.slane %v1515_v1, %v11304_v2  ;;  %v1530_v23 = vrot.slane %v1516_v10, %v11304_v2  ;;  %v1583_v26 = vcombine.low %v1457_v20, %v1473_v16  ;;  %v1584_v33 = vcombine.high %v1457_v20, %v1473_v16 }
 0x451   : > { %v1495_v16 = vshrl.u32 %v11327_v41, 16  ;;  %v1503_v20 = vshrl.u32 %v11331_v49, 16 }
 0x452   : > { %v1591_v32 = vrot.slane %v1583_v26, %v11304_v2  ;;  %v1598_v51 = vrot.slane %v1584_v33, %v11304_v2 }
 0x453   : > { %v1443_v63 = vpop.trf.xlu1 }
 0x454   : > { %v1477_v4 = vpack.i.b16 %v1443_v63, %v1427_v50  ;;  %v1480_v5 = vshrl.u32 %v1443_v63, 16  ;;  %v1348_v63 = vpop.trf.xlu0 }
 0x455   : > { %v1485_v6 = vpack.i.b16 %v1348_v63, %v11325_v38 }
 0x456   : > { %v1481_v11 = vpack.i.b16 %v1480_v5, %v1479_v60  ;;  %v1531_v12 = vcombine.low %v1461_v0, %v1477_v4  ;;  %v1532_v13 = vcombine.high %v1461_v0, %v1477_v4  ;;  %v1493_v4 = vpack.i.b16 %v11333_v52, %v11327_v41 }
 0x457   : > { %v1444_v58 = vpop.trf.xlu1  ;;  %v1501_v5 = vpack.i.b16 %v11337_v56, %v11331_v49  ;;  %v1487_v52 = vshrl.u32 %v11325_v38, 16 }
 0x458   : > { %v1539_v18 = vrot.slane %v1531_v12, %v11304_v2  ;;  %v1546_v19 = vrot.slane %v1532_v13, %v11304_v2  ;;  %v1599_v21 = vcombine.low %v1465_v15, %v1481_v11  ;;  %v1600_v31 = vcombine.high %v1465_v15, %v1481_v11 }
 0x459   : > { %v1509_v61 = vpack.i.b16 %v1444_v58, %v11335_v53  ;;  %v1512_v10 = vshrl.u32 %v1444_v58, 16  ;;  %v1651_v12 = vcombine.low %v1485_v6, %v1501_v5  ;;  %v1511_v13 = vshrl.u32 %v11335_v53, 16 }
 0x45a   : > { %v1548_v22 = vcombine.high %v1523_v17, %v1539_v18  ;;  %v1547_v24 = vcombine.low %v1523_v17, %v1539_v18  ;;  %v1563_v28 = vcombine.low %v1530_v23, %v1546_v19  ;;  %v1607_v30 = vrot.slane %v1599_v21, %v11304_v2 }
 0x45b   : > { %v1564_v37 = vcombine.high %v1530_v23, %v1546_v19  ;;  %v1614_v50 = vrot.slane %v1600_v31, %v11304_v2  ;;  %v1667_v7 = vcombine.low %v1493_v4, %v1509_v61  ;;  %v1504_v15 = vshrl.u32 %v11337_v56, 16 }
 0x45c   : > { %v1562_v27 = vrot.slane %v1548_v22, %v11307_v9  ;;  %v1555_v29 = vrot.slane %v1547_v24, %v11307_v9  ;;  %v1571_v34 = vrot.slane %v1563_v28, %v11307_v9  ;;  %v1616_v46 = vcombine.high %v1591_v32, %v1607_v30 }
 0x45d   : > { %v1578_v54 = vrot.slane %v1564_v37, %v11307_v9  ;;  %v1615_v55 = vcombine.low %v1591_v32, %v1607_v30  ;;  %v1631_v60 = vcombine.low %v1598_v51, %v1614_v50  ;;  %v1632_v1 = vcombine.high %v1598_v51, %v1614_v50 }
 0x45e   : > { %1851 = vxpose.xlu1.c.b16.start.end [1/1] (short) (narrow) %v1562_v27, 16  ;;  %1787 = vxpose.xlu0.c.b16.start.end [1/1] (short) (narrow) %v1555_v29, 16  ;;  %v1579_v40 = vcombine.high %v1555_v29, %v10811_v25  ;;  %v1630_v59 = vrot.slane %v1616_v46, %v11307_v9  ;;  %v1580_v8 = vcombine.high %v1562_v27, %v10811_v25  ;;  %v1488_v19 = vshrl.u32 %v1348_v63, 16 }
 0x45f   : > { %v1623_v62 = vrot.slane %v1615_v55, %v11307_v9  ;;  %v1639_v0 = vrot.slane %v1631_v60, %v11307_v9  ;;  %v1646_v11 = vrot.slane %v1632_v1, %v11307_v9  ;;  %v1581_v17 = vcombine.high %v1571_v34, %v10811_v25 }
 0x460   : > { %v1675_v18 = vrot.slane %v1667_v7, %v11304_v2  ;;  %v1513_v21 = vpack.i.b16 %v1512_v10, %v1511_v13  ;;  %v1659_v53 = vrot.slane %v1651_v12, %v11304_v2  ;;  %v1497_v23 = vpack.i.b16 %v1496_v14, %v1495_v16 }
 0x461   : > { %v1647_v22 = vcombine.high %v1623_v62, %v10811_v25  ;;  %v1505_v56 = vpack.i.b16 %v1504_v15, %v1503_v20  ;;  %v1668_v24 = vcombine.high %v1493_v4, %v1509_v61  ;;  %v1582_v41 = vcombine.high %v1578_v54, %v10811_v25 }
 0x462   : > { %1915 = vxpose.xlu1.c.b16.start.end [1/1] (short) (narrow) %v1571_v34, 16  ;;  %1819 = vxpose.xlu0.c.b16.start.end [1/1] (short) (narrow) %v1579_v40, 16  ;;  %v1683_v26 = vcombine.low %v1659_v53, %v1675_v18  ;;  %v1489_v27 = vpack.i.b16 %v1488_v19, %v1487_v52  ;;  %v1648_v28 = vcombine.high %v1630_v59, %v10811_v25  ;;  %v797_v12 = vsub.s32 2, %v11273_v42 }
 0x463   : > { %v1735_v29 = vcombine.low %v1497_v23, %v1513_v21  ;;  %v1652_v49 = vcombine.high %v1485_v6, %v1501_v5  ;;  %v1684_v32 = vcombine.high %v1659_v53, %v1675_v18  ;;  %v1682_v38 = vrot.slane %v1668_v24, %v11304_v2 }
 0x464   : > { %v1719_v30 = vcombine.low %v1489_v27, %v1505_v56  ;;  %v1691_v31 = vrot.slane %v1683_v26, %v11307_v9  ;;  %v1649_v33 = vcombine.high %v1639_v0, %v10811_v25  ;;  %v1650_v51 = vcombine.high %v1646_v11, %v10811_v25 }
 0x465   : > { %v1743_v34 = vrot.slane %v1735_v29, %v11304_v2  ;;  %v1666_v37 = vrot.slane %v1652_v49, %v11304_v2  ;;  %v1698_v46 = vrot.slane %v1684_v32, %v11307_v9  ;;  %v1736_v55 = vcombine.high %v1497_v23, %v1513_v21 }
 0x466   : > { %1979 = vxpose.xlu1.c.b16.start.end [1/1] (short) (narrow) %v1578_v54, 16  ;;  %1867 = vxpose.xlu0.c.b16.start.end [1/1] (short) (narrow) %v1630_v59, 16  ;;  %v1727_v40 = vrot.slane %v1719_v30, %v11304_v2  ;;  %v1720_v58 = vcombine.high %v1489_v27, %v1505_v56  ;;  %v1715_v6 = vcombine.high %v1691_v31, %v10811_v25 }
 0x467   : > { %v1699_v50 = vcombine.low %v1666_v37, %v1682_v38  ;;  %v1700_v60 = vcombine.high %v1666_v37, %v1682_v38  ;;  %v1750_v63 = vrot.slane %v1736_v55, %v11304_v2  ;;  %v1716_v10 = vcombine.high %v1698_v46, %v10811_v25 }
 0x468   : > { %v1751_v54 = vcombine.low %v1727_v40, %v1743_v34  ;;  %v798_v15 = vrot.slane %v11281_v44, %v797_v12 }
 0x469   : > { %v1707_v59 = vrot.slane %v1699_v50, %v11307_v9  ;;  %v1714_v1 = vrot.slane %v1700_v60, %v11307_v9 }
 0x46a   : > { %1803 = vxpose.xlu1.c.b16.start.end [1/1] (short) (narrow) %v1623_v62, 16  ;;  %1931 = vxpose.xlu0.c.b16.start.end [1/1] (short) (narrow) %v1639_v0, 16  ;;  %v1759_v61 = vrot.slane %v1751_v54, %v11307_v9  ;;  %v1752_v62 = vcombine.high %v1727_v40, %v1743_v34  ;;  %v1734_v0 = vrot.slane %v1720_v58, %v11304_v2 }
 0x46b   : > { %v1717_v13 = vcombine.high %v1707_v59, %v10811_v25  ;;  %v1718_v16 = vcombine.high %v1714_v1, %v10811_v25  ;;  %v11402_v18 = vadd.f32 %v11288_v48, %v798_v15 }
 0x46c   : > { %v1766_v4 = vrot.slane %v1752_v62, %v11307_v9  ;;  %v1767_v5 = vcombine.low %v1734_v0, %v1750_v63  ;;  %v1783_v14 = vcombine.high %v1759_v61, %v10811_v25 }
 0x46e   : > { %1883 = vxpose.xlu1.c.b16.start.end [1/1] (short) (narrow) %v1580_v8, 16  ;;  %1995 = vxpose.xlu0.c.b16.start.end [1/1] (short) (narrow) %v1646_v11, 16  ;;  %v1775_v7 = vrot.slane %v1767_v5, %v11307_v9  ;;  %v1768_v8 = vcombine.high %v1734_v0, %v1750_v63 }
 0x470   : > { %v1782_v11 = vrot.slane %v1768_v8, %v11307_v9  ;;  %v1785_v19 = vcombine.high %v1775_v7, %v10811_v25 }
 0x472   : > { %1947 = vxpose.xlu1.c.b16.start.end [1/1] (short) (narrow) %v1581_v17, 16  ;;  %1835 = vxpose.xlu0.c.b16.start.end [1/1] (short) (narrow) %v1647_v22, 16  ;;  %v1784_v17 = vcombine.high %v1766_v4, %v10811_v25  ;;  %v1786_v20 = vcombine.high %v1782_v11, %v10811_v25 }
 0x476   : > { %2011 = vxpose.xlu1.c.b16.start.end [1/1] (short) (narrow) %v1582_v41, 16  ;;  %1899 = vxpose.xlu0.c.b16.start.end [1/1] (short) (narrow) %v1648_v28, 16 }
 0x47a   : > { %2043 = vxpose.xlu1.c.b16.start.end [1/1] (short) (narrow) %v1691_v31, 16  ;;  %1963 = vxpose.xlu0.c.b16.start.end [1/1] (short) (narrow) %v1649_v33, 16 }
 0x47e   : > { %2107 = vxpose.xlu1.c.b16.start.end [1/1] (short) (narrow) %v1698_v46, 16  ;;  %2027 = vxpose.xlu0.c.b16.start.end [1/1] (short) (narrow) %v1650_v51, 16 }
 0x482   : > { %2171 = vxpose.xlu1.c.b16.start.end [1/1] (short) (narrow) %v1707_v59, 16  ;;  %2059 = vxpose.xlu0.c.b16.start.end [1/1] (short) (narrow) %v1759_v61, 16 }
 0x486   : > { %2235 = vxpose.xlu1.c.b16.start.end [1/1] (short) (narrow) %v1714_v1, 16  ;;  %2123 = vxpose.xlu0.c.b16.start.end [1/1] (short) (narrow) %v1766_v4, 16 }
 0x48a   : > { %2075 = vxpose.xlu1.c.b16.start.end [1/1] (short) (narrow) %v1715_v6, 16  ;;  %2187 = vxpose.xlu0.c.b16.start.end [1/1] (short) (narrow) %v1775_v7, 16 }
 0x48e   : > { %2139 = vxpose.xlu1.c.b16.start.end [1/1] (short) (narrow) %v1716_v10, 16  ;;  %2251 = vxpose.xlu0.c.b16.start.end [1/1] (short) (narrow) %v1782_v11, 16  ;;  %v1037_v11 = vcombine.low %v11329_v47, %v11323_v36 }
 0x492   : > { %2203 = vxpose.xlu1.c.b16.start.end [1/1] (short) (narrow) %v1717_v13, 16  ;;  %2091 = vxpose.xlu0.c.b16.start.end [1/1] (short) (narrow) %v1783_v14, 16 }
 0x496   : > { %2267 = vxpose.xlu1.c.b16.start.end [1/1] (short) (narrow) %v1718_v16, 16  ;;  %2155 = vxpose.xlu0.c.b16.start.end [1/1] (short) (narrow) %v1784_v17, 16  ;;  %v1038_v17 = vcombine.high %v11329_v47, %v11323_v36 }
 0x49a   : > { %1168 = vrot.lane.b32.xlu1 %v11402_v18, %s10814_s3  ;;  %2219 = vxpose.xlu0.c.b16.start.end [1/1] (short) (narrow) %v1785_v19, 16 }
 0x49e   : > { %1174 = vrot.lane.b32.xlu1 %v11402_v18, %s10813_s25  ;;  %2283 = vxpose.xlu0.c.b16.start.end [1/1] (short) (narrow) %v1786_v20, 16  ;;  %v1021_v20 = vcombine.low %v11294_v57, %v11321_v35 }
 0x4a0   : > { %v1029_v36 = vrot.slane %v1021_v20, %v11304_v2 }
 0x4a7   : > { %1171 = vrot.lane.b32.xlu0 %v11402_v18, %s10815_s2 }
 0x4c4   : > { %v1859_v44 = vpop.trf.xlu1  ;;  %v1795_v21 = vpop.trf.xlu0 }
 0x4c5   : > { %v2299_v32 = vcombine.low %v1795_v21, %v1859_v44  ;;  %v1022_v21 = vcombine.high %v11294_v57, %v11321_v35 }
 0x4c7   : > { %v2306_v51 = vrot.slane %v2299_v32, %v11304_v2 }
 0x4c8   : > { %v1923_v22 = vpop.trf.xlu1  ;;  %v1827_v48 = vpop.trf.xlu0 }
 0x4cc   : > { %v1987_v53 = vpop.trf.xlu1  ;;  %v1875_v52 = vpop.trf.xlu0 }
 0x4cd   : > { %v2315_v30 = vcombine.low %v1923_v22, %v1987_v53  ;;  %v1045_v22 = vrot.slane %v1037_v11, %v11304_v2 }
 0x4cf   : > { %v2322_v40 = vrot.slane %v2315_v30, %v11304_v2  ;;  %v1054_v35 = vcombine.high %v1029_v36, %v1045_v22 }
 0x4d0   : > { %v1811_v23 = vpop.trf.xlu1  ;;  %v1939_v56 = vpop.trf.xlu0 }
 0x4d1   : > { %v2349_v46 = vcombine.low %v1811_v23, %v1875_v52 }
 0x4d3   : > { %v2356_v61 = vrot.slane %v2349_v46, %v11304_v2 }
 0x4d4   : > { %v1891_v24 = vpop.trf.xlu1  ;;  %v2003_v41 = vpop.trf.xlu0 }
 0x4d5   : > { %v2307_v31 = vcombine.low %v1827_v48, %v1891_v24  ;;  %v2365_v54 = vcombine.low %v1939_v56, %v2003_v41  ;;  %v1052_v56 = vrot.slane %v1038_v17, %v11304_v2  ;;  %v1036_v41 = vrot.slane %v1022_v21, %v11304_v2 }
 0x4d7   : > { %v2314_v50 = vrot.slane %v2307_v31, %v11304_v2  ;;  %v2372_v0 = vrot.slane %v2365_v54, %v11304_v2  ;;  %v1068_v31 = vrot.slane %v1054_v35, %v11307_v9 }
 0x4d8   : > { %v1955_v26 = vpop.trf.xlu1  ;;  %v1843_v27 = vpop.trf.xlu0 }
 0x4d9   : > { %v2331_v62 = vcombine.low %v2306_v51, %v2314_v50  ;;  %v1086_v46 = vcombine.high %v1068_v31, %v10810_v3 }
 0x4db   : > { %v11430_v8 = vrot.slane %v2331_v62, %v11307_v9 }
 0x4dc   : > { %v2019_v28 = vpop.trf.xlu1  ;;  %v1907_v49 = vpop.trf.xlu0 }
 0x4dd   : > { %v2323_v29 = vcombine.low %v1955_v26, %v2019_v28  ;;  %v2357_v33 = vcombine.low %v1843_v27, %v1907_v49  ;;  %v1053_v26 = vcombine.low %v1029_v36, %v1045_v22  ;;  %v1069_v27 = vcombine.low %v1036_v41, %v1052_v56 }
 0x4de   : > { %v1070_v28 = vcombine.high %v1036_v41, %v1052_v56 }
 0x4df   : > { %v2330_v38 = vrot.slane %v2323_v29, %v11304_v2  ;;  %v2364_v58 = vrot.slane %v2357_v33, %v11304_v2  ;;  %v1061_v49 = vrot.slane %v1053_v26, %v11307_v9  ;;  %v1077_v32 = vrot.slane %v1069_v27, %v11307_v9 }
 0x4e0   : > { %v11413_v34 = vpop.trf.xlu1  ;;  %v1971_v37 = vpop.trf.xlu0 }
 0x4e1   : > { %v2339_v55 = vcombine.low %v2322_v40, %v2330_v38  ;;  %v2381_v4 = vcombine.low %v2356_v61, %v2364_v58  ;;  %v1084_v38 = vrot.slane %v1070_v28, %v11307_v9  ;;  %v1087_v50 = vcombine.high %v1077_v32, %v10810_v3 }
 0x4e2   : > { %v9565_v17 = vpack.c.bf16 %v1077_v32, %v1061_v49 }
 0x4e3   : > { %v11424_v1 = vrot.slane %v2339_v55, %v11307_v9  ;;  %v11435_v13 = vrot.slane %v2381_v4, %v11307_v9  ;;  %v1088_v51 = vcombine.high %v1084_v38, %v10810_v3  ;;  %v9566_v20 = vpack.c.bf16 %v1084_v38, %v1068_v31 }
 0x4e4   : > { %v11419_v59 = vpop.trf.xlu1  ;;  %v2035_v60 = vpop.trf.xlu0 }
 0x4e5   : > { %v2373_v63 = vcombine.low %v1971_v37, %v2035_v60  ;;  %v2347_v16 = vcombine.low %v11430_v8, %v11424_v1  ;;  %v1085_v37 = vcombine.high %v1061_v49, %v10810_v3  ;;  %v2399_v61 = vcombine.low %v11413_v34, %v11419_v59 }
 0x4e6   : > { %v9568_v4 = vpack.c.bf16 %v1088_v51, %v1086_v46 }
 0x4e7   : > { %v2380_v5 = vrot.slane %v2373_v63, %v11304_v2  ;;  %v2503_v52 = vshrl.u32 %v2347_v16, 16 }
 0x4e8   : > { %v2179_v6 = vpop.trf.xlu1  ;;  %v11427_v7 = vpop.trf.xlu0  ;;  %v1301_v21 = vrot.slane %v9568_v4, %v11304_v2 }
 0x4e9   : > { %v2389_v10 = vcombine.low %v2372_v0, %v2380_v5  ;;  %v9567_v0 = vpack.c.bf16 %v1087_v50, %v1085_v37 }
 0x4eb   : > { %v11438_v14 = vrot.slane %v2389_v10, %v11307_v9  ;;  %v1293_v59 = vrot.slane %v9567_v0, %v11304_v2 }
 0x4ec   : > { %v2243_v15 = vpop.trf.xlu1  ;;  %v2131_v19 = vpop.trf.xlu0 }
 0x4ed   : > { %v2397_v44 = vcombine.low %v11435_v13, %v11438_v14  ;;  %v2415_v58 = vcombine.low %v2179_v6, %v2243_v15  ;;  %v2449_v11 = vcombine.low %v11427_v7, %v2131_v19  ;;  %v2406_v6 = vrot.slane %v2399_v61, %v11304_v2 }
 0x4ee   : > { %v1268_v7 = vrot.slane %v9565_v17, %v11304_v2  ;;  %v1276_v19 = vrot.slane %v9566_v20, %v11304_v2 }
 0x4ef   : > { %v2501_v53 = vpack.i.b16 %v2397_v44, %v2347_v16  ;;  %v2504_v23 = vshrl.u32 %v2397_v44, 16  ;;  %v2422_v10 = vrot.slane %v2415_v58, %v11304_v2 }
 0x4f0   : > { %v2083_v48 = vpop.trf.xlu1  ;;  %v2195_v24 = vpop.trf.xlu0 }
 0x4f1   : > { %9895 = vmatpush3.bf16.msra.mxu0 %v2501_v53  ;;  %v2505_v47 = vpack.i.b16 %v2504_v23, %v2503_v52 }
 0x4f2   : > { %9896 = vmatprep.subr.bf16.mxu0 %v10810_v3 }
 0x4f3   : > { %9903 = vmatpush3.bf16.msra.mxu1 %v2505_v47  ;;  %v1302_v47 = vcombine.low %v1293_v59, %v1301_v21 }
 0x4f4   : > { %v2147_v57 = vpop.trf.xlu1  ;;  %v2259_v29 = vpop.trf.xlu0  ;;  %9904 = vmatprep.subr.bf16.mxu1 %v10810_v3 }
 0x4f5   : > { %v2407_v60 = vcombine.low %v2083_v48, %v2147_v57  ;;  %v2465_v15 = vcombine.low %v2195_v24, %v2259_v29  ;;  %v2456_v48 = vrot.slane %v2449_v11, %v11304_v2  ;;  %v1277_v57 = vcombine.low %v1268_v7, %v1276_v19 }
 0x4f6   : > { %v1309_v29 = vrot.slane %v1302_v47, %v11307_v9 }
 0x4f7   : > { %v2414_v16 = vrot.slane %v2407_v60, %v11304_v2  ;;  %v2472_v23 = vrot.slane %v2465_v15, %v11304_v2  ;;  %v1284_v31 = vrot.slane %v1277_v57, %v11307_v9 }
 0x4f8   : > { %v2211_v30 = vpop.trf.xlu1  ;;  %v2099_v33 = vpop.trf.xlu0  ;;  %v1315_v46 = vshrl.u32 %v1309_v29, 16 }
 0x4f9   : > { %v2431_v53 = vcombine.low %v2406_v6, %v2414_v16  ;;  %v1314_v58 = vshrl.u32 %v1284_v31, 16  ;;  %v1285_v0 = vcombine.high %v1284_v31, %v10811_v25 }
 0x4fb   : > { %v2438_v41 = vrot.slane %v2431_v53, %v11307_v9  ;;  %v1316_v61 = vpack.i.b16 %v1315_v46, %v1314_v58  ;;  %v1320_v20 = vshrl.u32 %v1285_v0, 16 }
 0x4fc   : > { %v2275_v40 = vpop.trf.xlu1  ;;  %v2163_v55 = vpop.trf.xlu0 }
 0x4fd   : > { %v2423_v54 = vcombine.low %v2211_v30, %v2275_v40  ;;  %v2457_v63 = vcombine.low %v2099_v33, %v2163_v55  ;;  %v2398_v30 = vcombine.high %v11435_v13, %v11438_v14  ;;  %v2348_v40 = vcombine.high %v11430_v8, %v11424_v1 }
 0x4fe   : > { %v1313_v55 = vpack.i.b16 %v1309_v29, %v1284_v31  ;;  %v1310_v1 = vcombine.high %v1309_v29, %v10811_v25 }
 0x4ff   : > { %v2430_v62 = vrot.slane %v2423_v54, %v11304_v2  ;;  %v2464_v34 = vrot.slane %v2457_v63, %v11304_v2  ;;  %v2512_v51 = vshrl.u32 %v2398_v30, 16  ;;  %v2509_v13 = vpack.i.b16 %v2398_v30, %v2348_v40 }
 0x500   : > { %v2227_v5 = vpop.trf.xlu0  ;;  %v2511_v14 = vshrl.u32 %v2348_v40, 16  ;;  %v1321_v11 = vshrl.u32 %v1310_v1, 16 }
 0x501   : > { %v2439_v44 = vcombine.low %v2422_v10, %v2430_v62  ;;  %v2481_v24 = vcombine.low %v2456_v48, %v2464_v34  ;;  %v1319_v34 = vpack.i.b16 %v1310_v1, %v1285_v0 }
 0x502   : > { %v2513_v62 = vpack.i.b16 %v2512_v51, %v2511_v14  ;;  %v1322_v48 = vpack.i.b16 %v1321_v11, %v1320_v20 }
 0x503   : > { %v2446_v56 = vrot.slane %v2439_v44, %v11307_v9  ;;  %v2488_v35 = vrot.slane %v2481_v24, %v11307_v9 }
 0x504   : > { %v2291_v22 = vpop.trf.xlu0 }
 0x505   : > { %v2473_v52 = vcombine.low %v2227_v5, %v2291_v22  ;;  %v2447_v28 = vcombine.low %v2438_v41, %v2446_v56  ;;  %v2448_v60 = vcombine.high %v2438_v41, %v2446_v56 }
 0x507   : > { %v2480_v36 = vrot.slane %v2473_v52, %v11304_v2  ;;  %v2519_v33 = vshrl.u32 %v2447_v28, 16  ;;  %v2527_v5 = vshrl.u32 %v2448_v60, 16 }
 0x509   : > { %v2489_v26 = vcombine.low %v2472_v23, %v2480_v36 }
 0x50b   : > { %v2496_v27 = vrot.slane %v2489_v26, %v11307_v9 }
 0x50c   : > { %v1169_v32 = vpop.permute.xlu1 %1168 }
 0x50d   : > { %v2497_v49 = vcombine.low %v2488_v35, %v2496_v27  ;;  %v2498_v54 = vcombine.high %v2488_v35, %v2496_v27 }
 0x50f   : > { %v2517_v38 = vpack.i.b16 %v2497_v49, %v2447_v28  ;;  %v2520_v37 = vshrl.u32 %v2497_v49, 16  ;;  %v2528_v63 = vshrl.u32 %v2498_v54, 16  ;;  %v2525_v4 = vpack.i.b16 %v2498_v54, %v2448_v60 }
 0x510   : > { %v1175_v8 = vpop.permute.xlu1 %1174 }
 0x511   : > { %9897 = vmatpush3.bf16.msra.mxu0 %v2517_v38  ;;  %v2521_v50 = vpack.i.b16 %v2520_v37, %v2519_v33  ;;  %v1193_v10 = vcombine.low %v1169_v32, %v1175_v8  ;;  %v2529_v17 = vpack.i.b16 %v2528_v63, %v2527_v5  ;;  %v1194_v6 = vcombine.high %v1169_v32, %v1175_v8 }
 0x512   : > { %9910 = vmatprep.subr.bf16.mxu0 %v10810_v3 }
 0x513   : > { %9905 = vmatpush3.bf16.msra.mxu1 %v2521_v50  ;;  %v1201_v59 = vrot.slane %v1193_v10, %v11304_v2  ;;  %v1208_v53 = vrot.slane %v1194_v6, %v11304_v2 }
 0x514   : > { %9899 = vmatmul.mubr.msk.bf16.vlgmr.msra.gmra.mrb[4].mxu0 %vm2531_vm1, %v1313_v55  ;;  %9918 = vmatprep.subr.bf16.mxu1 %v10810_v3 }
 0x515   : > { %9911 = vmatpush3.bf16.msra.mxu0 %v2509_v13  ;;  %9914 = vmatprep.mubr.msk.bf16.mxu0 %vm10812_vm0, %v10810_v3 }
 0x516   : > { %9907 = vmatmul.mubr.msk.bf16.vlgmr.msra.gmra.mrb[4].mxu1 %vm2531_vm1, %v1316_v61  ;;  %9912 = vmatprep.subr.bf16.mxu0 %v10810_v3 }
 0x517   : > { %9919 = vmatpush3.bf16.msra.mxu1 %v2513_v62  ;;  %9922 = vmatprep.mubr.msk.bf16.mxu1 %vm10812_vm0, %v10810_v3 }
 0x518   : > { %9920 = vmatprep.subr.bf16.mxu1 %v10810_v3 }
 0x519   : > { %9913 = vmatpush3.bf16.msra.mxu0 %v2525_v4  ;;  %v1172_v16 = vpop.permute.xlu0 %1171 }
 0x51a   : > { %v1177_v15 = vcombine.low %v11402_v18, %v1172_v16  ;;  %v1178_v44 = vcombine.high %v11402_v18, %v1172_v16 }
 0x51b   : > { %9921 = vmatpush3.bf16.msra.mxu1 %v2529_v17 }
 0x51c   : > { %v1185_v21 = vrot.slane %v1177_v15, %v11304_v2  ;;  %v1192_v22 = vrot.slane %v1178_v44, %v11304_v2  ;;  %9915 = vmatmul.mubr.msk.bf16.vlgmr.msra.gmra.mrb[8].mxu0 %vm2531_vm1, %v1319_v34 }
 0x51e   : > { %v1209_v52 = vcombine.low %v1185_v21, %v1201_v59  ;;  %9923 = vmatmul.mubr.msk.bf16.vlgmr.msra.gmra.mrb[8].mxu1 %vm2531_vm1, %v1322_v48  ;;  %v1210_v7 = vcombine.high %v1185_v21, %v1201_v59  ;;  %v1225_v23 = vcombine.low %v1192_v22, %v1208_v53  ;;  %v1226_v26 = vcombine.high %v1192_v22, %v1208_v53 }
 0x520   : > { %v1217_v19 = vrot.slane %v1209_v52, %v11307_v9  ;;  %v1224_v18 = vrot.slane %v1210_v7, %v11307_v9  ;;  %v1233_v41 = vrot.slane %v1225_v23, %v11307_v9  ;;  %v1240_v28 = vrot.slane %v1226_v26, %v11307_v9 }
 0x522   : > { %v2771_v56 = vpack.c.bf16 %v1217_v19, %v1217_v19  ;;  %v1241_v24 = vcombine.high %v1217_v19, %v10810_v3  ;;  %v1242_v36 = vcombine.high %v1224_v18, %v10810_v3  ;;  %v1243_v35 = vcombine.high %v1233_v41, %v10810_v3 }
 0x523   : > { %v2773_v27 = vpack.c.bf16 %v1224_v18, %v1224_v18  ;;  %v1244_v49 = vcombine.high %v1240_v28, %v10810_v3  ;;  %v2775_v30 = vpack.c.bf16 %v1233_v41, %v1233_v41  ;;  %v2777_v32 = vpack.c.bf16 %v1240_v28, %v1240_v28 }
 0x524   : > { %2779 = vxpose.xlu1.c.b16.start.end [1/1] (short) (narrow) %v2771_v56, 32  ;;  %v2772_v47 = vpack.c.bf16 %v1241_v24, %v1241_v24  ;;  %v2774_v57 = vpack.c.bf16 %v1242_v36, %v1242_v36  ;;  %v2776_v29 = vpack.c.bf16 %v1243_v35, %v1243_v35 }
 0x525   : > { %v2778_v31 = vpack.c.bf16 %v1244_v49, %v1244_v49 }
 0x526   : > { %2795 = vxpose.xlu0.c.b16.start.end [1/1] (short) (narrow) %v2772_v47, 32 }
 0x529   : > { %2827 = vxpose.xlu1.c.b16.start.end [1/1] (short) (narrow) %v2774_v57, 32 }
 0x52b   : > { %2811 = vxpose.xlu0.c.b16.start.end [1/1] (short) (narrow) %v2773_v27, 32 }
 0x52e   : > { %2859 = vxpose.xlu1.c.b16.start.end [1/1] (short) (narrow) %v2776_v29, 32 }
 0x530   : > { %2843 = vxpose.xlu0.c.b16.start.end [1/1] (short) (narrow) %v2775_v30, 32 }
 0x533   : > { %2891 = vxpose.xlu1.c.b16.start.end [1/1] (short) (narrow) %v2778_v31, 32 }
 0x535   : > { %2875 = vxpose.xlu0.c.b16.start.end [1/1] (short) (narrow) %v2777_v32, 32 }
 0x58a   : > { %v2787_v38 = vpop.trf.xlu1 }
 0x58b   : > { %v2911_v61 = vshrl.u32 %v2787_v38, 16 }
 0x58c   : > { %v2803_v33 = vpop.trf.xlu0 }
 0x58d   : > { %v2912_v1 = vshrl.u32 %v2803_v33, 16  ;;  %v11519_v63 = vpack.i.b16 %v2803_v33, %v2787_v38 }
 0x58e   : > { %v2788_v37 = vpop.trf.xlu1 }
 0x58f   : > { %v2943_v13 = vshrl.u32 %v2788_v37, 16  ;;  %v11527_v44 = vpack.i.b16 %v2912_v1, %v2911_v61 }
 0x590   : > { %v2804_v40 = vpop.trf.xlu0 }
 0x591   : > { %v2944_v14 = vshrl.u32 %v2804_v40, 16  ;;  %v11517_v8 = vpack.i.b16 %v2804_v40, %v2788_v37 }
 0x592   : > { %v2835_v46 = vpop.trf.xlu1 }
 0x593   : > { %v11521_v10 = vpack.i.b16 %v2944_v14, %v2943_v13  ;;  %v2920_v20 = vshrl.u32 %v2835_v46, 16 }
 0x594   : > { %v2819_v50 = vpop.trf.xlu0 }
 0x595   : > { %v2919_v6 = vshrl.u32 %v2819_v50, 16  ;;  %v2917_v34 = vpack.i.b16 %v2835_v46, %v2819_v50 }
 0x596   : > { %v2836_v51 = vpop.trf.xlu1 }
 0x597   : > { %v2952_v22 = vshrl.u32 %v2836_v51, 16  ;;  %v2921_v56 = vpack.i.b16 %v2920_v20, %v2919_v6 }
 0x598   : > { %v2820_v54 = vpop.trf.xlu0 }
 0x599   : > { %v2951_v48 = vshrl.u32 %v2820_v54, 16  ;;  %v11537_v47 = vpack.i.b16 %v2836_v51, %v2820_v54 }
 0x59a   : > { %v2867_v55 = vpop.trf.xlu1 }
 0x59b   : > { %v2928_v0 = vshrl.u32 %v2867_v55, 16  ;;  %v11539_v57 = vpack.i.b16 %v2952_v22, %v2951_v48 }
 0x59c   : > { %v2851_v58 = vpop.trf.xlu0 }
 0x59d   : > { %v2927_v4 = vshrl.u32 %v2851_v58, 16  ;;  %v11523_v11 = vpack.i.b16 %v2867_v55, %v2851_v58 }
 0x59e   : > { %v2868_v60 = vpop.trf.xlu1 }
 0x59f   : > { %v2960_v62 = vshrl.u32 %v2868_v60, 16  ;;  %v2929_v53 = vpack.i.b16 %v2928_v0, %v2927_v4  ;;  %v2971_v19 = vcombine.low %v11519_v63, %v11523_v11 }
 0x5a0   : > { %v2852_v5 = vpop.trf.xlu0 }
 0x5a1   : > { %v11525_v16 = vpack.i.b16 %v2868_v60, %v2852_v5  ;;  %v2959_v17 = vshrl.u32 %v2852_v5, 16  ;;  %v3039_v28 = vcombine.low %v11527_v44, %v2929_v53  ;;  %v2979_v30 = vrot.slane %v2971_v19, %v11304_v2 }
 0x5a2   : > { %v2899_v15 = vpop.trf.xlu1  ;;  %v2972_v60 = vcombine.high %v11519_v63, %v11523_v11  ;;  %v3040_v11 = vcombine.high %v11527_v44, %v2929_v53 }
 0x5a3   : > { %v11529_v59 = vpack.i.b16 %v2960_v62, %v2959_v17  ;;  %v3108_v21 = vcombine.high %v11517_v8, %v11525_v16  ;;  %v2936_v52 = vshrl.u32 %v2899_v15, 16  ;;  %v3047_v40 = vrot.slane %v3039_v28, %v11304_v2 }
 0x5a4   : > { %v2883_v7 = vpop.trf.xlu0 }
 0x5a5   : > { %v3176_v18 = vcombine.high %v11521_v10, %v11529_v59  ;;  %v2933_v23 = vpack.i.b16 %v2899_v15, %v2883_v7  ;;  %v2935_v24 = vshrl.u32 %v2883_v7, 16  ;;  %v11569_v20 = vrot.slane %v3108_v21, %v11304_v2 }
 0x5a6   : > { %v2900_v36 = vpop.trf.xlu1  ;;  %v2986_v15 = vrot.slane %v2972_v60, %v11304_v2  ;;  %v3054_v7 = vrot.slane %v3040_v11, %v11304_v2 }
 0x5a7   : > { %v2987_v41 = vcombine.low %v2917_v34, %v2933_v23  ;;  %v2968_v26 = vshrl.u32 %v2900_v36, 16  ;;  %v2937_v35 = vpack.i.b16 %v2936_v52, %v2935_v24  ;;  %v2988_v58 = vcombine.high %v2917_v34, %v2933_v23 }
 0x5a8   : > { %v2884_v27 = vpop.trf.xlu0  ;;  %v11560_v61 = vrot.slane %v3176_v18, %v11304_v2 }
 0x5a9   : > { %v11542_v29 = vpack.i.b16 %v2900_v36, %v2884_v27  ;;  %v2967_v49 = vshrl.u32 %v2884_v27, 16  ;;  %v2995_v31 = vrot.slane %v2987_v41, %v11304_v2  ;;  %v3055_v32 = vcombine.low %v2921_v56, %v2937_v35 }
 0x5aa   : > { %v3056_v0 = vcombine.high %v2921_v56, %v2937_v35  ;;  %v3002_v17 = vrot.slane %v2988_v58, %v11304_v2 }
 0x5ab   : > { %v11546_v38 = vpack.i.b16 %v2968_v26, %v2967_v49  ;;  %v3124_v33 = vcombine.high %v11537_v47, %v11542_v29  ;;  %v3003_v37 = vcombine.low %v2979_v30, %v2995_v31  ;;  %v3063_v46 = vrot.slane %v3055_v32, %v11304_v2 }
 0x5ac   : > { %v3004_v14 = vcombine.high %v2979_v30, %v2995_v31  ;;  %v3070_v52 = vrot.slane %v3056_v0, %v11304_v2  ;;  %v3019_v53 = vcombine.low %v2986_v15, %v3002_v17  ;;  %v3020_v36 = vcombine.high %v2986_v15, %v3002_v17  ;;  %v9573_v30 = vld [vmem:[%s12443_s20] ss:$0 sm:$0xff]  ;;  %s12493_s20 = scalar_lea.vmem [#allocation5], %s11222_s10 }
 0x5ad   : > { %v3192_v50 = vcombine.high %v11539_v57, %v11546_v38  ;;  %v3011_v51 = vrot.slane %v3003_v37, %v11307_v9  ;;  %v3071_v54 = vcombine.low %v3047_v40, %v3063_v46  ;;  %v3072_v62 = vcombine.high %v3047_v40, %v3063_v46 }
 0x5ae   : > { %v3018_v5 = vrot.slane %v3004_v14, %v11307_v9  ;;  %v11572_v63 = vrot.slane %v3124_v33, %v11304_v2  ;;  %v3087_v18 = vcombine.low %v3054_v7, %v3070_v52  ;;  %v3027_v23 = vrot.slane %v3019_v53, %v11307_v9 }
 0x5af   : > { %3243 = vxpose.xlu0.c.b16.start.end [1/1] (short) (narrow) %v3011_v51, 16  ;;  %v3079_v55 = vrot.slane %v3071_v54, %v11307_v9  ;;  %v3035_v13 = vcombine.high %v3011_v51, %v10811_v25  ;;  %v11564_v4 = vrot.slane %v3192_v50, %v11304_v2  ;;  %v3086_v48 = vrot.slane %v3072_v62, %v11307_v9 }
 0x5b0   : > { %v3155_v34 = vcombine.low %v11569_v20, %v11572_v63  ;;  %v3156_v21 = vcombine.high %v11569_v20, %v11572_v63  ;;  %v3036_v44 = vcombine.high %v3018_v5, %v10811_v25  ;;  %v3095_v56 = vrot.slane %v3087_v18, %v11307_v9 }
 0x5b1   : > { %3259 = vxpose.xlu1.c.b16.start.end [1/1] (short) (narrow) %v3079_v55, 16  ;;  %v3103_v1 = vcombine.high %v3079_v55, %v10811_v25  ;;  %v3223_v6 = vcombine.low %v11560_v61, %v11564_v4  ;;  %v3224_v22 = vcombine.high %v11560_v61, %v11564_v4  ;;  %v3104_v19 = vcombine.high %v3086_v48, %v10811_v25 }
 0x5b2   : > { %v3037_v24 = vcombine.high %v3027_v23, %v10811_v25  ;;  %v3105_v41 = vcombine.high %v3095_v56, %v10811_v25  ;;  %v3088_v26 = vcombine.high %v3054_v7, %v3070_v52  ;;  %v3034_v35 = vrot.slane %v3020_v36, %v11307_v9 }
 0x5b3   : > { %3275 = vxpose.xlu0.c.b16.start.end [1/1] (short) (narrow) %v3035_v13, 16  ;;  %v3191_v52 = vcombine.low %v11539_v57, %v11546_v38  ;;  %v3123_v53 = vcombine.low %v11537_v47, %v11542_v29  ;;  %v3107_v7 = vcombine.low %v11517_v8, %v11525_v16 }
 0x5b4   : > { %v3102_v27 = vrot.slane %v3088_v26, %v11307_v9  ;;  %v3038_v28 = vcombine.high %v3034_v35, %v10811_v25 }
 0x5b5   : > { %3291 = vxpose.xlu1.c.b16.start.end [1/1] (short) (narrow) %v3103_v1, 16  ;;  %v11625_v57 = vrot.slane %v3107_v7, %v11304_v2 }
 0x5b6   : > { %v3106_v49 = vcombine.high %v3102_v27, %v10811_v25 }
 0x5b7   : > { %3307 = vxpose.xlu0.c.b16.start.end [1/1] (short) (narrow) %v3018_v5, 16 }
 0x5b9   : > { %3323 = vxpose.xlu1.c.b16.start.end [1/1] (short) (narrow) %v3086_v48, 16 }
 0x5bb   : > { %3339 = vxpose.xlu0.c.b16.start.end [1/1] (short) (narrow) %v3036_v44, 16  ;;  %v3175_v44 = vcombine.low %v11521_v10, %v11529_v59 }
 0x5bd   : > { %3355 = vxpose.xlu1.c.b16.start.end [1/1] (short) (narrow) %v3104_v19, 16  ;;  %v11616_v19 = vrot.slane %v3191_v52, %v11304_v2  ;;  %v11619_v18 = vrot.slane %v3175_v44, %v11304_v2 }
 0x5bf   : > { %3371 = vxpose.xlu0.c.b16.start.end [1/1] (short) (narrow) %v3027_v23, 16  ;;  %v11622_v23 = vrot.slane %v3123_v53, %v11304_v2  ;;  %v3207_v10 = vcombine.low %v11619_v18, %v11616_v19 }
 0x5c1   : > { %3387 = vxpose.xlu1.c.b16.start.end [1/1] (short) (narrow) %v3095_v56, 16  ;;  %v3139_v47 = vcombine.low %v11625_v57, %v11622_v23  ;;  %v11632_v8 = vrot.slane %v3207_v10, %v11307_v9 }
 0x5c3   : > { %3403 = vxpose.xlu0.c.b16.start.end [1/1] (short) (narrow) %v3037_v24, 16  ;;  %v11636_v38 = vrot.slane %v3139_v47, %v11307_v9 }
 0x5c5   : > { %3419 = vxpose.xlu1.c.b16.start.end [1/1] (short) (narrow) %v3105_v41, 16 }
 0x5c7   : > { %3435 = vxpose.xlu0.c.b16.start.end [1/1] (short) (narrow) %v3034_v35, 16 }
 0x5c9   : > { %3451 = vxpose.xlu1.c.b16.start.end [1/1] (short) (narrow) %v3102_v27, 16 }
 0x5cb   : > { %3467 = vxpose.xlu0.c.b16.start.end [1/1] (short) (narrow) %v3038_v28, 16 }
 0x5cd   : > { %3483 = vxpose.xlu1.c.b16.start.end [1/1] (short) (narrow) %v3106_v49, 16 }
 0x5e7   : > { %v2569_v31 = vpop.f32.mrb[4].mxu0 }
 0x5e8   : > { %v2704_v32 = vmul.f32 0.17677669, %v2569_v31  ;;  %v9900_v33 = vpop.f32.mrb[5].mxu0 }
 0x5e9   : > { %v2572_v37 = vpop.f32.mrb[6].mxu0  ;;  %v2612_v40 = vpop.f32.mrb[4].mxu1 }
 0x5ea   : > { %v11599_v46 = vadd.f32 %v9573_v30, %v2704_v32  ;;  %v2705_v50 = vmul.f32 0.17677669, %v2612_v40  ;;  %v9901_v51 = vpop.f32.mrb[7].mxu0  ;;  %v9908_v54 = vpop.f32.mrb[5].mxu1 }
 0x5eb   : > { %v2615_v55 = vpop.f32.mrb[6].mxu1 }
 0x5ec   : > { %v9909_v58 = vpop.f32.mrb[7].mxu1  ;;  %v2719_v13 = vsel %vm2718_vm2, %v11599_v46, -inf  ;;  %v11603_v14 = vadd.f32 %v9573_v30, %v2705_v50 }
 0x5ed   : > { %2720 = vmax.xlane.f32.xlu1 %v2719_v13 }
 0x5ee   : > { %v2722_v60 = vsel %vm2718_vm2, %v11603_v14, -inf }
 0x5ef   : > { %v2655_v1 = vpop.f32.mrb[8].mxu0  ;;  %2723 = vmax.xlane.f32.xlu0 %v2722_v60 }
 0x5f0   : > { %v9916_v62 = vpop.f32.mrb[9].mxu0  ;;  %v2706_v36 = vmul.f32 0.17677669, %v2655_v1 }
 0x5f1   : > { %v2658_v0 = vpop.f32.mrb[10].mxu0  ;;  %v2698_v5 = vpop.f32.mrb[8].mxu1 }
 0x5f2   : > { %v9917_v17 = vpop.f32.mrb[11].mxu0  ;;  %v9924_v11 = vpop.f32.mrb[9].mxu1  ;;  %v2707_v41 = vmul.f32 0.17677669, %v2698_v5  ;;  %v11639_v27 = vadd.f32 %v9573_v30, %v2706_v36 }
 0x5f3   : > { %v2701_v15 = vpop.f32.mrb[10].mxu1 }
 0x5f4   : > { %v9925_v48 = vpop.f32.mrb[11].mxu1  ;;  %v11641_v28 = vadd.f32 %v9573_v30, %v2707_v41  ;;  %v2725_v32 = vsel %vm2718_vm2, %v11639_v27, -inf }
 0x5f6   : > { %v2728_v33 = vsel %vm2718_vm2, %v11641_v28, -inf }
 0x615   : > { %v3251_v59 = vpop.trf.xlu0 }
 0x617   : > { %v3267_v16 = vpop.trf.xlu1 }
 0x619   : > { %v3283_v29 = vpop.trf.xlu0 }
 0x61a   : > { %3515 = vxpose.xlu1.c.b16.start.end [1/1] (short) (narrow) %v11632_v8, 16 }
 0x61b   : > { %v3299_v56 = vpop.trf.xlu1 }
 0x61c   : > { %3499 = vxpose.xlu0.c.b16.start.end [1/1] (short) (narrow) %v11636_v38, 16 }
 0x61d   : > { %v3315_v24 = vpop.trf.xlu0 }
 0x61e   : > { %v3755_v50 = vcombine.low %v3251_v59, %v3315_v24 }
 0x61f   : > { %v3331_v26 = vpop.trf.xlu1 }
 0x620   : > { %v3805_v55 = vcombine.low %v3267_v16, %v3331_v26  ;;  %v3762_v30 = vrot.slane %v3755_v50, %v11304_v2 }
 0x621   : > { %v3347_v35 = vpop.trf.xlu0 }
 0x622   : > { %v3763_v51 = vcombine.low %v3283_v29, %v3347_v35  ;;  %v3812_v0 = vrot.slane %v3805_v55, %v11304_v2 }
 0x623   : > { %v3363_v49 = vpop.trf.xlu1 }
 0x624   : > { %v3813_v58 = vcombine.low %v3299_v56, %v3363_v49  ;;  %v3770_v60 = vrot.slane %v3763_v51, %v11304_v2 }
 0x625   : > { %v3379_v31 = vpop.trf.xlu0 }
 0x626   : > { %v3820_v5 = vrot.slane %v3813_v58, %v11304_v2  ;;  %v3787_v15 = vcombine.low %v3762_v30, %v3770_v60  ;;  %v3239_v58 = vcombine.high %v11632_v8, %v10811_v25  ;;  %v3171_v30 = vcombine.high %v11636_v38, %v10811_v25 }
 0x627   : > { %2726 = vmax.xlane.f32.xlu1 %v2725_v32  ;;  %v3395_v37 = vpop.trf.xlu1  ;;  %v3140_v60 = vcombine.high %v11625_v57, %v11622_v23  ;;  %v3238_v38 = vrot.slane %v3224_v22, %v11307_v9 }
 0x628   : > { %v3837_v7 = vcombine.low %v3812_v0, %v3820_v5  ;;  %v3794_v47 = vrot.slane %v3787_v15, %v11307_v9 }
 0x629   : > { %2729 = vmax.xlane.f32.xlu0 %v2728_v33  ;;  %v3411_v40 = vpop.trf.xlu0 }
 0x62a   : > { %v3844_v24 = vrot.slane %v3837_v7, %v11307_v9 }
 0x62b   : > { %v3427_v54 = vpop.trf.xlu1 }
 0x62d   : > { %v3443_v13 = vpop.trf.xlu0 }
 0x62e   : > { %v3771_v1 = vcombine.low %v3379_v31, %v3443_v13  ;;  %v3208_v13 = vcombine.high %v11619_v18, %v11616_v19  ;;  %v3231_v19 = vrot.slane %v3223_v6, %v11307_v9  ;;  %v3163_v18 = vrot.slane %v3155_v34, %v11307_v9 }
 0x62f   : > { %v3459_v62 = vpop.trf.xlu1  ;;  %v3170_v6 = vrot.slane %v3156_v21, %v11307_v9 }
 0x630   : > { %v3821_v17 = vcombine.low %v3395_v37, %v3459_v62  ;;  %v3778_v48 = vrot.slane %v3771_v1, %v11304_v2  ;;  %v3222_v1 = vrot.slane %v3208_v13, %v11307_v9  ;;  %v3154_v62 = vrot.slane %v3140_v60, %v11307_v9 }
 0x631   : > { %v3475_v11 = vpop.trf.xlu0  ;;  %v3241_v23 = vcombine.high %v3231_v19, %v10811_v25  ;;  %v3173_v57 = vcombine.high %v3163_v18, %v10811_v25  ;;  %v3174_v13 = vcombine.high %v3170_v6, %v10811_v25 }
 0x632   : > { %v3779_v52 = vcombine.low %v3411_v40, %v3475_v11  ;;  %v3828_v10 = vrot.slane %v3821_v17, %v11304_v2  ;;  %v3240_v0 = vcombine.high %v3222_v1, %v10811_v25  ;;  %v3172_v8 = vcombine.high %v3154_v62, %v10811_v25 }
 0x633   : > { %v3491_v44 = vpop.trf.xlu1 }
 0x634   : > { %v3786_v53 = vrot.slane %v3779_v52, %v11304_v2  ;;  %v3829_v59 = vcombine.low %v3427_v54, %v3491_v44 }
 0x636   : > { %v3795_v16 = vcombine.low %v3778_v48, %v3786_v53  ;;  %v3836_v29 = vrot.slane %v3829_v59, %v11304_v2 }
 0x638   : > { %v3802_v56 = vrot.slane %v3795_v16, %v11307_v9  ;;  %v3845_v36 = vcombine.low %v3828_v10, %v3836_v29 }
 0x63a   : > { %v3803_v41 = vcombine.low %v3794_v47, %v3802_v56  ;;  %v11658_v26 = vcombine.high %v3794_v47, %v3802_v56  ;;  %v3852_v35 = vrot.slane %v3845_v36, %v11307_v9 }
 0x63c   : > { %v3853_v49 = vcombine.low %v3844_v24, %v3852_v35  ;;  %v11661_v31 = vcombine.high %v3844_v24, %v3852_v35  ;;  %v3958_v32 = vshrl.u32 %v3803_v41, 16  ;;  %v3964_v33 = vshrl.u32 %v11658_v26, 16 }
 0x63e   : > { %v3957_v37 = vpack.i.b16 %v3853_v49, %v3803_v41  ;;  %v3959_v40 = vshrl.u32 %v3853_v49, 16  ;;  %v3963_v50 = vpack.i.b16 %v11661_v31, %v11658_v26  ;;  %v3965_v51 = vshrl.u32 %v11661_v31, 16 }
 0x640   : > { %9928 = vmatprep.mubr.msk.bf16.mxu0 %vm2718_vm2, %v3957_v37  ;;  %v3960_v54 = vpack.i.b16 %v3959_v40, %v3958_v32  ;;  %v11668_v55 = vpack.i.b16 %v3965_v51, %v3964_v33 }
 0x642   : > { %9934 = vmatprep.mubr.msk.bf16.mxu1 %vm2718_vm2, %v3960_v54 }
 0x654   : > { %3547 = vxpose.xlu1.c.b16.start.end [1/1] (short) (narrow) %v3239_v58, 16 }
 0x656   : > { %3531 = vxpose.xlu0.c.b16.start.end [1/1] (short) (narrow) %v3171_v30, 16  ;;  %v3242_v30 = vcombine.high %v3238_v38, %v10811_v25 }
 0x658   : > { %3579 = vxpose.xlu1.c.b16.start.end [1/1] (short) (narrow) %v3222_v1, 16 }
 0x65a   : > { %3563 = vxpose.xlu0.c.b16.start.end [1/1] (short) (narrow) %v3154_v62, 16 }
 0x65c   : > { %3611 = vxpose.xlu1.c.b16.start.end [1/1] (short) (narrow) %v3240_v0, 16 }
 0x65e   : > { %3595 = vxpose.xlu0.c.b16.start.end [1/1] (short) (narrow) %v3172_v8, 16 }
 0x660   : > { %3643 = vxpose.xlu1.c.b16.start.end [1/1] (short) (narrow) %v3231_v19, 16 }
 0x662   : > { %3627 = vxpose.xlu0.c.b16.start.end [1/1] (short) (narrow) %v3163_v18, 16 }
 0x664   : > { %3675 = vxpose.xlu1.c.b16.start.end [1/1] (short) (narrow) %v3241_v23, 16 }
 0x666   : > { %3659 = vxpose.xlu0.c.b16.start.end [1/1] (short) (narrow) %v3173_v57, 16 }
 0x668   : > { %3707 = vxpose.xlu1.c.b16.start.end [1/1] (short) (narrow) %v3238_v38, 16 }
 0x66a   : > { %3691 = vxpose.xlu0.c.b16.start.end [1/1] (short) (narrow) %v3170_v6, 16 }
 0x67a   : > { %v2721_v34 = vpop.xlane.xlu1 %2720 }
 0x67b   : > { %v2731_v5 = vsub.f32 %v11599_v46, %v2721_v34 }
 0x67c   : > { %v2724_v17 = vpop.xlane.xlu0 %2723 }
 0x67d   : > { %v2735_v11 = vmul.f32 1.442695, %v2731_v5  ;;  %v2732_v15 = vsub.f32 %v11603_v14, %v2724_v17 }
 0x67f   : > { %10400 = vpow2.f32 %v2735_v11  ;;  %v2737_v48 = vmul.f32 1.442695, %v2732_v15 }
 0x680   : > { %v3523_v20 = vpop.trf.xlu1 }
 0x681   : > { %10402 = vpow2.f32 %v2737_v48 }
 0x682   : > { %v3507_v63 = vpop.trf.xlu0 }
 0x689   : > { %v10401_v52 = vpop.eup %10400 }
 0x68a   : > { %v2743_v61 = vsel %vm2718_vm2, %v10401_v52, 0.0 }
 0x68b   : > { %v10403_v4 = vpop.eup %10402  ;;  %2744 = vadd.xlane.f32.xlu0 %v2743_v61 }
 0x68c   : > { %v2746_v22 = vsel %vm2718_vm2, %v10403_v4, 0.0 }
 0x68d   : > { %2747 = vadd.xlane.f32.xlu1 %v2746_v22 }
 0x6b4   : > { %v2727_v21 = vpop.xlane.xlu1 %2726 }
 0x6b5   : > { %v2733_v46 = vsub.f32 %v11639_v27, %v2727_v21 }
 0x6b6   : > { %v2730_v44 = vpop.xlane.xlu0 %2729 }
 0x6b7   : > { %v2739_v53 = vmul.f32 1.442695, %v2733_v46  ;;  %v2734_v14 = vsub.f32 %v11641_v28, %v2730_v44 }
 0x6b9   : > { %10404 = vpow2.f32 %v2739_v53  ;;  %v2741_v7 = vmul.f32 1.442695, %v2734_v14 }
 0x6ba   : > { %v3555_v10 = vpop.trf.xlu1 }
 0x6bb   : > { %10406 = vpow2.f32 %v2741_v7 }
 0x6bc   : > { %v3539_v59 = vpop.trf.xlu0 }
 0x6be   : > { %v3587_v47 = vpop.trf.xlu1 }
 0x6bf   : > { %v3905_v29 = vcombine.low %v3523_v20, %v3587_v47 }
 0x6c0   : > { %v3571_v16 = vpop.trf.xlu0 }
 0x6c1   : > { %v3855_v36 = vcombine.low %v3507_v63, %v3571_v16  ;;  %v3912_v28 = vrot.slane %v3905_v29, %v11304_v2 }
 0x6c2   : > { %v3619_v56 = vpop.trf.xlu1 }
 0x6c3   : > { %v11707_v24 = vpop.eup %10404  ;;  %v3913_v41 = vcombine.low %v3555_v10, %v3619_v56  ;;  %v3862_v40 = vrot.slane %v3855_v36, %v11304_v2 }
 0x6c4   : > { %v3603_v35 = vpop.trf.xlu0  ;;  %v2749_v27 = vsel %vm2718_vm2, %v11707_v24, 0.0 }
 0x6c5   : > { %v11711_v49 = vpop.eup %10406  ;;  %v3920_v32 = vrot.slane %v3913_v41, %v11304_v2  ;;  %v3863_v33 = vcombine.low %v3539_v59, %v3603_v35  ;;  %2750 = vadd.xlane.f32.xlu0 %v2749_v27 }
 0x6c6   : > { %v2752_v37 = vsel %vm2718_vm2, %v11711_v49, 0.0  ;;  %v3651_v1 = vpop.trf.xlu1 }
 0x6c7   : > { %v3937_v51 = vcombine.low %v3912_v28, %v3920_v32  ;;  %v3870_v54 = vrot.slane %v3863_v33, %v11304_v2  ;;  %2753 = vadd.xlane.f32.xlu1 %v2752_v37 }
 0x6c8   : > { %v3635_v60 = vpop.trf.xlu0 }
 0x6c9   : > { %v3887_v58 = vcombine.low %v3862_v40, %v3870_v54  ;;  %v3944_v28 = vrot.slane %v3937_v51, %v11307_v9 }
 0x6ca   : > { %v3683_v0 = vpop.trf.xlu1 }
 0x6cb   : > { %v3894_v56 = vrot.slane %v3887_v58, %v11307_v9 }
 0x6cc   : > { %v3667_v62 = vpop.trf.xlu0 }
 0x6ce   : > { %v3715_v19 = vpop.trf.xlu1 }
 0x6d0   : > { %v3699_v8 = vpop.trf.xlu0 }
 0x6f2   : > { %3723 = vxpose.xlu0.c.b16.start.end [1/1] (short) (narrow) %v3174_v13, 16 }
 0x6f4   : > { %3739 = vxpose.xlu1.c.b16.start.end [1/1] (short) (narrow) %v3242_v30, 16 }
 0x718   : > { %v2745_v18 = vpop.xlane.xlu0 %2744 }
 0x719   : > { %v2755_v23 = vmax.f32 %v2745_v18, 1e-20 }
 0x71a   : > { %v2748_v57 = vpop.xlane.xlu1 %2747 }
 0x71b   : > { %10408 = vrcp.f32 %v2755_v23  ;;  %v2756_v34 = vmax.f32 %v2748_v57, 1e-20 }
 0x71d   : > { %10410 = vrcp.f32 %v2756_v34 }
 0x725   : > { %v10409_v5 = vpop.eup %10408 }
 0x726   : > { %v2763_v17 = vmul.f32 %v10409_v5, %v10401_v52  ;;  %v3871_v52 = vcombine.low %v3635_v60, %v3699_v8 }
 0x727   : > { %v10411_v11 = vpop.eup %10410 }
 0x728   : > { %v2767_v6 = vpack.c.bf16 %v2763_v17, %v2763_v17  ;;  %v2764_v15 = vmul.f32 %v10411_v11, %v10403_v4  ;;  %v3921_v4 = vcombine.low %v3651_v1, %v3715_v19  ;;  %v3878_v14 = vrot.slane %v3871_v52, %v11304_v2  ;;  %v10265_v52 = vld [vmem:[#allocation11 + $0x18] sm:$0xff]  }
 0x72a   : > { %10086 = vmatprep.subr.msk.bf16.mxu0 %vm2718_vm2, %v2767_v6  ;;  %v3986_v38 = vsel %vm2718_vm2, %v2767_v6, 0  ;;  %v2768_v48 = vpack.c.bf16 %v2764_v15, %v2764_v15  ;;  %v3928_v59 = vrot.slane %v3921_v4, %v11304_v2  ;;  %v10267_v4 = vld [vmem:[#allocation11 + $0x28] sm:$0xff]  }
 0x72b   : > { %9927 = vmatpush3.bf16.xpose.msra.mxu0 %v3986_v38 }
 0x72c   : > { %10087 = vmatprep.subr.msk.bf16.mxu1 %vm2718_vm2, %v2768_v48  ;;  %v4044_v61 = vsel %vm2718_vm2, %v2768_v48, 0 }
 0x72d   : > { %9933 = vmatpush3.bf16.xpose.msra.mxu1 %v4044_v61 }
 0x752   : > { %v2751_v22 = vpop.xlane.xlu0 %2750 }
 0x753   : > { %v2757_v20 = vmax.f32 %v2751_v22, 1e-20 }
 0x754   : > { %v2754_v63 = vpop.xlane.xlu1 %2753 }
 0x755   : > { %10412 = vrcp.f32 %v2757_v20  ;;  %v2758_v21 = vmax.f32 %v2754_v63, 1e-20  ;;  %v10262_v20 = vld [vmem:[#allocation11] sm:$0xff]   ;;  %v10263_v63 = vld [vmem:[#allocation11 + $0x8] sm:$0xff]  }
 0x757   : > { %10414 = vrcp.f32 %v2758_v21  ;;  %v10264_v21 = vld [vmem:[#allocation11 + $0x10] sm:$0xff]  }
 0x758   : > { %v3731_v46 = vpop.trf.xlu0 }
 0x759   : > { %v3879_v44 = vcombine.low %v3667_v62, %v3731_v46  ;;  %v10266_v46 = vld [vmem:[#allocation11 + $0x20] sm:$0xff]  }
 0x75a   : > { %v3747_v53 = vpop.trf.xlu1 }
 0x75b   : > { %v3886_v7 = vrot.slane %v3879_v44, %v11304_v2  ;;  %v3929_v10 = vcombine.low %v3683_v0, %v3747_v53 }
 0x75d   : > { %v3895_v47 = vcombine.low %v3878_v14, %v3886_v7  ;;  %v3936_v16 = vrot.slane %v3929_v10, %v11304_v2 }
 0x75f   : > { %v10413_v29 = vpop.eup %10412  ;;  %v3902_v36 = vrot.slane %v3895_v47, %v11307_v9  ;;  %v3945_v41 = vcombine.low %v3928_v59, %v3936_v16 }
 0x760   : > { %v2765_v35 = vmul.f32 %v10413_v29, %v11707_v24 }
 0x761   : > { %v10415_v27 = vpop.eup %10414  ;;  %v3903_v32 = vcombine.low %v3894_v56, %v3902_v36  ;;  %v3904_v33 = vcombine.high %v3894_v56, %v3902_v36  ;;  %v3952_v37 = vrot.slane %v3945_v41, %v11307_v9 }
 0x762   : > { %v2769_v40 = vpack.c.bf16 %v2765_v35, %v2765_v35  ;;  %v2766_v54 = vmul.f32 %v10415_v27, %v11711_v49 }
 0x763   : > { %v3953_v13 = vcombine.low %v3944_v28, %v3952_v37  ;;  %v3954_v30 = vcombine.high %v3944_v28, %v3952_v37  ;;  %v3970_v60 = vshrl.u32 %v3903_v32, 16  ;;  %v3976_v1 = vshrl.u32 %v3904_v33, 16 }
 0x764   : > { %10088 = vmatprep.subr.msk.bf16.mxu0 %vm2718_vm2, %v2769_v40  ;;  %v2770_v58 = vpack.c.bf16 %v2766_v54, %v2766_v54  ;;  %v4102_v51 = vsel %vm2718_vm2, %v2769_v40, 0 }
 0x765   : > { %v3969_v62 = vpack.i.b16 %v3953_v13, %v3903_v32  ;;  %v3971_v0 = vshrl.u32 %v3953_v13, 16  ;;  %v3975_v24 = vpack.i.b16 %v3954_v30, %v3904_v33  ;;  %v3977_v8 = vshrl.u32 %v3954_v30, 16  ;;  %v10268_v33 = vld [vmem:[#allocation11 + $0x30] sm:$0xff]  }
 0x766   : > { %10089 = vmatprep.subr.msk.bf16.mxu1 %vm2718_vm2, %v2770_v58  ;;  %v4160_v49 = vsel %vm2718_vm2, %v2770_v58, 0 }
 0x767   : > { %9929 = vmatmul.mubr.msk.bf16.vlgmr.msra.gmra.mrb[12].mxu0 %vm2718_vm2, %v3969_v62  ;;  %v3972_v19 = vpack.i.b16 %v3971_v0, %v3970_v60  ;;  %v3978_v18 = vpack.i.b16 %v3977_v8, %v3976_v1 }
 0x768   : > { %9939 = vmatpush3.bf16.xpose.msra.mxu0 %v4102_v51  ;;  %9940 = vmatprep.mubr.msk.bf16.mxu0 %vm2718_vm2, %v3963_v50  ;;  %v10269_v51 = vld [vmem:[#allocation11 + $0x38] sm:$0xff]  }
 0x769   : > { %9935 = vmatmul.mubr.msk.bf16.vlgmr.msra.gmra.mrb[12].mxu1 %vm2718_vm2, %v3972_v19  ;;  %9950 = vmatprep.subr.bf16.mxu0 %v10810_v3 }
 0x76a   : > { %9945 = vmatpush3.bf16.xpose.msra.mxu1 %v4160_v49  ;;  %9946 = vmatprep.mubr.msk.bf16.mxu1 %vm2718_vm2, %v11668_v55 }
 0x76f   : > { %9941 = vmatmul.mubr.msk.bf16.vlgmr.msra.gmra.mrb[16].mxu0 %vm2718_vm2, %v3975_v24 }
 0x770   : > { %9966 = vmatprep.mubr.msk.bf16.mxu0 %vm10812_vm0, %v10810_v3  ;;  %9951 = vmatpush3.bf16.msra.mxu0 %v10262_v20  ;;  %v9584_v20 = vld [vmem:[%s12416_s7] ss:$0 sm:$0xff] }
 0x771   : > { %9947 = vmatmul.mubr.msk.bf16.vlgmr.msra.gmra.mrb[16].mxu1 %vm2718_vm2, %v3978_v18  ;;  %9952 = vmatprep.subr.bf16.mxu0 %v10810_v3 }
 0x772   : > { %4773 = vmatprep.mubr.bf16.mxu1 %v10811_v25 }
 0x774   : > { %9953 = vmatpush3.bf16.msra.mxu0 %v10263_v63 }
 0x775   : > { %9954 = vmatprep.subr.bf16.mxu0 %v10810_v3 }
 0x778   : > { %9955 = vmatpush3.bf16.msra.mxu0 %v10264_v21 }
 0x779   : > { %9956 = vmatprep.subr.bf16.mxu0 %v10810_v3 }
 0x77c   : > { %9957 = vmatpush3.bf16.msra.mxu0 %v10265_v52 }
 0x77d   : > { %9958 = vmatprep.subr.bf16.mxu0 %v10810_v3 }
 0x780   : > { %9959 = vmatpush3.bf16.msra.mxu0 %v10266_v46 }
 0x781   : > { %9960 = vmatprep.subr.bf16.mxu0 %v10810_v3 }
 0x784   : > { %9961 = vmatpush3.bf16.msra.mxu0 %v10267_v4 }
 0x785   : > { %9962 = vmatprep.subr.bf16.mxu0 %v10810_v3 }
 0x788   : > { %9963 = vmatpush3.bf16.msra.mxu0 %v10268_v33  ;;  %v10290_v33 = vld [vmem:[#allocation13 + $0x64] ss:$8 sps:$4 sm:$0xff]  }
 0x789   : > { %9964 = vmatprep.subr.bf16.mxu0 %v10810_v3 }
 0x78c   : > { %9965 = vmatpush3.bf16.msra.mxu0 %v10269_v51 }
 0x83a   : > { %v9930_v26 = vpop.f32.mrb[12].mxu0 }
 0x83b   : > { %v4022_v31 = vpop.f32.mrb[13].mxu0 }
 0x83c   : > { %v9936_v50 = vpop.f32.mrb[12].mxu1  ;;  %4211 = vxpose.xlu0.b32.start [1/4] (short) (narrow) %v4022_v31, 8  ;;  %v9931_v23 = vpop.f32.mrb[14].mxu0 }
 0x83d   : > { %v4025_v57 = vpop.f32.mrb[15].mxu0  ;;  %v4080_v34 = vpop.f32.mrb[13].mxu1 }
 0x83e   : > { %4243 = vxpose.xlu1.b32.start [1/4] (short) (narrow) %v4080_v34, 8  ;;  %v9937_v5 = vpop.f32.mrb[14].mxu1 }
 0x83f   : > { %v4083_v17 = vpop.f32.mrb[15].mxu1 }
 0x840   : > { %4212 = vxpose.xlu0.b32.cont [2/4] (short) (narrow) %v4025_v57, 8 }
 0x842   : > { %4244 = vxpose.xlu1.b32.cont [2/4] (short) (narrow) %v4083_v17, 8  ;;  %v9942_v55 = vpop.f32.mrb[16].mxu0 }
 0x843   : > { %v4138_v11 = vpop.f32.mrb[17].mxu0 }
 0x844   : > { %v9948_v6 = vpop.f32.mrb[16].mxu1  ;;  %4213 = vxpose.xlu0.b32.cont [3/4] (short) (narrow) %v9930_v26, 8  ;;  %v9943_v15 = vpop.f32.mrb[18].mxu0 }
 0x845   : > { %v4141_v38 = vpop.f32.mrb[19].mxu0  ;;  %v4196_v48 = vpop.f32.mrb[17].mxu1 }
 0x846   : > { %4245 = vxpose.xlu1.b32.cont [3/4] (short) (narrow) %v9936_v50, 8  ;;  %v9949_v61 = vpop.f32.mrb[18].mxu1 }
 0x847   : > { %v4199_v22 = vpop.f32.mrb[19].mxu1 }
 0x848   : > { %4214 = vxpose.xlu0.b32.end [4/4] (short) (narrow) %v9931_v23, 8 }
 0x84a   : > { %4246 = vxpose.xlu1.b32.end [4/4] (short) (narrow) %v9937_v5, 8 }
 0x84c   : > { %4275 = vxpose.xlu0.b32.start [1/4] (short) (narrow) %v4138_v11, 8 }
 0x84e   : > { %4307 = vxpose.xlu1.b32.start [1/4] (short) (narrow) %v4196_v48, 8 }
 0x850   : > { %4276 = vxpose.xlu0.b32.cont [2/4] (short) (narrow) %v4141_v38, 8 }
 0x852   : > { %4308 = vxpose.xlu1.b32.cont [2/4] (short) (narrow) %v4199_v22, 8 }
 0x854   : > { %4277 = vxpose.xlu0.b32.cont [3/4] (short) (narrow) %v9942_v55, 8 }
 0x856   : > { %4309 = vxpose.xlu1.b32.cont [3/4] (short) (narrow) %v9948_v6, 8 }
 0x858   : > { %4278 = vxpose.xlu0.b32.end [4/4] (short) (narrow) %v9943_v15, 8 }
 0x85a   : > { %4310 = vxpose.xlu1.b32.end [4/4] (short) (narrow) %v9949_v61, 8 }
 0x8bc   : > { %v4227_v44 = vpop.trf.xlu0 }
 0x8be   : > { %v4259_v53 = vpop.trf.xlu1 }
 0x8cc   : > { %v4291_v14 = vpop.trf.xlu0 }
 0x8cd   : > { %v4339_v7 = vcombine.low %v4227_v44, %v4291_v14  ;;  %v4340_v10 = vcombine.high %v4227_v44, %v4291_v14  ;;  %v10272_v14 = vld [vmem:[#allocation13 + $0x4] ss:$8 sps:$4 sm:$0xff]  }
 0x8ce   : > { %v4323_v59 = vpop.trf.xlu1  ;;  %4741 = vmatprep.subr.bf16.mxu1 %v10272_v14 }
 0x8cf   : > { %v4355_v47 = vcombine.low %v4259_v53, %v4323_v59  ;;  %v4356_v16 = vcombine.high %v4259_v53, %v4323_v59  ;;  %v4347_v29 = vrot.slane %v4339_v7, %v11304_v2  ;;  %v4354_v56 = vrot.slane %v4340_v10, %v11304_v2  ;;  %v10270_v53 = vld [vmem:[#allocation13] ss:$8 sps:$4 sm:$0xff]   ;;  %v10275_v7 = vld [vmem:[#allocation13 + $0x14] ss:$8 sps:$4 sm:$0xff]   ;;  %v10273_v10 = vld [vmem:[#allocation13 + $0x10] ss:$8 sps:$4 sm:$0xff]  }
 0x8d0   : > { %4742 = vmatpush1.bf16.msra.mxu1 %v10270_v53  ;;  %v10278_v59 = vld [vmem:[#allocation13 + $0x24] ss:$8 sps:$4 sm:$0xff]  }
 0x8d1   : > { %v4363_v36 = vrot.slane %v4355_v47, %v11304_v2  ;;  %v4370_v41 = vrot.slane %v4356_v16, %v11304_v2  ;;  %4743 = vmatprep.subr.bf16.mxu1 %v10275_v7  ;;  %v10276_v47 = vld [vmem:[#allocation13 + $0x20] ss:$8 sps:$4 sm:$0xff]  }
 0x8d3   : > { %v4371_v35 = vcombine.low %v4347_v29, %v4363_v36  ;;  %v4372_v27 = vcombine.high %v4347_v29, %v4363_v36  ;;  %v4387_v28 = vcombine.low %v4354_v56, %v4370_v41  ;;  %v4388_v32 = vcombine.high %v4354_v56, %v4370_v41  ;;  %v10281_v41 = vld [vmem:[#allocation13 + $0x34] ss:$8 sps:$4 sm:$0xff]  }
 0x8d4   : > { %4744 = vmatpush1.bf16.msra.mxu1 %v10273_v10 }
 0x8d5   : > { %v4379_v37 = vrot.slane %v4371_v35, %v11307_v9  ;;  %v4386_v40 = vrot.slane %v4372_v27, %v11307_v9  ;;  %v4395_v54 = vrot.slane %v4387_v28, %v11307_v9  ;;  %v4402_v13 = vrot.slane %v4388_v32, %v11307_v9  ;;  %4745 = vmatprep.subr.bf16.mxu1 %v10278_v59  ;;  %v10284_v35 = vld [vmem:[#allocation13 + $0x44] ss:$8 sps:$4 sm:$0xff]   ;;  %v10282_v27 = vld [vmem:[#allocation13 + $0x40] ss:$8 sps:$4 sm:$0xff]   ;;  %v10287_v28 = vld [vmem:[#allocation13 + $0x54] ss:$8 sps:$4 sm:$0xff]  }
 0x8d6   : > { %v10285_v32 = vld [vmem:[#allocation13 + $0x50] ss:$8 sps:$4 sm:$0xff]  }
 0x8d7   : > { %v4407_v30 = vcombine.low %v4379_v37, %v4386_v40  ;;  %v9582_v60 = vcombine.high %v4379_v37, %v4386_v40  ;;  %v4423_v1 = vcombine.low %v4395_v54, %v4402_v13  ;;  %v9583_v58 = vcombine.high %v4395_v54, %v4402_v13  ;;  %v10288_v37 = vld [vmem:[#allocation13 + $0x60] ss:$8 sps:$4 sm:$0xff]   ;;  %v10293_v40 = vld [vmem:[#allocation13 + $0x74] ss:$8 sps:$4 sm:$0xff]   ;;  %v10291_v54 = vld [vmem:[#allocation13 + $0x70] ss:$8 sps:$4 sm:$0xff]  }
 0x8d8   : > { %4746 = vmatpush1.bf16.msra.mxu1 %v10276_v47  ;;  %v10294_v13 = vld [vmem:[#allocation14 + $0x40] sm:$0xff]  }
 0x8d9   : > { %v4414_v62 = vrot.slane %v4407_v30, %v11304_v2  ;;  %v4422_v0 = vrot.slane %v9582_v60, %v11304_v2  ;;  %v4430_v24 = vrot.slane %v4423_v1, %v11304_v2  ;;  %v4438_v8 = vrot.slane %v9583_v58, %v11304_v2  ;;  %4747 = vmatprep.subr.bf16.mxu1 %v10281_v41  ;;  %v10295_v30 = vld [vmem:[#allocation14] sm:$0xff]   ;;  %v10296_v60 = vld [vmem:[#allocation14 + $0x48] sm:$0xff]  }
 0x8da   : > { %9779 = vmatprep.subr.bf16.mxu0 %v10294_v13  ;;  %v10297_v1 = vld [vmem:[#allocation14 + $0x8] sm:$0xff]   ;;  %v10312_v13 = vld [vmem:[#allocation10 + $0xc4] ss:$12 sps:$4 sm:$0xff]  }
 0x8db   : > { %v4440_v19 = vcombine.high %v4414_v62, %v4422_v0  ;;  %v4456_v18 = vcombine.high %v4430_v24, %v4438_v8  ;;  %v4439_v49 = vcombine.low %v4414_v62, %v4422_v0  ;;  %v4455_v26 = vcombine.low %v4430_v24, %v4438_v8  ;;  %v9593_v8 = vld [vmem:[%s12487_s15] ss:$0 sm:$0xff] }
 0x8dd   : > { %v4454_v31 = vrot.slane %v4440_v19, %v11307_v9  ;;  %v4470_v50 = vrot.slane %v4456_v18, %v11307_v9  ;;  %v4447_v23 = vrot.slane %v4439_v49, %v11307_v9  ;;  %v4463_v57 = vrot.slane %v4455_v26, %v11307_v9  ;;  %v9594_v19 = vld [vmem:[%s12488_s4] ss:$0 sm:$0xff] }
 0x8df   : > { %v4473_v34 = vcombine.low %v4454_v31, %v4470_v50  ;;  %v4472_v5 = vcombine.high %v4447_v23, %v4463_v57  ;;  %v4471_v17 = vcombine.low %v4447_v23, %v4463_v57  ;;  %v4474_v55 = vcombine.high %v4454_v31, %v4470_v50  ;;  %v10298_v31 = vld [vmem:[#allocation14 + $0x50] sm:$0xff]   ;;  %v10300_v23 = vld [vmem:[#allocation14 + $0x58] sm:$0xff]  }
 0x8e0   : > { %v10299_v50 = vld [vmem:[#allocation14 + $0x10] sm:$0xff]   ;;  %v10301_v57 = vld [vmem:[#allocation14 + $0x18] sm:$0xff]  }
 0x8e1   : > { %4480 = vrot.lane.b32.xlu1 %v4473_v34, %s10815_s2  ;;  %4476 = vrot.lane.b32.xlu0 %v4472_v5, %s10813_s25  ;;  %v10302_v34 = vld [vmem:[#allocation14 + $0x60] sm:$0xff]  }
 0x8e2   : > { %v10303_v5 = vld [vmem:[#allocation14 + $0x20] sm:$0xff]  }
 0x8e5   : > { %4484 = vrot.lane.b32.xlu1 %v4474_v55, %s10814_s3  ;;  %v10305_v55 = vld [vmem:[#allocation14 + $0x28] sm:$0xff]  }
 0x953   : > { %v4481_v11 = vpop.permute.xlu1 %4480  ;;  %v4477_v6 = vpop.permute.xlu0 %4476 }
 0x954   : > { %v4487_v15 = vsel %vm2531_vm1, %v4471_v17, %v4477_v6  ;;  %v10304_v17 = vld [vmem:[#allocation14 + $0x68] sm:$0xff]   ;;  %v10307_v6 = vld [vmem:[#allocation14 + $0x30] sm:$0xff]  }
 0x955   : > { %v4489_v48 = vsel %vm4488_vm3, %v4487_v15, %v4481_v11  ;;  %v10306_v11 = vld [vmem:[#allocation14 + $0x70] sm:$0xff]   ;;  %v10308_v15 = vld [vmem:[#allocation14 + $0x78] sm:$0xff]  }
 0x957   : > { %v4485_v38 = vpop.permute.xlu1 %4484 }
 0x958   : > { %v4491_v61 = vsel %vm4490_vm4, %v4489_v48, %v4485_v38  ;;  %v10309_v38 = vld [vmem:[#allocation14 + $0x38] sm:$0xff]   ;;  %v4649_v48 = vld [vmem:[%s12489_s22] sm:$0x3] }
 0x959   : > { %v4492_v22 = vpack.c.bf16 %v4491_v61, %v4491_v61  ;;  %v4654_v61 = vrot.slane %v4649_v48, %v11284_v45 }
 0x95b   : > { %9967 = vmatmul.mubr.bf16.vlgmr.msra.gmra.mrb[20].mxu0 %v4492_v22  ;;  %v4658_v22 = vrot.slane %v4649_v48, %v11276_v43  ;;  %v10341_v48 = vld [vmem:[#allocation10 + $0x170] ss:$12 sps:$4 sm:$0xff]  }
 0x95c   : > { %9780 = vmatpush3.bf16.msra.mxu0 %v10295_v30  ;;  %v10313_v30 = vld [vmem:[#allocation10 + $0xc8] ss:$12 sps:$4 sm:$0xff]  }
 0x95d   : > { %9781 = vmatprep.subr.bf16.mxu0 %v10296_v60  ;;  %v10316_v60 = vld [vmem:[#allocation10 + $0xdc] ss:$12 sps:$4 sm:$0xff]  }
 0x960   : > { %9782 = vmatpush3.bf16.msra.mxu0 %v10297_v1  ;;  %v10317_v1 = vld [vmem:[#allocation10 + $0xe0] ss:$12 sps:$4 sm:$0xff]  }
 0x961   : > { %9783 = vmatprep.subr.bf16.mxu0 %v10298_v31  ;;  %v10328_v31 = vld [vmem:[#allocation10 + $0x124] ss:$12 sps:$4 sm:$0xff]  }
 0x964   : > { %9784 = vmatpush3.bf16.msra.mxu0 %v10299_v50  ;;  %v10325_v50 = vld [vmem:[#allocation10 + $0x110] ss:$12 sps:$4 sm:$0xff]  }
 0x965   : > { %9785 = vmatprep.subr.bf16.mxu0 %v10300_v23  ;;  %v10326_v23 = vld [vmem:[#allocation10 + $0x120] ss:$12 sps:$4 sm:$0xff]  }
 0x968   : > { %9786 = vmatpush3.bf16.msra.mxu0 %v10301_v57  ;;  %v10332_v57 = vld [vmem:[#allocation10 + $0x13c] ss:$12 sps:$4 sm:$0xff]  }
 0x969   : > { %9787 = vmatprep.subr.bf16.mxu0 %v10302_v34  ;;  %v10329_v34 = vld [vmem:[#allocation10 + $0x128] ss:$12 sps:$4 sm:$0xff]  }
 0x96c   : > { %9788 = vmatpush3.bf16.msra.mxu0 %v10303_v5  ;;  %v10330_v5 = vld [vmem:[#allocation10 + $0x138] ss:$12 sps:$4 sm:$0xff]  }
 0x96d   : > { %9789 = vmatprep.subr.bf16.mxu0 %v10304_v17  ;;  %v10336_v17 = vld [vmem:[#allocation10 + $0x154] ss:$12 sps:$4 sm:$0xff]  }
 0x970   : > { %9790 = vmatpush3.bf16.msra.mxu0 %v10305_v55  ;;  %v10333_v55 = vld [vmem:[#allocation10 + $0x140] ss:$12 sps:$4 sm:$0xff]  }
 0x971   : > { %9791 = vmatprep.subr.bf16.mxu0 %v10306_v11  ;;  %v10334_v11 = vld [vmem:[#allocation10 + $0x150] ss:$12 sps:$4 sm:$0xff]  }
 0x974   : > { %9792 = vmatpush3.bf16.msra.mxu0 %v10307_v6  ;;  %v10340_v6 = vld [vmem:[#allocation10 + $0x16c] ss:$12 sps:$4 sm:$0xff]  }
 0x975   : > { %9793 = vmatprep.subr.bf16.mxu0 %v10308_v15  ;;  %v10337_v15 = vld [vmem:[#allocation10 + $0x158] ss:$12 sps:$4 sm:$0xff]  }
 0x978   : > { %9794 = vmatpush3.bf16.msra.mxu0 %v10309_v38  ;;  %v10338_v38 = vld [vmem:[#allocation10 + $0x168] ss:$12 sps:$4 sm:$0xff]  }
 0x979   : > { %9970 = vmatprep.subr.bf16.mxu0 %v10810_v3 }
 0xa2e   : > { %v4598_v63 = vpop.f32.mrb[20].mxu0 }
 0xa2f   : > { %v4599_v21 = vadd.f32 %v9584_v20, %v4598_v63  ;;  %v9968_v52 = vpop.f32.mrb[21].mxu0 }
 0xa30   : > { %v4601_v46 = vpop.f32.mrb[22].mxu0 }
 0xa31   : > { %v4604_v4 = vadd.f32 %v4599_v21, %v11265_v39  ;;  %v9969_v44 = vpop.f32.mrb[23].mxu0  ;;  %v10279_v39 = vld [vmem:[#allocation13 + $0x30] ss:$8 sps:$4 sm:$0xff]  }
 0xa32   : > { %4748 = vmatpush1.bf16.msra.mxu1 %v10279_v39 }
 0xa33   : > { %4607 = vadd.xlane.f32.xlu0 %v4604_v4  ;;  %4749 = vmatprep.subr.bf16.mxu1 %v10284_v35  ;;  %v9611_v35 = vld [vmem:[%s12490_s24] ss:$0 sm:$0xff] }
 0xa36   : > { %4750 = vmatpush1.bf16.msra.mxu1 %v10282_v27 }
 0xa37   : > { %4751 = vmatprep.subr.bf16.mxu1 %v10287_v28 }
 0xa3a   : > { %4752 = vmatpush1.bf16.msra.mxu1 %v10285_v32 }
 0xa3b   : > { %4753 = vmatprep.subr.bf16.mxu1 %v10290_v33 }
 0xa3e   : > { %4754 = vmatpush1.bf16.msra.mxu1 %v10288_v37 }
 0xa3f   : > { %4755 = vmatprep.subr.bf16.mxu1 %v10293_v40 }
 0xa42   : > { %4756 = vmatpush1.bf16.msra.mxu1 %v10291_v54  ;;  %v10310_v54 = vld [vmem:[#allocation10 + $0xc0] ss:$12 sps:$4 sm:$0xff]  }
 0xa43   : > { %5177 = vmatprep.subr.bf16.mxu1 %v10312_v13 }
 0xac0   : > { %v4608_v16 = vpop.xlane.xlu0 %4607 }
 0xac1   : > { %v4609_v29 = vmul.f32 0.0078125, %v4608_v16 }
 0xac3   : > { %v4610_v56 = vsub.f32 %v4604_v4, %v4609_v29 }
 0xac5   : > { %v4611_v36 = vmul.f32 %v4610_v56, %v4610_v56 }
 0xac7   : > { %4612 = vadd.xlane.f32.xlu1 %v4611_v36 }
 0xb54   : > { %v4613_v58 = vpop.xlane.xlu1 %4612 }
 0xb55   : > { %v4614_v62 = vmul.f32 0.0078125, %v4613_v58  ;;  %v10314_v58 = vld [vmem:[#allocation10 + $0xd8] ss:$12 sps:$4 sm:$0xff]  }
 0xb57   : > { %v4615_v0 = vadd.f32 1e-12, %v4614_v62  ;;  %v10320_v62 = vld [vmem:[#allocation10 + $0xf4] ss:$12 sps:$4 sm:$0xff]  }
 0xb59   : > { %10416 = vrsqrt.f32 %v4615_v0  ;;  %v10318_v0 = vld [vmem:[#allocation10 + $0xf0] ss:$12 sps:$4 sm:$0xff]  }
 0xb63   : > { %v10417_v24 = vpop.eup %10416 }
 0xb64   : > { %v4617_v51 = vmul.f32 %v10417_v24, %v4610_v56 }
 0xb66   : > { %v4624_v18 = vmul.f32 %v9593_v8, %v4617_v51 }
 0xb68   : > { %v4631_v49 = vadd.f32 %v9594_v19, %v4624_v18  ;;  %v10321_v18 = vld [vmem:[#allocation10 + $0xf8] ss:$12 sps:$4 sm:$0xff]  }
 0xb6a   : > { %v4632_v26 = vpack.c.bf16 %v4631_v49, %v4631_v49 }
 0xb6c   : > { %4774 = vmatmul.mubr.bf16.vlgmr.msra.gmra.mrb[20].mxu1 %v4632_v26  ;;  %v10324_v26 = vld [vmem:[#allocation10 + $0x10c] ss:$12 sps:$4 sm:$0xff]  }
 0xb6d   : > { %5209 = vmatprep.mubr.bf16.mxu1 %v10811_v25  ;;  %5178 = vmatpush1.bf16.msra.mxu1 %v10310_v54 }
 0xb6e   : > { %5179 = vmatprep.subr.bf16.mxu1 %v10316_v60 }
 0xb71   : > { %5180 = vmatpush1.bf16.msra.mxu1 %v10314_v58 }
 0xb72   : > { %5181 = vmatprep.subr.bf16.mxu1 %v10320_v62 }
 0xb75   : > { %5182 = vmatpush1.bf16.msra.mxu1 %v10318_v0 }
 0xb76   : > { %5183 = vmatprep.subr.bf16.mxu1 %v10324_v26 }
 0xc3f   : > { %v4775_v20 = vpop.f32.mrb[20].mxu1 }
 0xc40   : > { %v4776_v63 = vadd.f32 %v4775_v20, %v4654_v61  ;;  %v4777_v21 = vpop.f32.mrb[21].mxu1 }
 0xc41   : > { %v4778_v52 = vadd.f32 %v4777_v21, %v4658_v22  ;;  %v4779_v46 = vpop.f32.mrb[22].mxu1  ;;  %v9628_v21 = vld [vmem:[%s12491_s23] ss:$0 sm:$0xff] }
 0xc42   : > { %v4784_v4 = vmul.f32 0.70710677, %v4776_v63  ;;  %v4780_v44 = vpop.f32.mrb[23].mxu1  ;;  %v4782_v10 = vmul.f32 0.5, %v4776_v63  ;;  %v9629_v46 = vld [vmem:[%s12492_s0] ss:$0 sm:$0xff] }
 0xc43   : > { %v4785_v53 = vmul.f32 0.70710677, %v4778_v52  ;;  %v4783_v47 = vmul.f32 0.5, %v4778_v52 }
 0xc44   : > { %10418 = verf.f32 %v4784_v4 }
 0xc45   : > { %10420 = verf.f32 %v4785_v53 }
 0xc4e   : > { %v10419_v14 = vpop.eup %10418 }
 0xc4f   : > { %v10421_v7 = vpop.eup %10420  ;;  %v4788_v59 = vadd.f32 1.0, %v10419_v14  ;;  %v11827_v14 = vld [vmem:[%s12414_s5 + $0x3] sm:$0x7] }
 0xc50   : > { %v4789_v16 = vadd.f32 1.0, %v10421_v7  ;;  %v5041_v7 = vrot.slane %v11827_v14, %v11276_v43 }
 0xc51   : > { %v4790_v29 = vmul.f32 %v4788_v59, %v4782_v10 }
 0xc52   : > { %v4791_v56 = vmul.f32 %v4789_v16, %v4783_v47 }
 0xc53   : > { %v4792_v39 = vpack.c.bf16 %v4790_v29, %v4790_v29  ;;  %v5037_v29 = vrot.slane %v11827_v14, %v11284_v45 }
 0xc54   : > { %v4793_v36 = vpack.c.bf16 %v4791_v56, %v4791_v56 }
 0xc56   : > { %4961 = vmatprep.mubr.bf16.mxu0 %v4793_v36 }
 0xc57   : > { %4962 = vmatmul.mubr.bf16.vlgmr.msra.gmra.mrb[24].mxu0 %v4792_v39 }
 0xc58   : > { %9986 = vmatprep.mubr.msk.bf16.mxu0 %vm10812_vm0, %v10810_v3  ;;  %9971 = vmatpush3.bf16.msra.mxu0 %v10313_v30 }
 0xc59   : > { %9972 = vmatprep.subr.bf16.mxu0 %v10810_v3 }
 0xc5c   : > { %9973 = vmatpush3.bf16.msra.mxu0 %v10317_v1 }
 0xc5d   : > { %9974 = vmatprep.subr.bf16.mxu0 %v10810_v3 }
 0xc60   : > { %9975 = vmatpush3.bf16.msra.mxu0 %v10321_v18 }
 0xc61   : > { %9976 = vmatprep.subr.bf16.mxu0 %v10810_v3 }
 0xc64   : > { %9977 = vmatpush3.bf16.msra.mxu0 %v10325_v50 }
 0xc65   : > { %9978 = vmatprep.subr.bf16.mxu0 %v10810_v3 }
 0xc68   : > { %9979 = vmatpush3.bf16.msra.mxu0 %v10329_v34 }
 0xc69   : > { %9980 = vmatprep.subr.bf16.mxu0 %v10810_v3 }
 0xc6c   : > { %9981 = vmatpush3.bf16.msra.mxu0 %v10333_v55 }
 0xc6d   : > { %9982 = vmatprep.subr.bf16.mxu0 %v10810_v3 }
 0xc70   : > { %9983 = vmatpush3.bf16.msra.mxu0 %v10337_v15 }
 0xc71   : > { %9984 = vmatprep.subr.bf16.mxu0 %v10810_v3 }
 0xc74   : > { %9985 = vmatpush3.bf16.msra.mxu0 %v10341_v48 }
 0xd2a   : > { %v9795_v41 = vpop.f32.mrb[24].mxu0 }
 0xd2b   : > { %v9796_v27 = vpop.f32.mrb[25].mxu0 }
 0xd2c   : > { %v9797_v28 = vadd.f32 %v9796_v27, %v9795_v41  ;;  %v9798_v32 = vpop.f32.mrb[26].mxu0 }
 0xd2d   : > { %v9799_v33 = vpop.f32.mrb[27].mxu0 }
 0xd2e   : > { %v4964_v37 = vadd.f32 %v9797_v28, %v9611_v35 }
 0xd30   : > { %v4969_v40 = vadd.f32 %v4964_v37, %v4631_v49  ;;  %v10322_v49 = vld [vmem:[#allocation10 + $0x108] ss:$12 sps:$4 sm:$0xff]  }
 0xd31   : > { %5184 = vmatpush1.bf16.msra.mxu1 %v10322_v49 }
 0xd32   : > { %4972 = vadd.xlane.f32.xlu0 %v4969_v40  ;;  %5185 = vmatprep.subr.bf16.mxu1 %v10328_v31 }
 0xd35   : > { %5186 = vmatpush1.bf16.msra.mxu1 %v10326_v23 }
 0xd36   : > { %5187 = vmatprep.subr.bf16.mxu1 %v10332_v57 }
 0xd39   : > { %5188 = vmatpush1.bf16.msra.mxu1 %v10330_v5 }
 0xd3a   : > { %5189 = vmatprep.subr.bf16.mxu1 %v10336_v17 }
 0xd3d   : > { %5190 = vmatpush1.bf16.msra.mxu1 %v10334_v11 }
 0xd3e   : > { %5191 = vmatprep.subr.bf16.mxu1 %v10340_v6 }
 0xd41   : > { %5192 = vmatpush1.bf16.msra.mxu1 %v10338_v38 }
 0xd42   : > { %9990 = vmatprep.subr.bf16.mxu1 %v10810_v3 }
 0xdbf   : > { %v4973_v24 = vpop.xlane.xlu0 %4972 }
 0xdc0   : > { %v4974_v8 = vmul.f32 0.0078125, %v4973_v24 }
 0xdc2   : > { %v4975_v51 = vsub.f32 %v4969_v40, %v4974_v8 }
 0xdc4   : > { %v4976_v19 = vmul.f32 %v4975_v51, %v4975_v51 }
 0xdc6   : > { %4977 = vadd.xlane.f32.xlu0 %v4976_v19 }
 0xe53   : > { %v4978_v61 = vpop.xlane.xlu0 %4977 }
 0xe54   : > { %v4979_v22 = vmul.f32 0.0078125, %v4978_v61 }
 0xe56   : > { %v4980_v20 = vadd.f32 1e-12, %v4979_v22 }
 0xe58   : > { %10422 = vrsqrt.f32 %v4980_v20 }
 0xe62   : > { %v10423_v63 = vpop.eup %10422 }
 0xe63   : > { %v4982_v52 = vmul.f32 %v10423_v63, %v4975_v51 }
 0xe65   : > { %v4989_v4 = vmul.f32 %v9628_v21, %v4982_v52 }
 0xe67   : > { %v11818_v44 = vadd.f32 %v9629_v46, %v4989_v4 }
 0xe69   : > { %v4997_v53 = vpack.c.bf16 %v11818_v44, %v11818_v44 }
 0xe6b   : > { %5210 = vmatmul.mubr.bf16.vlgmr.msra.gmra.mrb[24].mxu1 %v4997_v53  ;;  %9987 = vmatmul.mubr.bf16.vlgmr.msra.gmra.mrb[28].mxu0 %v4997_v53 }
 0xe6c   : > { %9994 = vmatprep.mubr.msk.bf16.mxu1 %vm10812_vm0, %v10810_v3 }
 0xf3e   : > { %v5211_v10 = vpop.f32.mrb[24].mxu1  ;;  %v11831_v59 = vpop.f32.mrb[28].mxu0 }
 0xf3f   : > { %v5213_v47 = vpop.f32.mrb[25].mxu1  ;;  %v9988_v16 = vpop.f32.mrb[29].mxu0  ;;  %v11837_v27 = vadd.f32 %v5211_v10, %v5037_v29 }
 0xf40   : > { %v5214_v56 = vadd.f32 %v5213_v47, %v5041_v7  ;;  %v5215_v36 = vpop.f32.mrb[26].mxu1  ;;  %v5255_v39 = vpop.f32.mrb[30].mxu0 }
 0xf41   : > { %v5216_v41 = vpop.f32.mrb[27].mxu1  ;;  %v9989_v35 = vpop.f32.mrb[31].mxu0 }
 0xf42   : > { %5340 = vrot.lane.b32.xlu0 %v5214_v56, %s10815_s2  ;;  %5337 = vrot.lane.b32.xlu1 %v5214_v56, %s10814_s3 }
 0xf46   : > { %5343 = vrot.lane.b32.xlu1 %v5214_v56, %s10813_s25  ;;  %5259 = vrot.lane.b32.xlu0 %v11837_v27, %s10814_s3 }
 0xf4a   : > { %5262 = vrot.lane.b32.xlu1 %v11837_v27, %s10815_s2 }
 0xf4e   : > { %5265 = vrot.lane.b32.xlu1 %v11837_v27, %s10813_s25 }
 0xfb4   : > { %v5341_v28 = vpop.permute.xlu0 %5340  ;;  %v5338_v32 = vpop.permute.xlu1 %5337 }
 0xfb5   : > { %v5346_v33 = vcombine.low %v5214_v56, %v5341_v28  ;;  %v5347_v37 = vcombine.high %v5214_v56, %v5341_v28 }
 0xfb7   : > { %v5354_v30 = vrot.slane %v5346_v33, %v11304_v2  ;;  %v5361_v58 = vrot.slane %v5347_v37, %v11304_v2 }
 0xfb8   : > { %v5344_v40 = vpop.permute.xlu1 %5343  ;;  %v11860_v48 = vpop.permute.xlu0 %5259 }
 0xfb9   : > { %v5362_v54 = vcombine.low %v5338_v32, %v5344_v40  ;;  %v5363_v13 = vcombine.high %v5338_v32, %v5344_v40 }
 0xfbb   : > { %v5370_v60 = vrot.slane %v5362_v54, %v11304_v2  ;;  %v5377_v1 = vrot.slane %v5363_v13, %v11304_v2 }
 0xfbc   : > { %v11858_v38 = vpop.permute.xlu1 %5262 }
 0xfbd   : > { %v5378_v62 = vcombine.low %v5354_v30, %v5370_v60  ;;  %v5379_v0 = vcombine.high %v5354_v30, %v5370_v60  ;;  %v5394_v24 = vcombine.low %v5361_v58, %v5377_v1  ;;  %v5395_v31 = vcombine.high %v5361_v58, %v5377_v1 }
 0xfbf   : > { %v5386_v8 = vrot.slane %v5378_v62, %v11307_v9  ;;  %v5393_v51 = vrot.slane %v5379_v0, %v11307_v9  ;;  %v5402_v26 = vrot.slane %v5394_v24, %v11307_v9  ;;  %v5409_v34 = vrot.slane %v5395_v31, %v11307_v9 }
 0xfc0   : > { %v11862_v61 = vpop.permute.xlu1 %5265 }
 0xfc1   : > { %v5500_v19 = vpack.c.bf16 %v5386_v8, %v5386_v8  ;;  %v5502_v18 = vpack.c.bf16 %v5393_v51, %v5393_v51  ;;  %v5411_v49 = vcombine.high %v5393_v51, %v10810_v3  ;;  %v5504_v23 = vpack.c.bf16 %v5402_v26, %v5402_v26 }
 0xfc2   : > { %v5412_v57 = vcombine.high %v5402_v26, %v10810_v3  ;;  %v5506_v17 = vpack.c.bf16 %v5409_v34, %v5409_v34  ;;  %v5413_v55 = vcombine.high %v5409_v34, %v10810_v3  ;;  %v5410_v11 = vcombine.high %v5386_v8, %v10810_v3 }
 0xfc3   : > { %5570 = vxpose.xlu1.c.b16.start.end [1/1] (short) (narrow) %v5500_v19, 32  ;;  %5602 = vxpose.xlu0.c.b16.start.end [1/1] (short) (narrow) %v5502_v18, 32  ;;  %v5503_v50 = vpack.c.bf16 %v5411_v49, %v5411_v49 }
 0xfc4   : > { %v5505_v5 = vpack.c.bf16 %v5412_v57, %v5412_v57  ;;  %v5507_v6 = vpack.c.bf16 %v5413_v55, %v5413_v55  ;;  %v5501_v15 = vpack.c.bf16 %v5410_v11, %v5410_v11 }
 0xfc8   : > { %5618 = vxpose.xlu1.c.b16.start.end [1/1] (short) (narrow) %v5503_v50, 32  ;;  %5634 = vxpose.xlu0.c.b16.start.end [1/1] (short) (narrow) %v5504_v23, 32 }
 0xfcd   : > { %5650 = vxpose.xlu1.c.b16.start.end [1/1] (short) (narrow) %v5505_v5, 32  ;;  %5666 = vxpose.xlu0.c.b16.start.end [1/1] (short) (narrow) %v5506_v17, 32 }
 0xfd2   : > { %5682 = vxpose.xlu1.c.b16.start.end [1/1] (short) (narrow) %v5507_v6, 32  ;;  %5586 = vxpose.xlu0.c.b16.start.end [1/1] (short) (narrow) %v5501_v15, 32 }
0x1029   : > { %v5578_v22 = vpop.trf.xlu1  ;;  %v5610_v20 = vpop.trf.xlu0 }
0x102a   : > { %v5702_v33 = vshrl.u32 %v5578_v22, 16  ;;  %v5710_v58 = vshrl.u32 %v5610_v20, 16 }
0x102d   : > { %v11864_v63 = vpop.trf.xlu1  ;;  %v11866_v21 = vpop.trf.xlu0 }
0x1031   : > { %v5626_v52 = vpop.trf.xlu1  ;;  %v5642_v46 = vpop.trf.xlu0 }
0x1032   : > { %v5708_v36 = vpack.i.b16 %v5626_v52, %v5610_v20  ;;  %v5711_v13 = vshrl.u32 %v5626_v52, 16  ;;  %v5718_v62 = vshrl.u32 %v5642_v46, 16 }
0x1034   : > { %v5712_v26 = vpack.i.b16 %v5711_v13, %v5710_v58 }
0x1035   : > { %v11868_v4 = vpop.trf.xlu1  ;;  %v11870_v53 = vpop.trf.xlu0 }
0x1039   : > { %v5658_v7 = vpop.trf.xlu1  ;;  %v5674_v10 = vpop.trf.xlu0 }
0x103a   : > { %v5716_v28 = vpack.i.b16 %v5658_v7, %v5642_v46  ;;  %v5719_v37 = vshrl.u32 %v5658_v7, 16  ;;  %v5726_v30 = vshrl.u32 %v5674_v10, 16 }
0x103c   : > { %v5720_v49 = vpack.i.b16 %v5719_v37, %v5718_v62 }
0x103d   : > { %v11872_v47 = vpop.trf.xlu1  ;;  %v11874_v16 = vpop.trf.xlu0 }
0x103e   : > { %v5748_v13 = vpack.i.b16 %v11872_v47, %v11870_v53 }
0x1041   : > { %v5690_v29 = vpop.trf.xlu1  ;;  %v5594_v56 = vpop.trf.xlu0 }
0x1042   : > { %v5724_v39 = vpack.i.b16 %v5690_v29, %v5674_v10  ;;  %v5700_v41 = vpack.i.b16 %v5594_v56, %v5578_v22  ;;  %v5703_v35 = vshrl.u32 %v5594_v56, 16  ;;  %v5727_v32 = vshrl.u32 %v5690_v29, 16 }
0x1044   : > { %v5778_v40 = vcombine.low %v5708_v36, %v5724_v39  ;;  %v5779_v54 = vcombine.high %v5708_v36, %v5724_v39  ;;  %v5762_v60 = vcombine.low %v5700_v41, %v5716_v28  ;;  %v5763_v1 = vcombine.high %v5700_v41, %v5716_v28 }
0x1045   : > { %v5704_v24 = vpack.i.b16 %v5703_v35, %v5702_v33  ;;  %v5728_v8 = vpack.i.b16 %v5727_v32, %v5726_v30  ;;  %v5691_v36 = vpop.trf.xlu1  ;;  %v5595_v39 = vpop.trf.xlu0 }
0x1046   : > { %v5786_v0 = vrot.slane %v5778_v40, %v11304_v2  ;;  %v5793_v51 = vrot.slane %v5779_v54, %v11304_v2  ;;  %v5770_v19 = vrot.slane %v5762_v60, %v11304_v2  ;;  %v5777_v18 = vrot.slane %v5763_v1, %v11304_v2 }
0x1047   : > { %v5830_v23 = vcombine.low %v5704_v24, %v5720_v49  ;;  %v5846_v57 = vcombine.low %v5712_v26, %v5728_v8  ;;  %v5847_v55 = vcombine.high %v5712_v26, %v5728_v8  ;;  %v5831_v11 = vcombine.high %v5704_v24, %v5720_v49 }
0x1048   : > { %v5795_v31 = vcombine.high %v5770_v19, %v5786_v0  ;;  %v5794_v50 = vcombine.low %v5770_v19, %v5786_v0  ;;  %v5810_v17 = vcombine.low %v5777_v18, %v5793_v51  ;;  %v5811_v22 = vcombine.high %v5777_v18, %v5793_v51 }
0x1049   : > { %v5838_v6 = vrot.slane %v5830_v23, %v11304_v2  ;;  %v5854_v20 = vrot.slane %v5846_v57, %v11304_v2  ;;  %v5845_v46 = vrot.slane %v5831_v11, %v11304_v2  ;;  %v5861_v7 = vrot.slane %v5847_v55, %v11304_v2 }
0x104a   : > { %v5809_v34 = vrot.slane %v5795_v31, %v11307_v9  ;;  %v5802_v5 = vrot.slane %v5794_v50, %v11307_v9  ;;  %v5818_v15 = vrot.slane %v5810_v17, %v11307_v9  ;;  %v5825_v29 = vrot.slane %v5811_v22, %v11307_v9 }
0x104b   : > { %v5863_v10 = vcombine.high %v5838_v6, %v5854_v20  ;;  %v5862_v56 = vcombine.low %v5838_v6, %v5854_v20  ;;  %v5878_v35 = vcombine.low %v5845_v46, %v5861_v7  ;;  %v5756_v28 = vpack.i.b16 %v5691_v36, %v11874_v16 }
0x104c   : > { %6098 = vxpose.xlu1.c.b16.start.end [1/1] (short) (narrow) %v5809_v34, 16  ;;  %6034 = vxpose.xlu0.c.b16.start.end [1/1] (short) (narrow) %v5802_v5, 16  ;;  %v5826_v52 = vcombine.high %v5802_v5, %v10811_v25  ;;  %v5732_v32 = vpack.i.b16 %v5595_v39, %v11864_v63  ;;  %v5879_v40 = vcombine.high %v5845_v46, %v5861_v7  ;;  %v5759_v58 = vshrl.u32 %v5691_v36, 16 }
0x104d   : > { %v5877_v41 = vrot.slane %v5863_v10, %v11307_v9  ;;  %v5870_v33 = vrot.slane %v5862_v56, %v11307_v9  ;;  %v5886_v37 = vrot.slane %v5878_v35, %v11307_v9  ;;  %v5740_v54 = vpack.i.b16 %v11868_v4, %v11866_v21 }
0x104e   : > { %v5898_v60 = vcombine.low %v5732_v32, %v5748_v13  ;;  %v5827_v1 = vcombine.high %v5809_v34, %v10811_v25  ;;  %v5735_v62 = vshrl.u32 %v5595_v39, 16  ;;  %v5893_v0 = vrot.slane %v5879_v40, %v11307_v9 }
0x104f   : > { %v5914_v30 = vcombine.low %v5740_v54, %v5756_v28  ;;  %v5734_v24 = vshrl.u32 %v11864_v63, 16  ;;  %v5743_v8 = vshrl.u32 %v11868_v4, 16  ;;  %v5751_v51 = vshrl.u32 %v11872_v47, 16 }
0x1050   : > { %6162 = vxpose.xlu1.c.b16.start.end [1/1] (short) (narrow) %v5818_v15, 16  ;;  %6066 = vxpose.xlu0.c.b16.start.end [1/1] (short) (narrow) %v5826_v52, 16  ;;  %v5758_v19 = vshrl.u32 %v11874_v16, 16  ;;  %v5742_v18 = vshrl.u32 %v11866_v21, 16  ;;  %v5906_v26 = vrot.slane %v5898_v60, %v11304_v2  ;;  %v5828_v31 = vcombine.high %v5818_v15, %v10811_v25 }
0x1051   : > { %v5922_v49 = vrot.slane %v5914_v30, %v11304_v2  ;;  %v5750_v50 = vshrl.u32 %v11870_v53, 16  ;;  %v5736_v57 = vpack.i.b16 %v5735_v62, %v5734_v24  ;;  %v5894_v63 = vcombine.high %v5870_v33, %v10811_v25 }
0x1052   : > { %v5760_v23 = vpack.i.b16 %v5759_v58, %v5758_v19  ;;  %v5744_v4 = vpack.i.b16 %v5743_v8, %v5742_v18  ;;  %v5915_v16 = vcombine.high %v5740_v54, %v5756_v28  ;;  %v5899_v34 = vcombine.high %v5732_v32, %v5748_v13 }
0x1053   : > { %v5752_v47 = vpack.i.b16 %v5751_v51, %v5750_v50  ;;  %v5829_v21 = vcombine.high %v5825_v29, %v10811_v25  ;;  %v5930_v5 = vcombine.low %v5906_v26, %v5922_v49  ;;  %v5895_v11 = vcombine.high %v5877_v41, %v10811_v25 }
0x1054   : > { %6226 = vxpose.xlu1.c.b16.start.end [1/1] (short) (narrow) %v5825_v29, 16  ;;  %6114 = vxpose.xlu0.c.b16.start.end [1/1] (short) (narrow) %v5877_v41, 16  ;;  %v5982_v17 = vcombine.low %v5744_v4, %v5760_v23  ;;  %v5929_v53 = vrot.slane %v5915_v16, %v11304_v2  ;;  %v5913_v6 = vrot.slane %v5899_v34, %v11304_v2 }
0x1055   : > { %v5966_v55 = vcombine.low %v5736_v57, %v5752_v47  ;;  %v5938_v15 = vrot.slane %v5930_v5, %v11307_v9  ;;  %v5931_v22 = vcombine.high %v5906_v26, %v5922_v49  ;;  %v5896_v20 = vcombine.high %v5886_v37, %v10811_v25 }
0x1056   : > { %v5990_v46 = vrot.slane %v5982_v17, %v11304_v2  ;;  %v5946_v10 = vcombine.low %v5913_v6, %v5929_v53  ;;  %v5983_v29 = vcombine.high %v5744_v4, %v5760_v23  ;;  %v5967_v56 = vcombine.high %v5736_v57, %v5752_v47 }
0x1057   : > { %v5974_v52 = vrot.slane %v5966_v55, %v11304_v2  ;;  %v5945_v7 = vrot.slane %v5931_v22, %v11307_v9  ;;  %v5897_v36 = vcombine.high %v5893_v0, %v10811_v25  ;;  %v5947_v35 = vcombine.high %v5913_v6, %v5929_v53 }
0x1058   : > { %6050 = vxpose.xlu1.c.b16.start.end [1/1] (short) (narrow) %v5870_v33, 16  ;;  %6178 = vxpose.xlu0.c.b16.start.end [1/1] (short) (narrow) %v5886_v37, 16  ;;  %v5954_v41 = vrot.slane %v5946_v10, %v11307_v9  ;;  %v5981_v33 = vrot.slane %v5967_v56, %v11304_v2  ;;  %v5997_v37 = vrot.slane %v5983_v29, %v11304_v2 }
0x1059   : > { %v5998_v39 = vcombine.low %v5974_v52, %v5990_v46  ;;  %v5999_v32 = vcombine.high %v5974_v52, %v5990_v46  ;;  %v5961_v40 = vrot.slane %v5947_v35, %v11307_v9  ;;  %v5962_v30 = vcombine.high %v5938_v15, %v10811_v25 }
0x105a   : > { %v6014_v13 = vcombine.low %v5981_v33, %v5997_v37  ;;  %v5963_v58 = vcombine.high %v5945_v7, %v10811_v25  ;;  %v5045_v8 = vrot.slane %v11827_v14, %v797_v12 }
0x105b   : > { %v6006_v28 = vrot.slane %v5998_v39, %v11307_v9  ;;  %v6013_v54 = vrot.slane %v5999_v32, %v11307_v9  ;;  %v5965_v51 = vcombine.high %v5961_v40, %v10811_v25 }
0x105c   : > { %6130 = vxpose.xlu1.c.b16.start.end [1/1] (short) (narrow) %v5827_v1, 16  ;;  %6242 = vxpose.xlu0.c.b16.start.end [1/1] (short) (narrow) %v5893_v0, 16  ;;  %v6022_v60 = vrot.slane %v6014_v13, %v11307_v9  ;;  %v6015_v1 = vcombine.high %v5981_v33, %v5997_v37  ;;  %v5964_v0 = vcombine.high %v5954_v41, %v10811_v25 }
0x105d   : > { %v6030_v24 = vcombine.high %v6006_v28, %v10811_v25  ;;  %v6031_v19 = vcombine.high %v6013_v54, %v10811_v25  ;;  %v11938_v18 = vadd.f32 %v11831_v59, %v5045_v8 }
0x105e   : > { %v6029_v62 = vrot.slane %v6015_v1, %v11307_v9  ;;  %v6032_v49 = vcombine.high %v6022_v60, %v10811_v25 }
0x1060   : > { %6194 = vxpose.xlu1.c.b16.start.end [1/1] (short) (narrow) %v5828_v31, 16  ;;  %6082 = vxpose.xlu0.c.b16.start.end [1/1] (short) (narrow) %v5894_v63, 16  ;;  %v6033_v26 = vcombine.high %v6029_v62, %v10811_v25 }
0x1064   : > { %6258 = vxpose.xlu1.c.b16.start.end [1/1] (short) (narrow) %v5829_v21, 16  ;;  %6146 = vxpose.xlu0.c.b16.start.end [1/1] (short) (narrow) %v5895_v11, 16 }
0x1068   : > { %6290 = vxpose.xlu1.c.b16.start.end [1/1] (short) (narrow) %v5938_v15, 16  ;;  %6210 = vxpose.xlu0.c.b16.start.end [1/1] (short) (narrow) %v5896_v20, 16 }
0x106c   : > { %6354 = vxpose.xlu1.c.b16.start.end [1/1] (short) (narrow) %v5945_v7, 16  ;;  %6274 = vxpose.xlu0.c.b16.start.end [1/1] (short) (narrow) %v5897_v36, 16 }
0x1070   : > { %6418 = vxpose.xlu1.c.b16.start.end [1/1] (short) (narrow) %v5954_v41, 16  ;;  %6306 = vxpose.xlu0.c.b16.start.end [1/1] (short) (narrow) %v6006_v28, 16 }
0x1074   : > { %6482 = vxpose.xlu1.c.b16.start.end [1/1] (short) (narrow) %v5961_v40, 16  ;;  %6370 = vxpose.xlu0.c.b16.start.end [1/1] (short) (narrow) %v6013_v54, 16 }
0x1078   : > { %6322 = vxpose.xlu1.c.b16.start.end [1/1] (short) (narrow) %v5962_v30, 16  ;;  %6434 = vxpose.xlu0.c.b16.start.end [1/1] (short) (narrow) %v6022_v60, 16 }
0x107c   : > { %6386 = vxpose.xlu1.c.b16.start.end [1/1] (short) (narrow) %v5963_v58, 16  ;;  %6498 = vxpose.xlu0.c.b16.start.end [1/1] (short) (narrow) %v6029_v62, 16 }
0x1080   : > { %6450 = vxpose.xlu1.c.b16.start.end [1/1] (short) (narrow) %v5964_v0, 16  ;;  %6338 = vxpose.xlu0.c.b16.start.end [1/1] (short) (narrow) %v6030_v24, 16 }
0x1084   : > { %6514 = vxpose.xlu1.c.b16.start.end [1/1] (short) (narrow) %v5965_v51, 16  ;;  %6402 = vxpose.xlu0.c.b16.start.end [1/1] (short) (narrow) %v6031_v19, 16  ;;  %v5284_v51 = vcombine.low %v11860_v48, %v11862_v61  ;;  %v5285_v19 = vcombine.high %v11860_v48, %v11862_v61 }
0x1088   : > { %5415 = vrot.lane.b32.xlu1 %v11938_v18, %s10814_s3  ;;  %6466 = vxpose.xlu0.c.b16.start.end [1/1] (short) (narrow) %v6032_v49, 16 }
0x108c   : > { %5421 = vrot.lane.b32.xlu1 %v11938_v18, %s10813_s25  ;;  %6530 = vxpose.xlu0.c.b16.start.end [1/1] (short) (narrow) %v6033_v26, 16 }
0x1095   : > { %5418 = vrot.lane.b32.xlu0 %v11938_v18, %s10815_s2 }
0x10b2   : > { %v6106_v42 = vpop.trf.xlu1  ;;  %v6042_v12 = vpop.trf.xlu0 }
0x10b3   : > { %v6546_v15 = vcombine.low %v6042_v12, %v6106_v42  ;;  %v5268_v42 = vcombine.low %v11837_v27, %v11858_v38  ;;  %v5269_v12 = vcombine.high %v11837_v27, %v11858_v38 }
0x10b5   : > { %v6553_v36 = vrot.slane %v6546_v15, %v11304_v2  ;;  %v5276_v48 = vrot.slane %v5268_v42, %v11304_v2  ;;  %v5283_v61 = vrot.slane %v5269_v12, %v11304_v2 }
0x10b6   : > { %v6170_v14 = vpop.trf.xlu1  ;;  %v6074_v59 = vpop.trf.xlu0 }
0x10ba   : > { %v6234_v31 = vpop.trf.xlu1  ;;  %v6122_v50 = vpop.trf.xlu0 }
0x10bb   : > { %v6562_v17 = vcombine.low %v6170_v14, %v6234_v31  ;;  %v5299_v31 = vrot.slane %v5285_v19, %v11304_v2 }
0x10bd   : > { %v6569_v52 = vrot.slane %v6562_v17, %v11304_v2 }
0x10be   : > { %v6058_v23 = vpop.trf.xlu1  ;;  %v6186_v57 = vpop.trf.xlu0 }
0x10bf   : > { %v6596_v22 = vcombine.low %v6058_v23, %v6122_v50 }
0x10c1   : > { %v6603_v39 = vrot.slane %v6596_v22, %v11304_v2 }
0x10c2   : > { %v6138_v63 = vpop.trf.xlu1  ;;  %v6250_v4 = vpop.trf.xlu0 }
0x10c3   : > { %v6554_v55 = vcombine.low %v6074_v59, %v6138_v63  ;;  %v6612_v7 = vcombine.low %v6186_v57, %v6250_v4  ;;  %v5292_v59 = vrot.slane %v5284_v51, %v11304_v2  ;;  %v5316_v4 = vcombine.low %v5283_v61, %v5299_v31 }
0x10c5   : > { %v6561_v46 = vrot.slane %v6554_v55, %v11304_v2  ;;  %v6619_v32 = vrot.slane %v6612_v7, %v11304_v2  ;;  %v5300_v57 = vcombine.low %v5276_v48, %v5292_v59  ;;  %v5301_v63 = vcombine.high %v5276_v48, %v5292_v59 }
0x10c6   : > { %v6202_v47 = vpop.trf.xlu1  ;;  %v6090_v16 = vpop.trf.xlu0 }
0x10c7   : > { %v6578_v28 = vcombine.low %v6553_v36, %v6561_v46  ;;  %v5308_v38 = vrot.slane %v5300_v57, %v11307_v9 }
0x10c9   : > { %v11964_v60 = vrot.slane %v6578_v28, %v11307_v9 }
0x10ca   : > { %v6266_v34 = vpop.trf.xlu1  ;;  %v6154_v21 = vpop.trf.xlu0 }
0x10cb   : > { %v6570_v5 = vcombine.low %v6202_v47, %v6266_v34  ;;  %v6604_v11 = vcombine.low %v6090_v16, %v6154_v21  ;;  %v5317_v47 = vcombine.high %v5283_v61, %v5299_v31  ;;  %v5315_v34 = vrot.slane %v5301_v63, %v11307_v9 }
0x10cc   : > { %v5324_v21 = vrot.slane %v5316_v4, %v11307_v9 }
0x10cd   : > { %v6577_v20 = vrot.slane %v6570_v5, %v11304_v2  ;;  %v6611_v10 = vrot.slane %v6604_v11, %v11304_v2  ;;  %v5331_v5 = vrot.slane %v5317_v47, %v11307_v9  ;;  %v5333_v15 = vcombine.high %v5315_v34, %v10810_v3 }
0x10ce   : > { %v11948_v53 = vpop.trf.xlu1  ;;  %v6218_v6 = vpop.trf.xlu0  ;;  %v5334_v22 = vcombine.high %v5324_v21, %v10810_v3 }
0x10cf   : > { %v6586_v41 = vcombine.low %v6569_v52, %v6577_v20  ;;  %v6628_v33 = vcombine.low %v6603_v39, %v6611_v10  ;;  %v5335_v20 = vcombine.high %v5331_v5, %v10810_v3 }
0x10d1   : > { %v11961_v13 = vrot.slane %v6586_v41, %v11307_v9  ;;  %v11967_v1 = vrot.slane %v6628_v33, %v11307_v9 }
0x10d2   : > { %v11954_v29 = vpop.trf.xlu1  ;;  %v6282_v56 = vpop.trf.xlu0 }
0x10d3   : > { %v6620_v35 = vcombine.low %v6218_v6, %v6282_v56  ;;  %v11974_v24 = vcombine.low %v11964_v60, %v11961_v13  ;;  %v5332_v6 = vcombine.high %v5308_v38, %v10810_v3  ;;  %v6646_v56 = vcombine.low %v11948_v53, %v11954_v29 }
0x10d5   : > { %v6627_v37 = vrot.slane %v6620_v35, %v11304_v2  ;;  %v9657_v41 = vpack.c.bf16 %v5334_v22, %v5332_v6  ;;  %v9658_v35 = vpack.c.bf16 %v5335_v20, %v5333_v15  ;;  %v6653_v51 = vrot.slane %v6646_v56, %v11304_v2 }
0x10d6   : > { %v6426_v40 = vpop.trf.xlu1  ;;  %v6314_v54 = vpop.trf.xlu0 }
0x10d7   : > { %v6636_v30 = vcombine.low %v6619_v32, %v6627_v37 }
0x10d9   : > { %v11970_v58 = vrot.slane %v6636_v30, %v11307_v9  ;;  %v9655_v30 = vpack.c.bf16 %v5324_v21, %v5308_v38 }
0x10da   : > { %v6490_v62 = vpop.trf.xlu1  ;;  %v6378_v0 = vpop.trf.xlu0 }
0x10db   : > { %v11978_v8 = vcombine.low %v11967_v1, %v11970_v58  ;;  %v6662_v52 = vcombine.low %v6426_v40, %v6490_v62  ;;  %v6696_v36 = vcombine.low %v6314_v54, %v6378_v0  ;;  %v9656_v40 = vpack.c.bf16 %v5331_v5, %v5315_v34 }
0x10dc   : > { %v5540_v54 = vrot.slane %v9657_v41, %v11304_v2  ;;  %v5548_v0 = vrot.slane %v9658_v35, %v11304_v2  ;;  %v6750_v5 = vshrl.u32 %v11974_v24, 16  ;;  %v6645_v22 = vcombine.high %v11967_v1, %v11970_v58 }
0x10dd   : > { %v6748_v26 = vpack.i.b16 %v11978_v8, %v11974_v24  ;;  %v6669_v28 = vrot.slane %v6662_v52, %v11304_v2  ;;  %v6703_v19 = vrot.slane %v6696_v36, %v11304_v2  ;;  %v5523_v59 = vrot.slane %v9656_v40, %v11304_v2 }
0x10de   : > { %v6330_v49 = vpop.trf.xlu1  ;;  %v6442_v14 = vpop.trf.xlu0  ;;  %v5549_v48 = vcombine.low %v5540_v54, %v5548_v0  ;;  %v6751_v34 = vshrl.u32 %v11978_v8, 16 }
0x10df   : > { %9991 = vmatpush3.bf16.msra.mxu1 %v6748_v26 }
0x10e0   : > { %9992 = vmatprep.subr.bf16.mxu1 %v10810_v3 }
0x10e2   : > { %v6394_v50 = vpop.trf.xlu1  ;;  %v6506_v23 = vpop.trf.xlu0 }
0x10e3   : > { %v6654_v46 = vcombine.low %v6330_v49, %v6394_v50  ;;  %v6712_v33 = vcombine.low %v6442_v14, %v6506_v23  ;;  %v5515_v14 = vrot.slane %v9655_v30, %v11304_v2  ;;  %v6759_v30 = vshrl.u32 %v6645_v22, 16 }
0x10e5   : > { %v6661_v32 = vrot.slane %v6654_v46, %v11304_v2  ;;  %v6719_v26 = vrot.slane %v6712_v33, %v11304_v2  ;;  %v5524_v63 = vcombine.low %v5515_v14, %v5523_v59  ;;  %v6595_v46 = vcombine.high %v11964_v60, %v11961_v13 }
0x10e6   : > { %v6458_v16 = vpop.trf.xlu1  ;;  %v6346_v27 = vpop.trf.xlu0 }
0x10e7   : > { %v6678_v49 = vcombine.low %v6653_v51, %v6661_v32  ;;  %v5531_v21 = vrot.slane %v5524_v63, %v11307_v9  ;;  %v6756_v35 = vpack.i.b16 %v6645_v22, %v6595_v46 }
0x10e9   : > { %v6685_v61 = vrot.slane %v6678_v49, %v11307_v9  ;;  %v5561_v52 = vshrl.u32 %v5531_v21, 16  ;;  %v5532_v51 = vcombine.high %v5531_v21, %v10811_v25 }
0x10ea   : > { %v6522_v17 = vpop.trf.xlu1  ;;  %v6410_v55 = vpop.trf.xlu0 }
0x10eb   : > { %v6670_v11 = vcombine.low %v6458_v16, %v6522_v17  ;;  %v6704_v7 = vcombine.low %v6346_v27, %v6410_v55  ;;  %v5556_v16 = vrot.slane %v5549_v48, %v11307_v9  ;;  %v6752_v55 = vpack.i.b16 %v6751_v34, %v6750_v5 }
0x10ed   : > { %v6677_v39 = vrot.slane %v6670_v11, %v11304_v2  ;;  %v6711_v37 = vrot.slane %v6704_v7, %v11304_v2  ;;  %v5560_v17 = vpack.i.b16 %v5556_v16, %v5531_v21  ;;  %v5562_v8 = vshrl.u32 %v5556_v16, 16 }
0x10ee   : > { %v6474_v10 = vpop.trf.xlu0  ;;  %v5557_v33 = vcombine.high %v5556_v16, %v10811_v25 }
0x10ef   : > { %v6686_v53 = vcombine.low %v6669_v28, %v6677_v39  ;;  %v6728_v42 = vcombine.low %v6703_v19, %v6711_v37  ;;  %v5563_v39 = vpack.i.b16 %v5562_v8, %v5561_v52 }
0x10f1   : > { %v6693_v31 = vrot.slane %v6686_v53, %v11307_v9  ;;  %v6735_v23 = vrot.slane %v6728_v42, %v11307_v9  ;;  %v6758_v53 = vshrl.u32 %v6595_v46, 16 }
0x10f2   : > { %v6538_v62 = vpop.trf.xlu0 }
0x10f3   : > { %v6720_v29 = vcombine.low %v6474_v10, %v6538_v62  ;;  %v6694_v4 = vcombine.low %v6685_v61, %v6693_v31  ;;  %v6695_v13 = vcombine.high %v6685_v61, %v6693_v31  ;;  %v6760_v49 = vpack.i.b16 %v6759_v30, %v6758_v53 }
0x10f5   : > { %v6727_v12 = vrot.slane %v6720_v29, %v11304_v2  ;;  %v6766_v15 = vshrl.u32 %v6694_v4, 16  ;;  %v5566_v29 = vpack.i.b16 %v5557_v33, %v5532_v51  ;;  %v6774_v31 = vshrl.u32 %v6695_v13, 16 }
0x10f7   : > { %v6736_v50 = vcombine.low %v6719_v26, %v6727_v12 }
0x10f9   : > { %v6743_v57 = vrot.slane %v6736_v50, %v11307_v9  ;;  %v5568_v50 = vshrl.u32 %v5557_v33, 16 }
0x10fa   : > { %v5416_v27 = vpop.permute.xlu1 %5415 }
0x10fb   : > { %v6744_v47 = vcombine.low %v6735_v23, %v6743_v57  ;;  %v6745_v41 = vcombine.high %v6735_v23, %v6743_v57  ;;  %v5567_v23 = vshrl.u32 %v5532_v51, 16 }
0x10fd   : > { %v6764_v38 = vpack.i.b16 %v6744_v47, %v6694_v4  ;;  %v6767_v11 = vshrl.u32 %v6744_v47, 16  ;;  %v6772_v37 = vpack.i.b16 %v6745_v41, %v6695_v13  ;;  %v6775_v26 = vshrl.u32 %v6745_v41, 16 }
0x10fe   : > { %v5422_v6 = vpop.permute.xlu1 %5421  ;;  %v5569_v47 = vpack.i.b16 %v5568_v50, %v5567_v23 }
0x10ff   : > { %9993 = vmatpush3.bf16.msra.mxu1 %v6764_v38  ;;  %v6768_v24 = vpack.i.b16 %v6767_v11, %v6766_v15  ;;  %v5440_v20 = vcombine.low %v5416_v27, %v5422_v6  ;;  %v5441_v10 = vcombine.high %v5416_v27, %v5422_v6  ;;  %v6776_v48 = vpack.i.b16 %v6775_v26, %v6774_v31 }
0x1100   : > { %9998 = vmatprep.subr.bf16.mxu1 %v10810_v3 }
0x1101   : > { %v5448_v1 = vrot.slane %v5440_v20, %v11304_v2 }
0x1102   : > { %9995 = vmatmul.mubr.msk.bf16.vlgmr.msra.gmra.mrb[28].mxu1 %vm2531_vm1, %v5560_v17 }
0x1103   : > { %9999 = vmatpush3.bf16.msra.mxu1 %v6752_v55  ;;  %10002 = vmatprep.mubr.msk.bf16.mxu1 %vm10812_vm0, %v10810_v3 }
0x1104   : > { %10000 = vmatprep.subr.bf16.mxu1 %v10810_v3 }
0x1107   : > { %10001 = vmatpush3.bf16.msra.mxu1 %v6768_v24  ;;  %v5419_v7 = vpop.permute.xlu0 %5418 }
0x1108   : > { %v5424_v56 = vcombine.low %v11938_v18, %v5419_v7  ;;  %v5425_v36 = vcombine.high %v11938_v18, %v5419_v7  ;;  %10006 = vmatprep.subr.bf16.mxu1 %v10810_v3  ;;  %v5455_v18 = vrot.slane %v5441_v10, %v11304_v2 }
0x110a   : > { %v5432_v58 = vrot.slane %v5424_v56, %v11304_v2  ;;  %v5439_v28 = vrot.slane %v5425_v36, %v11304_v2  ;;  %10003 = vmatmul.mubr.msk.bf16.vlgmr.msra.gmra.mrb[32].mxu1 %vm2531_vm1, %v5563_v39 }
0x110b   : > { %10007 = vmatpush3.bf16.msra.mxu1 %v6756_v35  ;;  %10010 = vmatprep.mubr.msk.bf16.mxu1 %vm10812_vm0, %v10810_v3 }
0x110c   : > { %v5456_v60 = vcombine.low %v5432_v58, %v5448_v1  ;;  %v5457_v32 = vcombine.high %v5432_v58, %v5448_v1  ;;  %10008 = vmatprep.subr.bf16.mxu1 %v10810_v3  ;;  %v5472_v62 = vcombine.low %v5439_v28, %v5455_v18  ;;  %v5473_v59 = vcombine.high %v5439_v28, %v5455_v18 }
0x110e   : > { %v5464_v40 = vrot.slane %v5456_v60, %v11307_v9  ;;  %v5471_v19 = vrot.slane %v5457_v32, %v11307_v9  ;;  %v5480_v14 = vrot.slane %v5472_v62, %v11307_v9  ;;  %v5487_v4 = vrot.slane %v5473_v59, %v11307_v9 }
0x110f   : > { %10009 = vmatpush3.bf16.msra.mxu1 %v6772_v37 }
0x1110   : > { %10014 = vmatprep.subr.bf16.mxu1 %v10810_v3  ;;  %v7010_v54 = vpack.c.bf16 %v5464_v40, %v5464_v40  ;;  %v5488_v0 = vcombine.high %v5464_v40, %v10810_v3  ;;  %v5489_v42 = vcombine.high %v5471_v19, %v10810_v3  ;;  %v5490_v57 = vcombine.high %v5480_v14, %v10810_v3 }
0x1111   : > { %v7012_v63 = vpack.c.bf16 %v5471_v19, %v5471_v19  ;;  %v5491_v27 = vcombine.high %v5487_v4, %v10810_v3  ;;  %v7014_v38 = vpack.c.bf16 %v5480_v14, %v5480_v14  ;;  %v7016_v21 = vpack.c.bf16 %v5487_v4, %v5487_v4 }
0x1112   : > { %10011 = vmatmul.mubr.msk.bf16.vlgmr.msra.gmra.mrb[36].mxu1 %vm2531_vm1, %v5566_v29  ;;  %7018 = vxpose.xlu1.c.b16.start.end [1/1] (short) (narrow) %v7010_v54, 32  ;;  %v7011_v12 = vpack.c.bf16 %v5488_v0, %v5488_v0  ;;  %v7013_v61 = vpack.c.bf16 %v5489_v42, %v5489_v42  ;;  %v7015_v16 = vpack.c.bf16 %v5490_v57, %v5490_v57 }
0x1113   : > { %10015 = vmatpush3.bf16.msra.mxu1 %v6760_v49  ;;  %10018 = vmatprep.mubr.msk.bf16.mxu1 %vm10812_vm0, %v10810_v3  ;;  %v7017_v34 = vpack.c.bf16 %v5491_v27, %v5491_v27 }
0x1114   : > { %7034 = vxpose.xlu0.c.b16.start.end [1/1] (short) (narrow) %v7011_v12, 32  ;;  %10016 = vmatprep.subr.bf16.mxu1 %v10810_v3 }
0x1117   : > { %10017 = vmatpush3.bf16.msra.mxu1 %v6776_v48  ;;  %7066 = vxpose.xlu1.c.b16.start.end [1/1] (short) (narrow) %v7013_v61, 32 }
0x1119   : > { %7050 = vxpose.xlu0.c.b16.start.end [1/1] (short) (narrow) %v7012_v63, 32 }
0x111a   : > { %10019 = vmatmul.mubr.msk.bf16.vlgmr.msra.gmra.mrb[40].mxu1 %vm2531_vm1, %v5569_v47 }
0x111c   : > { %7098 = vxpose.xlu1.c.b16.start.end [1/1] (short) (narrow) %v7015_v16, 32 }
0x111e   : > { %7082 = vxpose.xlu0.c.b16.start.end [1/1] (short) (narrow) %v7014_v38, 32 }
0x1121   : > { %7130 = vxpose.xlu1.c.b16.start.end [1/1] (short) (narrow) %v7017_v34, 32 }
0x1123   : > { %7114 = vxpose.xlu0.c.b16.start.end [1/1] (short) (narrow) %v7016_v21, 32 }
0x1178   : > { %v7026_v5 = vpop.trf.xlu1 }
0x1179   : > { %v7150_v35 = vshrl.u32 %v7026_v5, 16 }
0x117a   : > { %v7042_v17 = vpop.trf.xlu0 }
0x117b   : > { %v7151_v1 = vshrl.u32 %v7042_v17, 16  ;;  %v12067_v18 = vpack.i.b16 %v7042_v17, %v7026_v5 }
0x117c   : > { %v7027_v55 = vpop.trf.xlu1 }
0x117d   : > { %v7182_v11 = vshrl.u32 %v7027_v55, 16  ;;  %v12071_v37 = vpack.i.b16 %v7151_v1, %v7150_v35 }
0x117e   : > { %v7043_v6 = vpop.trf.xlu0 }
0x117f   : > { %v12061_v15 = vpack.i.b16 %v7043_v6, %v7027_v55  ;;  %v7183_v8 = vshrl.u32 %v7043_v6, 16 }
0x1180   : > { %v7074_v22 = vpop.trf.xlu1 }
0x1181   : > { %v12063_v24 = vpack.i.b16 %v7183_v8, %v7182_v11  ;;  %v7159_v30 = vshrl.u32 %v7074_v22, 16 }
0x1182   : > { %v7058_v20 = vpop.trf.xlu0 }
0x1183   : > { %v7158_v40 = vshrl.u32 %v7058_v20, 16  ;;  %v7156_v29 = vpack.i.b16 %v7074_v22, %v7058_v20 }
0x1184   : > { %v7075_v52 = vpop.trf.xlu1 }
0x1185   : > { %v7191_v46 = vshrl.u32 %v7075_v52, 16  ;;  %v7160_v14 = vpack.i.b16 %v7159_v30, %v7158_v40 }
0x1186   : > { %v7059_v7 = vpop.trf.xlu0 }
0x1187   : > { %v12065_v10 = vpack.i.b16 %v7075_v52, %v7059_v7  ;;  %v7190_v56 = vshrl.u32 %v7059_v7, 16 }
0x1188   : > { %v7106_v36 = vpop.trf.xlu1 }
0x1189   : > { %v7192_v39 = vpack.i.b16 %v7191_v46, %v7190_v56  ;;  %v7167_v58 = vshrl.u32 %v7106_v36, 16 }
0x118a   : > { %v7090_v41 = vpop.trf.xlu0 }
0x118b   : > { %v7166_v28 = vshrl.u32 %v7090_v41, 16  ;;  %v12069_v60 = vpack.i.b16 %v7106_v36, %v7090_v41 }
0x118c   : > { %v7107_v13 = vpop.trf.xlu1 }
0x118d   : > { %v7199_v32 = vshrl.u32 %v7107_v13, 16  ;;  %v12073_v62 = vpack.i.b16 %v7167_v58, %v7166_v28  ;;  %v7210_v54 = vcombine.low %v12067_v18, %v12069_v60 }
0x118e   : > { %v7091_v33 = vpop.trf.xlu0 }
0x118f   : > { %v7196_v51 = vpack.i.b16 %v7107_v13, %v7091_v33  ;;  %v7198_v19 = vshrl.u32 %v7091_v33, 16  ;;  %v7278_v59 = vcombine.low %v12071_v37, %v12073_v62  ;;  %v7218_v57 = vrot.slane %v7210_v54, %v11304_v2 }
0x1190   : > { %v7138_v53 = vpop.trf.xlu1 }
0x1191   : > { %v7175_v0 = vshrl.u32 %v7138_v53, 16  ;;  %v7200_v49 = vpack.i.b16 %v7199_v32, %v7198_v19  ;;  %v7346_v26 = vcombine.low %v12061_v15, %v7196_v51  ;;  %v7347_v42 = vcombine.high %v12061_v15, %v7196_v51 }
0x1192   : > { %v7122_v12 = vpop.trf.xlu0  ;;  %v7286_v27 = vrot.slane %v7278_v59, %v11304_v2  ;;  %v7279_v32 = vcombine.high %v12071_v37, %v12073_v62 }
0x1193   : > { %v7172_v31 = vpack.i.b16 %v7138_v53, %v7122_v12  ;;  %v7174_v50 = vshrl.u32 %v7122_v12, 16  ;;  %v7414_v48 = vcombine.low %v12063_v24, %v7200_v49  ;;  %v7415_v61 = vcombine.high %v12063_v24, %v7200_v49 }
0x1194   : > { %v7139_v23 = vpop.trf.xlu1  ;;  %v12088_v11 = vrot.slane %v7346_v26, %v11304_v2  ;;  %v12118_v33 = vrot.slane %v7347_v42, %v11304_v2  ;;  %v7293_v54 = vrot.slane %v7279_v32, %v11304_v2 }
0x1195   : > { %v7176_v63 = vpack.i.b16 %v7175_v0, %v7174_v50  ;;  %v7226_v4 = vcombine.low %v7156_v29, %v7172_v31  ;;  %v7207_v47 = vshrl.u32 %v7139_v23, 16  ;;  %v12094_v20 = vrot.slane %v7414_v48, %v11304_v2 }
0x1196   : > { %v7123_v16 = vpop.trf.xlu0  ;;  %v12100_v56 = vrot.slane %v7415_v61, %v11304_v2  ;;  %v7227_v58 = vcombine.high %v7156_v29, %v7172_v31 }
0x1197   : > { %v7234_v38 = vrot.slane %v7226_v4, %v11304_v2  ;;  %v7294_v34 = vcombine.low %v7160_v14, %v7176_v63  ;;  %v7204_v21 = vpack.i.b16 %v7139_v23, %v7123_v16  ;;  %v7206_v5 = vshrl.u32 %v7123_v16, 16 }
0x1198   : > { %v7295_v30 = vcombine.high %v7160_v14, %v7176_v63  ;;  %v7241_v53 = vrot.slane %v7227_v58, %v11304_v2 }
0x1199   : > { %v7302_v17 = vrot.slane %v7294_v34, %v11304_v2  ;;  %v7242_v55 = vcombine.low %v7218_v57, %v7234_v38  ;;  %v7208_v6 = vpack.i.b16 %v7207_v47, %v7206_v5  ;;  %v7362_v15 = vcombine.low %v12065_v10, %v7204_v21 }
0x119a   : > { %v7363_v8 = vcombine.high %v12065_v10, %v7204_v21  ;;  %v7243_v13 = vcombine.high %v7218_v57, %v7234_v38  ;;  %v7309_v49 = vrot.slane %v7295_v30, %v11304_v2 }
0x119b   : > { %v7250_v22 = vrot.slane %v7242_v55, %v11307_v9  ;;  %v7310_v24 = vcombine.low %v7286_v27, %v7302_v17  ;;  %v12097_v52 = vrot.slane %v7362_v15, %v11304_v2  ;;  %v7430_v46 = vcombine.low %v7192_v39, %v7208_v6  ;;  %v10450_v55 = vld [vmem:[%s12493_s20] ss:$0 sm:$0xff]  ;;  %s9734_s20 = sshll.u32 %s10935_s1, 4  ;;  %s10818_s1 = smov [#allocation17]  }
0x119c   : > { %v7431_v7 = vcombine.high %v7192_v39, %v7208_v6  ;;  %v7211_v39 = vcombine.high %v12067_v18, %v12069_v60  ;;  %v12123_v51 = vrot.slane %v7363_v8, %v11304_v2  ;;  %v7311_v18 = vcombine.high %v7286_v27, %v7302_v17 }
0x119d   : > { %7482 = vxpose.xlu0.c.b16.start.end [1/1] (short) (narrow) %v7250_v22, 16  ;;  %v7318_v36 = vrot.slane %v7310_v24, %v11307_v9  ;;  %v7274_v41 = vcombine.high %v7250_v22, %v10811_v25  ;;  %v7378_v10 = vcombine.low %v12088_v11, %v12097_v52  ;;  %v12107_v35 = vrot.slane %v7430_v46, %v11304_v2 }
0x119e   : > { %v12110_v1 = vrot.slane %v7431_v7, %v11304_v2  ;;  %v7379_v37 = vcombine.high %v12088_v11, %v12097_v52  ;;  %v7225_v62 = vrot.slane %v7211_v39, %v11304_v2  ;;  %v7257_v29 = vrot.slane %v7243_v13, %v11307_v9 }
0x119f   : > { %7498 = vxpose.xlu1.c.b16.start.end [1/1] (short) (narrow) %v7318_v36, 16  ;;  %v7342_v28 = vcombine.high %v7318_v36, %v10811_v25  ;;  %v7446_v40 = vcombine.low %v12094_v20, %v12107_v35  ;;  %v7447_v60 = vcombine.high %v12094_v20, %v12107_v35  ;;  %v7325_v26 = vrot.slane %v7311_v18, %v11307_v9 }
0x11a0   : > { %v7462_v19 = vcombine.low %v12100_v56, %v12110_v1  ;;  %v7463_v0 = vcombine.high %v12100_v56, %v12110_v1  ;;  %v7394_v42 = vcombine.low %v12118_v33, %v12123_v51  ;;  %v7395_v12 = vcombine.high %v12118_v33, %v12123_v51 }
0x11a1   : > { %7514 = vxpose.xlu0.c.b16.start.end [1/1] (short) (narrow) %v7274_v41, 16  ;;  %v7275_v14 = vcombine.high %v7257_v29, %v10811_v25  ;;  %v7258_v59 = vcombine.low %v7225_v62, %v7241_v53  ;;  %v7343_v31 = vcombine.high %v7325_v26, %v10811_v25  ;;  %v7326_v50 = vcombine.low %v7293_v54, %v7309_v49 }
0x11a2   : > { %v7259_v57 = vcombine.high %v7225_v62, %v7241_v53  ;;  %v7327_v4 = vcombine.high %v7293_v54, %v7309_v49  ;;  %v12167_v49 = vrot.slane %v7446_v40, %v11307_v9  ;;  %v7409_v52 = vrot.slane %v7395_v12, %v11307_v9 }
0x11a3   : > { %7530 = vxpose.xlu1.c.b16.start.end [1/1] (short) (narrow) %v7342_v28, 16  ;;  %v7266_v48 = vrot.slane %v7258_v59, %v11307_v9  ;;  %v7334_v61 = vrot.slane %v7326_v50, %v11307_v9 }
0x11a4   : > { %v7273_v47 = vrot.slane %v7259_v57, %v11307_v9  ;;  %v7341_v16 = vrot.slane %v7327_v4, %v11307_v9 }
0x11a5   : > { %7546 = vxpose.xlu0.c.b16.start.end [1/1] (short) (narrow) %v7257_v29, 16  ;;  %v7276_v23 = vcombine.high %v7266_v48, %v10811_v25  ;;  %v7344_v63 = vcombine.high %v7334_v61, %v10811_v25 }
0x11a6   : > { %v7277_v27 = vcombine.high %v7273_v47, %v10811_v25  ;;  %v7345_v38 = vcombine.high %v7341_v16, %v10811_v25 }
0x11a7   : > { %7562 = vxpose.xlu1.c.b16.start.end [1/1] (short) (narrow) %v7325_v26, 16 }
0x11a9   : > { %7578 = vxpose.xlu0.c.b16.start.end [1/1] (short) (narrow) %v7275_v14, 16 }
0x11ab   : > { %7594 = vxpose.xlu1.c.b16.start.end [1/1] (short) (narrow) %v7343_v31, 16 }
0x11ad   : > { %7610 = vxpose.xlu0.c.b16.start.end [1/1] (short) (narrow) %v7266_v48, 16  ;;  %v7386_v48 = vrot.slane %v7378_v10, %v11307_v9 }
0x11af   : > { %7626 = vxpose.xlu1.c.b16.start.end [1/1] (short) (narrow) %v7334_v61, 16 }
0x11b1   : > { %7642 = vxpose.xlu0.c.b16.start.end [1/1] (short) (narrow) %v7276_v23, 16 }
0x11b3   : > { %7658 = vxpose.xlu1.c.b16.start.end [1/1] (short) (narrow) %v7344_v63, 16 }
0x11b5   : > { %7674 = vxpose.xlu0.c.b16.start.end [1/1] (short) (narrow) %v7273_v47, 16 }
0x11b7   : > { %7690 = vxpose.xlu1.c.b16.start.end [1/1] (short) (narrow) %v7341_v16, 16 }
0x11b9   : > { %7706 = vxpose.xlu0.c.b16.start.end [1/1] (short) (narrow) %v7277_v27, 16 }
0x11bb   : > { %7722 = vxpose.xlu1.c.b16.start.end [1/1] (short) (narrow) %v7345_v38, 16 }
0x11d5   : > { %v6815_v34 = vpop.f32.mrb[28].mxu1 }
0x11d6   : > { %v6950_v21 = vmul.f32 0.17677669, %v6815_v34  ;;  %v9996_v5 = vpop.f32.mrb[29].mxu1 }
0x11d7   : > { %v6818_v17 = vpop.f32.mrb[30].mxu1 }
0x11d8   : > { %v12155_v6 = vadd.f32 %v10450_v55, %v6950_v21  ;;  %v9997_v15 = vpop.f32.mrb[31].mxu1 }
0x11da   : > { %v6958_v8 = vsel %vm2718_vm2, %v12155_v6, -inf }
0x11db   : > { %6959 = vmax.xlane.f32.xlu1 %v6958_v8 }
0x11dd   : > { %v6858_v22 = vpop.f32.mrb[32].mxu1 }
0x11de   : > { %v6951_v24 = vmul.f32 0.17677669, %v6858_v22  ;;  %v10004_v46 = vpop.f32.mrb[33].mxu1 }
0x11df   : > { %v6861_v7 = vpop.f32.mrb[34].mxu1 }
0x11e0   : > { %v12159_v36 = vadd.f32 %v10450_v55, %v6951_v24  ;;  %v10005_v41 = vpop.f32.mrb[35].mxu1 }
0x11e2   : > { %v6961_v39 = vsel %vm2718_vm2, %v12159_v36, -inf }
0x11e3   : > { %6962 = vmax.xlane.f32.xlu0 %v6961_v39 }
0x11e5   : > { %v6901_v58 = vpop.f32.mrb[36].mxu1 }
0x11e6   : > { %v10012_v28 = vpop.f32.mrb[37].mxu1  ;;  %v6952_v31 = vmul.f32 0.17677669, %v6901_v58 }
0x11e7   : > { %v6904_v13 = vpop.f32.mrb[38].mxu1 }
0x11e8   : > { %v10013_v32 = vpop.f32.mrb[39].mxu1  ;;  %v12174_v23 = vadd.f32 %v10450_v55, %v6952_v31 }
0x11ea   : > { %v6964_v4 = vsel %vm2718_vm2, %v12174_v23, -inf }
0x11ed   : > { %v6944_v30 = vpop.f32.mrb[40].mxu1 }
0x11ee   : > { %v10020_v18 = vpop.f32.mrb[41].mxu1  ;;  %v6953_v40 = vmul.f32 0.17677669, %v6944_v30 }
0x11ef   : > { %v6947_v62 = vpop.f32.mrb[42].mxu1 }
0x11f0   : > { %v10021_v53 = vpop.f32.mrb[43].mxu1  ;;  %v12178_v27 = vadd.f32 %v10450_v55, %v6953_v40 }
0x11f2   : > { %v6967_v15 = vsel %vm2718_vm2, %v12178_v27, -inf }
0x1203   : > { %v7490_v29 = vpop.trf.xlu0 }
0x1205   : > { %v7506_v54 = vpop.trf.xlu1 }
0x1207   : > { %v7522_v26 = vpop.trf.xlu0 }
0x1208   : > { %7754 = vxpose.xlu1.c.b16.start.end [1/1] (short) (narrow) %v12167_v49, 16 }
0x1209   : > { %v7538_v14 = vpop.trf.xlu1 }
0x120b   : > { %v7554_v59 = vpop.trf.xlu0 }
0x120c   : > { %v7994_v38 = vcombine.low %v7490_v29, %v7554_v59 }
0x120d   : > { %v7570_v50 = vpop.trf.xlu1 }
0x120e   : > { %v8044_v5 = vcombine.low %v7506_v54, %v7570_v50  ;;  %v8001_v8 = vrot.slane %v7994_v38, %v11304_v2 }
0x120f   : > { %v7586_v61 = vpop.trf.xlu0 }
0x1210   : > { %7738 = vxpose.xlu0.c.b16.start.end [1/1] (short) (narrow) %v7386_v48, 16  ;;  %v8002_v34 = vcombine.low %v7522_v26, %v7586_v61  ;;  %v8051_v7 = vrot.slane %v8044_v5, %v11304_v2 }
0x1211   : > { %v7602_v57 = vpop.trf.xlu1 }
0x1212   : > { %v8052_v10 = vcombine.low %v7538_v14, %v7602_v57  ;;  %v8009_v22 = vrot.slane %v8002_v34, %v11304_v2 }
0x1213   : > { %v7618_v63 = vpop.trf.xlu0 }
0x1214   : > { %v8059_v55 = vrot.slane %v8052_v10, %v11304_v2  ;;  %v8026_v58 = vcombine.low %v8001_v8, %v8009_v22  ;;  %v7410_v22 = vcombine.high %v7386_v48, %v10811_v25 }
0x1215   : > { %6965 = vmax.xlane.f32.xlu1 %v6964_v4  ;;  %v7634_v47 = vpop.trf.xlu1 }
0x1216   : > { %v8076_v30 = vcombine.low %v8051_v7, %v8059_v55  ;;  %v8033_v29 = vrot.slane %v8026_v58, %v11307_v9 }
0x1217   : > { %v7650_v16 = vpop.trf.xlu0 }
0x1218   : > { %v8083_v14 = vrot.slane %v8076_v30, %v11307_v9 }
0x1219   : > { %v7666_v21 = vpop.trf.xlu1 }
0x121b   : > { %v7682_v17 = vpop.trf.xlu0 }
0x121c   : > { %v8010_v24 = vcombine.low %v7618_v63, %v7682_v17  ;;  %v7478_v17 = vcombine.high %v12167_v49, %v10811_v25  ;;  %v7393_v49 = vrot.slane %v7379_v37, %v11307_v9 }
0x121d   : > { %6968 = vmax.xlane.f32.xlu0 %v6967_v15  ;;  %v7698_v46 = vpop.trf.xlu1  ;;  %v7461_v15 = vrot.slane %v7447_v60, %v11307_v9  ;;  %v7477_v60 = vrot.slane %v7463_v0, %v11307_v9 }
0x121e   : > { %v8060_v41 = vcombine.low %v7634_v47, %v7698_v46  ;;  %v8017_v28 = vrot.slane %v8010_v24, %v11304_v2  ;;  %v7470_v24 = vrot.slane %v7462_v19, %v11307_v9  ;;  %v7411_v35 = vcombine.high %v7393_v49, %v10811_v25 }
0x121f   : > { %v7714_v39 = vpop.trf.xlu0  ;;  %v7479_v8 = vcombine.high %v7461_v15, %v10811_v25  ;;  %v7402_v19 = vrot.slane %v7394_v42, %v11307_v9 }
0x1220   : > { %v8018_v13 = vcombine.low %v7650_v16, %v7714_v39  ;;  %v8067_v18 = vrot.slane %v8060_v41, %v11304_v2  ;;  %v7480_v20 = vcombine.high %v7470_v24, %v10811_v25 }
0x1221   : > { %v7730_v32 = vpop.trf.xlu1  ;;  %v7412_v11 = vcombine.high %v7402_v19, %v10811_v25 }
0x1222   : > { %v8068_v62 = vcombine.low %v7666_v21, %v7730_v32  ;;  %v8025_v53 = vrot.slane %v8018_v13, %v11304_v2 }
0x1224   : > { %v8075_v54 = vrot.slane %v8068_v62, %v11304_v2  ;;  %v8034_v26 = vcombine.low %v8017_v28, %v8025_v53 }
0x1226   : > { %v8084_v59 = vcombine.low %v8067_v18, %v8075_v54  ;;  %v8041_v31 = vrot.slane %v8034_v26, %v11307_v9 }
0x1228   : > { %v8091_v50 = vrot.slane %v8084_v59, %v11307_v9  ;;  %v8042_v61 = vcombine.low %v8033_v29, %v8041_v31  ;;  %v12194_v57 = vcombine.high %v8033_v29, %v8041_v31 }
0x122a   : > { %v8092_v63 = vcombine.low %v8083_v14, %v8091_v50  ;;  %v12196_v40 = vcombine.high %v8083_v14, %v8091_v50  ;;  %v8197_v4 = vshrl.u32 %v8042_v61, 16  ;;  %v8203_v47 = vshrl.u32 %v12194_v57, 16 }
0x122c   : > { %v8196_v16 = vpack.i.b16 %v8092_v63, %v8042_v61  ;;  %v8198_v38 = vshrl.u32 %v8092_v63, 16  ;;  %v8202_v34 = vpack.i.b16 %v12196_v40, %v12194_v57  ;;  %v8204_v21 = vshrl.u32 %v12196_v40, 16 }
0x122e   : > { %10024 = vmatprep.mubr.msk.bf16.mxu0 %vm2718_vm2, %v8196_v16  ;;  %v8199_v5 = vpack.i.b16 %v8198_v38, %v8197_v4  ;;  %v12203_v10 = vpack.i.b16 %v8204_v21, %v8203_v47  ;;  %v7413_v38 = vcombine.high %v7409_v52, %v10811_v25  ;;  %v7481_v21 = vcombine.high %v7477_v60, %v10811_v25 }
0x1230   : > { %10030 = vmatprep.mubr.msk.bf16.mxu1 %vm2718_vm2, %v8199_v5 }
0x1242   : > { %7786 = vxpose.xlu1.c.b16.start.end [1/1] (short) (narrow) %v7478_v17, 16 }
0x1246   : > { %7818 = vxpose.xlu1.c.b16.start.end [1/1] (short) (narrow) %v7461_v15, 16 }
0x124a   : > { %7850 = vxpose.xlu1.c.b16.start.end [1/1] (short) (narrow) %v7479_v8, 16  ;;  %7770 = vxpose.xlu0.c.b16.start.end [1/1] (short) (narrow) %v7410_v22, 16 }
0x124e   : > { %7882 = vxpose.xlu1.c.b16.start.end [1/1] (short) (narrow) %v7470_v24, 16  ;;  %7802 = vxpose.xlu0.c.b16.start.end [1/1] (short) (narrow) %v7393_v49, 16 }
0x1252   : > { %7914 = vxpose.xlu1.c.b16.start.end [1/1] (short) (narrow) %v7480_v20, 16  ;;  %7834 = vxpose.xlu0.c.b16.start.end [1/1] (short) (narrow) %v7411_v35, 16 }
0x1256   : > { %7946 = vxpose.xlu1.c.b16.start.end [1/1] (short) (narrow) %v7477_v60, 16  ;;  %7866 = vxpose.xlu0.c.b16.start.end [1/1] (short) (narrow) %v7402_v19, 16 }
0x125a   : > { %7898 = vxpose.xlu0.c.b16.start.end [1/1] (short) (narrow) %v7412_v11, 16 }
0x125e   : > { %7930 = vxpose.xlu0.c.b16.start.end [1/1] (short) (narrow) %v7409_v52, 16 }
0x1268   : > { %v6960_v37 = vpop.xlane.xlu1 %6959 }
0x1269   : > { %v6970_v56 = vsub.f32 %v12155_v6, %v6960_v37 }
0x126b   : > { %v6974_v1 = vmul.f32 1.442695, %v6970_v56 }
0x126d   : > { %10424 = vpow2.f32 %v6974_v1 }
0x126e   : > { %v7762_v33 = vpop.trf.xlu1 }
0x1270   : > { %v6963_v0 = vpop.xlane.xlu0 %6962 }
0x1271   : > { %v6971_v48 = vsub.f32 %v12159_v36, %v6963_v0 }
0x1273   : > { %v6976_v42 = vmul.f32 1.442695, %v6971_v48 }
0x1275   : > { %10426 = vpow2.f32 %v6976_v42 }
0x1276   : > { %v7746_v6 = vpop.trf.xlu0 }
0x1277   : > { %v10425_v46 = vpop.eup %10424 }
0x1278   : > { %v6982_v7 = vsel %vm2718_vm2, %v10425_v46, 0.0 }
0x1279   : > { %6983 = vadd.xlane.f32.xlu0 %v6982_v7 }
0x127f   : > { %v10427_v55 = vpop.eup %10426 }
0x1280   : > { %v6985_v41 = vsel %vm2718_vm2, %v10427_v55, 0.0 }
0x1281   : > { %6986 = vadd.xlane.f32.xlu1 %v6985_v41 }
0x12a2   : > { %v6966_v51 = vpop.xlane.xlu1 %6965 }
0x12a3   : > { %v6972_v12 = vsub.f32 %v12174_v23, %v6966_v51 }
0x12a5   : > { %v6978_v39 = vmul.f32 1.442695, %v6972_v12 }
0x12a7   : > { %10428 = vpow2.f32 %v6978_v39 }
0x12a8   : > { %v7794_v58 = vpop.trf.xlu1 }
0x12aa   : > { %v6969_v28 = vpop.xlane.xlu0 %6968 }
0x12ab   : > { %v6973_v36 = vsub.f32 %v12178_v27, %v6969_v28 }
0x12ac   : > { %v7826_v13 = vpop.trf.xlu1 }
0x12ad   : > { %v6980_v32 = vmul.f32 1.442695, %v6973_v36  ;;  %v8144_v30 = vcombine.low %v7762_v33, %v7826_v13 }
0x12af   : > { %10430 = vpow2.f32 %v6980_v32  ;;  %v12245_v26 = vrot.slane %v8144_v30, %v11304_v2 }
0x12b0   : > { %v7858_v18 = vpop.trf.xlu1  ;;  %v7778_v62 = vpop.trf.xlu0 }
0x12b1   : > { %v10429_v53 = vpop.eup %10428  ;;  %v8152_v29 = vcombine.low %v7794_v58, %v7858_v18 }
0x12b2   : > { %v6988_v54 = vsel %vm2718_vm2, %v10429_v53, 0.0 }
0x12b3   : > { %v12248_v23 = vrot.slane %v8152_v29, %v11304_v2  ;;  %6989 = vadd.xlane.f32.xlu0 %v6988_v54 }
0x12b4   : > { %v7810_v14 = vpop.trf.xlu0  ;;  %v7890_v15 = vpop.trf.xlu1 }
0x12b5   : > { %v8176_v27 = vcombine.low %v12245_v26, %v12248_v23  ;;  %v8094_v59 = vcombine.low %v7746_v6, %v7810_v14 }
0x12b7   : > { %v8101_v4 = vrot.slane %v8094_v59, %v11304_v2 }
0x12b8   : > { %v7842_v31 = vpop.trf.xlu0  ;;  %v7922_v22 = vpop.trf.xlu1 }
0x12b9   : > { %v12252_v50 = vpop.eup %10430  ;;  %v8102_v61 = vcombine.low %v7778_v62, %v7842_v31 }
0x12ba   : > { %v6991_v63 = vsel %vm2718_vm2, %v12252_v50, 0.0 }
0x12bb   : > { %v8109_v47 = vrot.slane %v8102_v61, %v11304_v2  ;;  %6992 = vadd.xlane.f32.xlu1 %v6991_v63  ;;  %v8183_v63 = vrot.slane %v8176_v27, %v11307_v9 }
0x12bc   : > { %v7874_v5 = vpop.trf.xlu0  ;;  %v7954_v20 = vpop.trf.xlu1 }
0x12bd   : > { %v8126_v16 = vcombine.low %v8101_v4, %v8109_v47  ;;  %v8160_v36 = vcombine.low %v7890_v15, %v7954_v20 }
0x12bf   : > { %v8133_v28 = vrot.slane %v8126_v16, %v11307_v9  ;;  %v8167_v14 = vrot.slane %v8160_v36, %v11304_v2 }
0x12c0   : > { %v7906_v17 = vpop.trf.xlu0 }
0x12c4   : > { %v7938_v8 = vpop.trf.xlu0 }
0x12c5   : > { %v8110_v41 = vcombine.low %v7874_v5, %v7938_v8 }
0x12c7   : > { %v8117_v12 = vrot.slane %v8110_v41, %v11304_v2  ;;  %v10346_v41 = vld [vmem:[#allocation11 + $0x60] sm:$0xff]  }
0x12e0   : > { %7962 = vxpose.xlu0.c.b16.start.end [1/1] (short) (narrow) %v7413_v38, 16 }
0x12e8   : > { %7978 = vxpose.xlu1.c.b16.start.end [1/1] (short) (narrow) %v7481_v21, 16 }
0x1306   : > { %v6984_v24 = vpop.xlane.xlu0 %6983 }
0x1307   : > { %v6994_v49 = vmax.f32 %v6984_v24, 1e-20 }
0x1309   : > { %10432 = vrcp.f32 %v6994_v49 }
0x130e   : > { %v6987_v35 = vpop.xlane.xlu1 %6986 }
0x130f   : > { %v6995_v19 = vmax.f32 %v6987_v35, 1e-20 }
0x1311   : > { %10434 = vrcp.f32 %v6995_v19 }
0x1313   : > { %v10433_v11 = vpop.eup %10432 }
0x1314   : > { %v7002_v37 = vmul.f32 %v10433_v11, %v10425_v46 }
0x1316   : > { %v7006_v56 = vpack.c.bf16 %v7002_v37, %v7002_v37 }
0x1318   : > { %10090 = vmatprep.subr.msk.bf16.mxu0 %vm2718_vm2, %v7006_v56  ;;  %v8225_v60 = vsel %vm2718_vm2, %v7006_v56, 0 }
0x1319   : > { %10023 = vmatpush3.bf16.xpose.msra.mxu0 %v8225_v60 }
0x131b   : > { %v10435_v52 = vpop.eup %10434 }
0x131c   : > { %v7003_v1 = vmul.f32 %v10435_v52, %v10427_v55 }
0x131e   : > { %v7007_v0 = vpack.c.bf16 %v7003_v1, %v7003_v1 }
0x1320   : > { %10091 = vmatprep.subr.msk.bf16.mxu1 %vm2718_vm2, %v7007_v0  ;;  %v8283_v48 = vsel %vm2718_vm2, %v7007_v0, 0  ;;  %v10342_v0 = vld [vmem:[#allocation11 + $0x40] sm:$0xff]  }
0x1321   : > { %10029 = vmatpush3.bf16.xpose.msra.mxu1 %v8283_v48  ;;  %v10343_v48 = vld [vmem:[#allocation11 + $0x48] sm:$0xff]  }
0x1340   : > { %v6990_v42 = vpop.xlane.xlu0 %6989 }
0x1341   : > { %v6996_v7 = vmax.f32 %v6990_v42, 1e-20  ;;  %v10344_v42 = vld [vmem:[#allocation11 + $0x50] sm:$0xff]  }
0x1343   : > { %10436 = vrcp.f32 %v6996_v7  ;;  %v10345_v7 = vld [vmem:[#allocation11 + $0x58] sm:$0xff]  }
0x1346   : > { %v7970_v33 = vpop.trf.xlu0 }
0x1347   : > { %v8118_v46 = vcombine.low %v7906_v17, %v7970_v33  ;;  %v10347_v33 = vld [vmem:[#allocation11 + $0x68] sm:$0xff]  }
0x1348   : > { %v6993_v51 = vpop.xlane.xlu1 %6992 }
0x1349   : > { %v8125_v6 = vrot.slane %v8118_v46, %v11304_v2  ;;  %v6997_v39 = vmax.f32 %v6993_v51, 1e-20 }
0x134b   : > { %v8134_v58 = vcombine.low %v8117_v12, %v8125_v6  ;;  %10438 = vrcp.f32 %v6997_v39 }
0x134d   : > { %v10437_v55 = vpop.eup %10436  ;;  %v8141_v13 = vrot.slane %v8134_v58, %v11307_v9 }
0x134e   : > { %v7986_v32 = vpop.trf.xlu1  ;;  %v7004_v30 = vmul.f32 %v10437_v55, %v10429_v53 }
0x134f   : > { %v8142_v18 = vcombine.low %v8133_v28, %v8141_v13  ;;  %v8143_v62 = vcombine.high %v8133_v28, %v8141_v13  ;;  %v8168_v29 = vcombine.low %v7922_v22, %v7986_v32 }
0x1350   : > { %v7008_v54 = vpack.c.bf16 %v7004_v30, %v7004_v30 }
0x1351   : > { %v8175_v59 = vrot.slane %v8168_v29, %v11304_v2  ;;  %v8209_v38 = vshrl.u32 %v8142_v18, 16  ;;  %v8215_v21 = vshrl.u32 %v8143_v62, 16 }
0x1352   : > { %10092 = vmatprep.subr.msk.bf16.mxu0 %vm2718_vm2, %v7008_v54  ;;  %v8341_v26 = vsel %vm2718_vm2, %v7008_v54, 0 }
0x1353   : > { %v8184_v31 = vcombine.low %v8167_v14, %v8175_v59  ;;  %v10348_v14 = vld [vmem:[#allocation11 + $0x70] sm:$0xff]  }
0x1355   : > { %v10439_v61 = vpop.eup %10438  ;;  %v8191_v4 = vrot.slane %v8184_v31, %v11307_v9 }
0x1356   : > { %v7005_v53 = vmul.f32 %v10439_v61, %v12252_v50 }
0x1357   : > { %v8192_v47 = vcombine.low %v8183_v63, %v8191_v4  ;;  %v8193_v16 = vcombine.high %v8183_v63, %v8191_v4 }
0x1358   : > { %v7009_v5 = vpack.c.bf16 %v7005_v53, %v7005_v53 }
0x1359   : > { %v8208_v17 = vpack.i.b16 %v8192_v47, %v8142_v18  ;;  %v8210_v15 = vshrl.u32 %v8192_v47, 16  ;;  %v8214_v8 = vpack.i.b16 %v8193_v16, %v8143_v62  ;;  %v8216_v22 = vshrl.u32 %v8193_v16, 16 }
0x135a   : > { %10093 = vmatprep.subr.msk.bf16.mxu1 %vm2718_vm2, %v7009_v5  ;;  %v8399_v50 = vsel %vm2718_vm2, %v7009_v5, 0 }
0x135b   : > { %10025 = vmatmul.mubr.msk.bf16.vlgmr.msra.gmra.mrb[32].mxu0 %vm2718_vm2, %v8208_v17  ;;  %v8211_v23 = vpack.i.b16 %v8210_v15, %v8209_v38  ;;  %v8217_v27 = vpack.i.b16 %v8216_v22, %v8215_v21  ;;  %v10349_v15 = vld [vmem:[#allocation11 + $0x78] sm:$0xff]  }
0x135c   : > { %10035 = vmatpush3.bf16.xpose.msra.mxu0 %v8341_v26  ;;  %10036 = vmatprep.mubr.msk.bf16.mxu0 %vm2718_vm2, %v8202_v34 }
0x135d   : > { %10031 = vmatmul.mubr.msk.bf16.vlgmr.msra.gmra.mrb[44].mxu1 %vm2718_vm2, %v8211_v23  ;;  %10046 = vmatprep.subr.bf16.mxu0 %v10810_v3 }
0x135e   : > { %10041 = vmatpush3.bf16.xpose.msra.mxu1 %v8399_v50  ;;  %10042 = vmatprep.mubr.msk.bf16.mxu1 %vm2718_vm2, %v12203_v10 }
0x1363   : > { %10037 = vmatmul.mubr.msk.bf16.vlgmr.msra.gmra.mrb[36].mxu0 %vm2718_vm2, %v8214_v8 }
0x1364   : > { %10062 = vmatprep.mubr.msk.bf16.mxu0 %vm10812_vm0, %v10810_v3  ;;  %10047 = vmatpush3.bf16.msra.mxu0 %v10342_v0 }
0x1365   : > { %10043 = vmatmul.mubr.msk.bf16.vlgmr.msra.gmra.mrb[48].mxu1 %vm2718_vm2, %v8217_v27  ;;  %10048 = vmatprep.subr.bf16.mxu0 %v10810_v3 }
0x1366   : > { %9016 = vmatprep.mubr.bf16.mxu1 %v10811_v25 }
0x1368   : > { %10049 = vmatpush3.bf16.msra.mxu0 %v10343_v48 }
0x1369   : > { %10050 = vmatprep.subr.bf16.mxu0 %v10810_v3 }
0x136c   : > { %10051 = vmatpush3.bf16.msra.mxu0 %v10344_v42  ;;  %v10350_v42 = vld [vmem:[#allocation13 + $0x80] ss:$8 sps:$4 sm:$0xff]  }
0x136d   : > { %10052 = vmatprep.subr.bf16.mxu0 %v10810_v3 }
0x1370   : > { %10053 = vmatpush3.bf16.msra.mxu0 %v10345_v7  ;;  %v10352_v7 = vld [vmem:[#allocation13 + $0x84] ss:$8 sps:$4 sm:$0xff]  }
0x1371   : > { %10054 = vmatprep.subr.bf16.mxu0 %v10810_v3  ;;  %8984 = vmatprep.subr.bf16.mxu1 %v10352_v7 }
0x1372   : > { %8985 = vmatpush1.bf16.msra.mxu1 %v10350_v42 }
0x1374   : > { %10055 = vmatpush3.bf16.msra.mxu0 %v10346_v41  ;;  %v10355_v41 = vld [vmem:[#allocation13 + $0x94] ss:$8 sps:$4 sm:$0xff]  }
0x1375   : > { %10056 = vmatprep.subr.bf16.mxu0 %v10810_v3  ;;  %8986 = vmatprep.subr.bf16.mxu1 %v10355_v41 }
0x1378   : > { %10057 = vmatpush3.bf16.msra.mxu0 %v10347_v33  ;;  %v10353_v33 = vld [vmem:[#allocation13 + $0x90] ss:$8 sps:$4 sm:$0xff]  }
0x1379   : > { %10058 = vmatprep.subr.bf16.mxu0 %v10810_v3  ;;  %8987 = vmatpush1.bf16.msra.mxu1 %v10353_v33 }
0x137c   : > { %10059 = vmatpush3.bf16.msra.mxu0 %v10348_v14  ;;  %v10376_v14 = vld [vmem:[#allocation14 + $0xc8] sm:$0xff]  }
0x137d   : > { %10060 = vmatprep.subr.bf16.mxu0 %v10810_v3 }
0x1380   : > { %10061 = vmatpush3.bf16.msra.mxu0 %v10349_v15  ;;  %v10378_v15 = vld [vmem:[#allocation14 + $0xd0] sm:$0xff]  }
0x142e   : > { %v10026_v57 = vpop.f32.mrb[32].mxu0 }
0x142f   : > { %v8261_v40 = vpop.f32.mrb[33].mxu0 }
0x1430   : > { %v10032_v34 = vpop.f32.mrb[44].mxu1  ;;  %8450 = vxpose.xlu0.b32.start [1/4] (short) (narrow) %v8261_v40, 8  ;;  %v10027_v24 = vpop.f32.mrb[34].mxu0 }
0x1431   : > { %v8264_v49 = vpop.f32.mrb[35].mxu0  ;;  %v8319_v20 = vpop.f32.mrb[45].mxu1 }
0x1432   : > { %8482 = vxpose.xlu1.b32.start [1/4] (short) (narrow) %v8319_v20, 8  ;;  %v10033_v35 = vpop.f32.mrb[46].mxu1 }
0x1433   : > { %v8322_v19 = vpop.f32.mrb[47].mxu1 }
0x1434   : > { %8451 = vxpose.xlu0.b32.cont [2/4] (short) (narrow) %v8264_v49, 8 }
0x1436   : > { %8483 = vxpose.xlu1.b32.cont [2/4] (short) (narrow) %v8322_v19, 8  ;;  %v10038_v10 = vpop.f32.mrb[36].mxu0 }
0x1437   : > { %v8377_v11 = vpop.f32.mrb[37].mxu0 }
0x1438   : > { %v10044_v37 = vpop.f32.mrb[48].mxu1  ;;  %8452 = vxpose.xlu0.b32.cont [3/4] (short) (narrow) %v10026_v57, 8  ;;  %v10039_v56 = vpop.f32.mrb[38].mxu0 }
0x1439   : > { %v8380_v60 = vpop.f32.mrb[39].mxu0  ;;  %v8435_v52 = vpop.f32.mrb[49].mxu1 }
0x143a   : > { %8484 = vxpose.xlu1.b32.cont [3/4] (short) (narrow) %v10032_v34, 8  ;;  %v10045_v25 = vpop.f32.mrb[50].mxu1 }
0x143b   : > { %v8438_v1 = vpop.f32.mrb[51].mxu1 }
0x143c   : > { %8453 = vxpose.xlu0.b32.end [4/4] (short) (narrow) %v10027_v24, 8 }
0x143e   : > { %8485 = vxpose.xlu1.b32.end [4/4] (short) (narrow) %v10033_v35, 8 }
0x1440   : > { %8514 = vxpose.xlu0.b32.start [1/4] (short) (narrow) %v8377_v11, 8 }
0x1442   : > { %8546 = vxpose.xlu1.b32.start [1/4] (short) (narrow) %v8435_v52, 8 }
0x1444   : > { %8515 = vxpose.xlu0.b32.cont [2/4] (short) (narrow) %v8380_v60, 8 }
0x1446   : > { %8547 = vxpose.xlu1.b32.cont [2/4] (short) (narrow) %v8438_v1, 8 }
0x1448   : > { %8516 = vxpose.xlu0.b32.cont [3/4] (short) (narrow) %v10038_v10, 8 }
0x144a   : > { %8548 = vxpose.xlu1.b32.cont [3/4] (short) (narrow) %v10044_v37, 8 }
0x144c   : > { %8517 = vxpose.xlu0.b32.end [4/4] (short) (narrow) %v10039_v56, 8  ;;  %v9674_v56 = vld [vmem:[%s12416_s7 + $0x1] ss:$0 sm:$0xff] }
0x144e   : > { %8549 = vxpose.xlu1.b32.end [4/4] (short) (narrow) %v10045_v25, 8 }
0x14b0   : > { %v8466_v46 = vpop.trf.xlu0 }
0x14b2   : > { %v8498_v51 = vpop.trf.xlu1 }
0x14c0   : > { %v8530_v12 = vpop.trf.xlu0 }
0x14c1   : > { %v8578_v6 = vcombine.low %v8466_v46, %v8530_v12  ;;  %v8579_v39 = vcombine.high %v8466_v46, %v8530_v12  ;;  %v10358_v46 = vld [vmem:[#allocation13 + $0xa4] ss:$8 sps:$4 sm:$0xff]  }
0x14c2   : > { %v8562_v58 = vpop.trf.xlu1  ;;  %8988 = vmatprep.subr.bf16.mxu1 %v10358_v46 }
0x14c3   : > { %v8594_v55 = vcombine.low %v8498_v51, %v8562_v58  ;;  %v8595_v28 = vcombine.high %v8498_v51, %v8562_v58  ;;  %v8586_v36 = vrot.slane %v8578_v6, %v11304_v2  ;;  %v8593_v13 = vrot.slane %v8579_v39, %v11304_v2  ;;  %v10356_v51 = vld [vmem:[#allocation13 + $0xa0] ss:$8 sps:$4 sm:$0xff]  }
0x14c4   : > { %8989 = vmatpush1.bf16.msra.mxu1 %v10356_v51  ;;  %v9705_v51 = vld [vmem:[%s12490_s24 + $0x1] ss:$0 sm:$0xff] }
0x14c5   : > { %v8602_v32 = vrot.slane %v8594_v55, %v11304_v2  ;;  %v8609_v30 = vrot.slane %v8595_v28, %v11304_v2  ;;  %v10359_v55 = vld [vmem:[#allocation13 + $0xb0] ss:$8 sps:$4 sm:$0xff]   ;;  %v10364_v28 = vld [vmem:[#allocation13 + $0xc4] ss:$8 sps:$4 sm:$0xff]  }
0x14c7   : > { %v8610_v18 = vcombine.low %v8586_v36, %v8602_v32  ;;  %v8611_v62 = vcombine.high %v8586_v36, %v8602_v32  ;;  %v8626_v29 = vcombine.low %v8593_v13, %v8609_v30  ;;  %v8627_v54 = vcombine.high %v8593_v13, %v8609_v30  ;;  %v10362_v36 = vld [vmem:[#allocation13 + $0xc0] ss:$8 sps:$4 sm:$0xff]   ;;  %v10367_v13 = vld [vmem:[#allocation13 + $0xd4] ss:$8 sps:$4 sm:$0xff]   ;;  %v10365_v32 = vld [vmem:[#allocation13 + $0xd0] ss:$8 sps:$4 sm:$0xff]  }
0x14c8   : > { %v10370_v30 = vld [vmem:[#allocation13 + $0xe4] ss:$8 sps:$4 sm:$0xff]  }
0x14c9   : > { %v8618_v59 = vrot.slane %v8610_v18, %v11307_v9  ;;  %v8625_v31 = vrot.slane %v8611_v62, %v11307_v9  ;;  %v8634_v61 = vrot.slane %v8626_v29, %v11307_v9  ;;  %v8641_v63 = vrot.slane %v8627_v54, %v11307_v9  ;;  %v10368_v18 = vld [vmem:[#allocation13 + $0xe0] ss:$8 sps:$4 sm:$0xff]   ;;  %v10373_v62 = vld [vmem:[#allocation13 + $0xf4] ss:$8 sps:$4 sm:$0xff]  }
0x14ca   : > { %v10374_v29 = vld [vmem:[#allocation14 + $0xc0] sm:$0xff]  }
0x14cb   : > { %v8646_v4 = vcombine.low %v8618_v59, %v8625_v31  ;;  %v9671_v53 = vcombine.high %v8618_v59, %v8625_v31  ;;  %v8662_v47 = vcombine.low %v8634_v61, %v8641_v63  ;;  %v9672_v16 = vcombine.high %v8634_v61, %v8641_v63  ;;  %v10375_v54 = vld [vmem:[#allocation14 + $0x80] sm:$0xff]   ;;  %v10371_v59 = vld [vmem:[#allocation13 + $0xf0] ss:$8 sps:$4 sm:$0xff]   ;;  %9843 = vmatprep.subr.bf16.mxu0 %v10374_v29  ;;  %v10377_v31 = vld [vmem:[#allocation14 + $0x88] sm:$0xff]  }
0x14cc   : > { %v10393_v29 = vld [vmem:[#allocation16 + $0x18] sm:$0xff]  }
0x14cd   : > { %v8653_v38 = vrot.slane %v8646_v4, %v11304_v2  ;;  %v8661_v21 = vrot.slane %v9671_v53, %v11304_v2  ;;  %v8669_v5 = vrot.slane %v8662_v47, %v11304_v2  ;;  %v8677_v17 = vrot.slane %v9672_v16, %v11304_v2  ;;  %v9685_v47 = vld [vmem:[%s12487_s15 + $0x1] ss:$0 sm:$0xff] }
0x14cf   : > { %v8679_v8 = vcombine.high %v8653_v38, %v8661_v21  ;;  %v8695_v22 = vcombine.high %v8669_v5, %v8677_v17  ;;  %v8678_v26 = vcombine.low %v8653_v38, %v8661_v21  ;;  %v8694_v23 = vcombine.low %v8669_v5, %v8677_v17  ;;  %v9686_v38 = vld [vmem:[%s12488_s4 + $0x1] ss:$0 sm:$0xff] }
0x14d1   : > { %v8693_v27 = vrot.slane %v8679_v8, %v11307_v9  ;;  %v8709_v50 = vrot.slane %v8695_v22, %v11307_v9  ;;  %v8686_v57 = vrot.slane %v8678_v26, %v11307_v9  ;;  %v8702_v40 = vrot.slane %v8694_v23, %v11307_v9  ;;  %v10379_v8 = vld [vmem:[#allocation14 + $0x90] sm:$0xff]   ;;  %v10380_v22 = vld [vmem:[#allocation14 + $0xd8] sm:$0xff]   ;;  %v10382_v23 = vld [vmem:[#allocation14 + $0xe0] sm:$0xff]  }
0x14d2   : > { %v10381_v26 = vld [vmem:[#allocation14 + $0x98] sm:$0xff]  }
0x14d3   : > { %v8712_v34 = vcombine.low %v8693_v27, %v8709_v50  ;;  %v8711_v24 = vcombine.high %v8686_v57, %v8702_v40  ;;  %v8710_v49 = vcombine.low %v8686_v57, %v8702_v40  ;;  %v8713_v2 = vcombine.high %v8693_v27, %v8709_v50  ;;  %v10383_v27 = vld [vmem:[#allocation14 + $0xa0] sm:$0xff]   ;;  %v10384_v50 = vld [vmem:[#allocation14 + $0xe8] sm:$0xff]   ;;  %v10386_v40 = vld [vmem:[#allocation14 + $0xf0] sm:$0xff]  }
0x14d4   : > { %v10385_v57 = vld [vmem:[#allocation14 + $0xa8] sm:$0xff]  }
0x14d5   : > { %8719 = vrot.lane.b32.xlu1 %v8712_v34, %s10815_s2  ;;  %8715 = vrot.lane.b32.xlu0 %v8711_v24, %s10813_s25  ;;  %v10387_v34 = vld [vmem:[#allocation14 + $0xb0] sm:$0xff]   ;;  %v10388_v24 = vld [vmem:[#allocation14 + $0xf8] sm:$0xff]   ;;  %s12495_s2 = sld [smem:[#allocation39_spill]] }
0x14d9   : > { %8723 = vrot.lane.b32.xlu1 %v8713_v2, %s10814_s3  ;;  %v9687_v2 = vld [vmem:[%s12489_s22 + $0x2] sm:$0x3] }
0x1547   : > { %v8720_v20 = vpop.permute.xlu1 %8719  ;;  %v8716_v35 = vpop.permute.xlu0 %8715 }
0x1548   : > { %v8726_v19 = vsel %vm2531_vm1, %v8710_v49, %v8716_v35  ;;  %v10389_v49 = vld [vmem:[#allocation14 + $0xb8] sm:$0xff]   ;;  %v8901_v35 = vrot.slane %v9687_v2, %v11276_v43 }
0x1549   : > { %v8727_v11 = vsel %vm4488_vm3, %v8726_v19, %v8720_v20  ;;  %v8897_v20 = vrot.slane %v9687_v2, %v11284_v45 }
0x154b   : > { %v8724_v10 = vpop.permute.xlu1 %8723 }
0x154c   : > { %v8728_v37 = vsel %vm4490_vm4, %v8727_v11, %v8724_v10 }
0x154d   : > { %v8729_v9 = vpack.c.bf16 %v8728_v37, %v8728_v37 }
0x154f   : > { %10063 = vmatmul.mubr.bf16.vlgmr.msra.gmra.mrb[40].mxu0 %v8729_v9 }
0x1550   : > { %9844 = vmatpush3.bf16.msra.mxu0 %v10375_v54  ;;  %v10394_v54 = vld [vmem:[#allocation16 + $0x20] sm:$0xff]  }
0x1551   : > { %9845 = vmatprep.subr.bf16.mxu0 %v10376_v14  ;;  %v10395_v14 = vld [vmem:[#allocation16 + $0x28] sm:$0xff]  }
0x1554   : > { %9846 = vmatpush3.bf16.msra.mxu0 %v10377_v31  ;;  %v10397_v31 = vld [vmem:[#allocation16 + $0x38] sm:$0xff]  }
0x1555   : > { %9847 = vmatprep.subr.bf16.mxu0 %v10378_v15 }
0x1558   : > { %9848 = vmatpush3.bf16.msra.mxu0 %v10379_v8 }
0x1559   : > { %9849 = vmatprep.subr.bf16.mxu0 %v10380_v22 }
0x155c   : > { %9850 = vmatpush3.bf16.msra.mxu0 %v10381_v26 }
0x155d   : > { %9851 = vmatprep.subr.bf16.mxu0 %v10382_v23 }
0x1560   : > { %9852 = vmatpush3.bf16.msra.mxu0 %v10383_v27 }
0x1561   : > { %9853 = vmatprep.subr.bf16.mxu0 %v10384_v50 }
0x1564   : > { %9854 = vmatpush3.bf16.msra.mxu0 %v10385_v57 }
0x1565   : > { %9855 = vmatprep.subr.bf16.mxu0 %v10386_v40 }
0x1568   : > { %9856 = vmatpush3.bf16.msra.mxu0 %v10387_v34 }
0x1569   : > { %9857 = vmatprep.subr.bf16.mxu0 %v10388_v24 }
0x156c   : > { %9858 = vmatpush3.bf16.msra.mxu0 %v10389_v49 }
0x1622   : > { %v8837_v60 = vpop.f32.mrb[40].mxu0 }
0x1623   : > { %v8838_v52 = vadd.f32 %v9674_v56, %v8837_v60  ;;  %v10064_v25 = vpop.f32.mrb[41].mxu0 }
0x1624   : > { %v8840_v1 = vpop.f32.mrb[42].mxu0 }
0x1625   : > { %v8843_v0 = vadd.f32 %v8838_v52, %v11818_v44  ;;  %v10065_v48 = vpop.f32.mrb[43].mxu0  ;;  %v10361_v44 = vld [vmem:[#allocation13 + $0xb4] ss:$8 sps:$4 sm:$0xff]  }
0x1626   : > { %8990 = vmatprep.subr.bf16.mxu1 %v10361_v44 }
0x1627   : > { %8848 = vadd.xlane.f32.xlu0 %v8843_v0  ;;  %8991 = vmatpush1.bf16.msra.mxu1 %v10359_v55 }
0x1628   : > { %8992 = vmatprep.subr.bf16.mxu1 %v10364_v28  ;;  %v10390_v28 = vld [vmem:[#allocation16] sm:$0xff]  }
0x162b   : > { %8993 = vmatpush1.bf16.msra.mxu1 %v10362_v36  ;;  %v10391_v36 = vld [vmem:[#allocation16 + $0x8] sm:$0xff]  }
0x162c   : > { %8994 = vmatprep.subr.bf16.mxu1 %v10367_v13 }
0x162f   : > { %8995 = vmatpush1.bf16.msra.mxu1 %v10365_v32 }
0x1630   : > { %8996 = vmatprep.subr.bf16.mxu1 %v10370_v30 }
0x1633   : > { %8997 = vmatpush1.bf16.msra.mxu1 %v10368_v18 }
0x1634   : > { %8998 = vmatprep.subr.bf16.mxu1 %v10373_v62  ;;  %v10392_v62 = vld [vmem:[#allocation16 + $0x10] sm:$0xff]  }
0x1637   : > { %8999 = vmatpush1.bf16.msra.mxu1 %v10371_v59  ;;  %v10396_v59 = vld [vmem:[#allocation16 + $0x30] sm:$0xff]  }
0x1638   : > { %10066 = vmatprep.subr.bf16.mxu1 %v10810_v3 }
0x16b4   : > { %v8849_v12 = vpop.xlane.xlu0 %8848 }
0x16b5   : > { %v8850_v6 = vmul.f32 0.0078125, %v8849_v12 }
0x16b7   : > { %v8851_v39 = vsub.f32 %v8843_v0, %v8850_v6 }
0x16b9   : > { %v8852_v58 = vmul.f32 %v8851_v39, %v8851_v39 }
0x16bb   : > { %8853 = vadd.xlane.f32.xlu1 %v8852_v58 }
0x1748   : > { %v8854_v61 = vpop.xlane.xlu1 %8853 }
0x1749   : > { %v8855_v63 = vmul.f32 0.0078125, %v8854_v61 }
0x174b   : > { %v8856_v4 = vadd.f32 1e-12, %v8855_v63 }
0x174d   : > { %10440 = vrsqrt.f32 %v8856_v4 }
0x1757   : > { %v10441_v53 = vpop.eup %10440 }
0x1758   : > { %v8858_v16 = vmul.f32 %v10441_v53, %v8851_v39 }
0x175a   : > { %v8865_v21 = vmul.f32 %v9685_v47, %v8858_v16  ;;  %v9724_v47 = vld [vmem:[%s12491_s23 + $0x1] ss:$0 sm:$0xff] }
0x175c   : > { %v8872_v5 = vadd.f32 %v9686_v38, %v8865_v21  ;;  %v9725_v38 = vld [vmem:[%s12492_s0 + $0x1] ss:$0 sm:$0xff]  ;;  %s12365_s0 = scalar_lea.hbm %s12495_s2, %s9734_s20 }
0x175e   : > { %v8873_v17 = vpack.c.bf16 %v8872_v5, %v8872_v5 }
0x1760   : > { %9017 = vmatmul.mubr.bf16.vlgmr.msra.gmra.mrb[52].mxu1 %v8873_v17  ;;  %v9261_v17 = vld [vmem:[%s12494_s9] sm:$0x1]  ;;  %s10711_s9 = sshll.u32 %s10818_s1, 4  ;;  %s10712_s9 = int_to_ptr.vmem [resolvable:$false] %s10711_s9 }
0x1761   : > { %10082 = vmatprep.mubr.msk.bf16.mxu1 %vm10812_vm0, %v10810_v3  ;;  %10067 = vmatpush3.bf16.msra.mxu1 %v10390_v28  ;;  %s10713_s4 = scalar_lea.vmem %s10712_s9, 32  ;;  %p10714_p3 = scmp.lt.s32.totalorder %s12367_s26, %s10712_s9 }
0x1762   : > { %10068 = vmatprep.subr.bf16.mxu1 %v10810_v3  ;;  %p10715_p8 = scmp.lt.s32.totalorder %s10713_s4, %s10707_s11 }
0x1764   : > { %p10716_p7 = por %p10715_p8, %p10714_p3 }
0x1765   : > { %10069 = vmatpush3.bf16.msra.mxu1 %v10391_v36 }
0x1766   : > { %10070 = vmatprep.subr.bf16.mxu1 %v10810_v3  ;;  %p10717_p12 = pnand %p10716_p7, %p10710_p9 }
0x1769   : > { %10071 = vmatpush3.bf16.msra.mxu1 %v10392_v62 }
0x176a   : > { %10072 = vmatprep.subr.bf16.mxu1 %v10810_v3 }
0x176d   : > { %10073 = vmatpush3.bf16.msra.mxu1 %v10393_v29 }
0x176e   : > { %10074 = vmatprep.subr.bf16.mxu1 %v10810_v3 }
0x1771   : > { %10075 = vmatpush3.bf16.msra.mxu1 %v10394_v54 }
0x1772   : > { %10076 = vmatprep.subr.bf16.mxu1 %v10810_v3 }
0x1775   : > { %10077 = vmatpush3.bf16.msra.mxu1 %v10395_v14 }
0x1776   : > { %10078 = vmatprep.subr.bf16.mxu1 %v10810_v3 }
0x1779   : > { %10079 = vmatpush3.bf16.msra.mxu1 %v10396_v59 }
0x177a   : > { %10080 = vmatprep.subr.bf16.mxu1 %v10810_v3 }
0x177d   : > { %10081 = vmatpush3.bf16.msra.mxu1 %v10397_v31 }
0x1833   : > { %v9018_v19 = vpop.f32.mrb[52].mxu1 }
0x1834   : > { %v9019_v10 = vadd.f32 %v9018_v19, %v8897_v20  ;;  %v9020_v11 = vpop.f32.mrb[53].mxu1 }
0x1835   : > { %v9021_v37 = vadd.f32 %v9020_v11, %v8901_v35  ;;  %v9022_v9 = vpop.f32.mrb[54].mxu1 }
0x1836   : > { %v9027_v56 = vmul.f32 0.70710677, %v9019_v10  ;;  %v9023_v60 = vpop.f32.mrb[55].mxu1  ;;  %v9025_v0 = vmul.f32 0.5, %v9019_v10 }
0x1837   : > { %v9028_v52 = vmul.f32 0.70710677, %v9021_v37  ;;  %v9026_v42 = vmul.f32 0.5, %v9021_v37 }
0x1838   : > { %10442 = verf.f32 %v9027_v56 }
0x1839   : > { %10444 = verf.f32 %v9028_v52 }
0x1842   : > { %v10443_v25 = vpop.eup %10442 }
0x1843   : > { %v10445_v1 = vpop.eup %10444  ;;  %v9031_v48 = vadd.f32 1.0, %v10443_v25 }
0x1844   : > { %v9032_v7 = vadd.f32 1.0, %v10445_v1 }
0x1845   : > { %v9033_v41 = vmul.f32 %v9031_v48, %v9025_v0 }
0x1846   : > { %v9034_v45 = vmul.f32 %v9032_v7, %v9026_v42 }
0x1847   : > { %v9035_v43 = vpack.c.bf16 %v9033_v41, %v9033_v41 }
0x1848   : > { %v9036_v33 = vpack.c.bf16 %v9034_v45, %v9034_v45 }
0x184a   : > { %9206 = vmatprep.mubr.bf16.mxu0 %v9036_v33 }
0x184b   : > { %9207 = vmatmul.mubr.bf16.vlgmr.msra.gmra.mrb[44].mxu0 %v9035_v43 }
0x191e   : > { %v9859_v46 = vpop.f32.mrb[44].mxu0 }
0x191f   : > { %v9860_v12 = vpop.f32.mrb[45].mxu0 }
0x1920   : > { %v9861_v6 = vadd.f32 %v9860_v12, %v9859_v46  ;;  %v9862_v39 = vpop.f32.mrb[46].mxu0 }
0x1921   : > { %v9863_v58 = vpop.f32.mrb[47].mxu0 }
0x1922   : > { %v9209_v44 = vadd.f32 %v9861_v6, %v9705_v51 }
0x1924   : > { %v9214_v55 = vadd.f32 %v9209_v44, %v8872_v5 }
0x1926   : > { %9219 = vadd.xlane.f32.xlu0 %v9214_v55 }
0x19b3   : > { %v9220_v13 = vpop.xlane.xlu0 %9219 }
0x19b4   : > { %v9221_v32 = vmul.f32 0.0078125, %v9220_v13 }
0x19b6   : > { %v9222_v30 = vsub.f32 %v9214_v55, %v9221_v32 }
0x19b8   : > { %v9223_v18 = vmul.f32 %v9222_v30, %v9222_v30 }
0x19ba   : > { %9224 = vadd.xlane.f32.xlu0 %v9223_v18 }
0x1a47   : > { %v9225_v61 = vpop.xlane.xlu0 %9224 }
0x1a48   : > { %v9226_v63 = vmul.f32 0.0078125, %v9225_v61 }
0x1a4a   : > { %v9227_v4 = vadd.f32 1e-12, %v9226_v63 }
0x1a4c   : > { %10446 = vrsqrt.f32 %v9227_v4 }
0x1a56   : > { %v10447_v53 = vpop.eup %10446 }
0x1a57   : > { %v9229_v16 = vmul.f32 %v10447_v53, %v9222_v30 }
0x1a59   : > { %v9236_v21 = vmul.f32 %v9724_v47, %v9229_v16 }
0x1a5b   : > { %v9243_v5 = vadd.f32 %v9725_v38, %v9236_v21 }
0x1a5d   : > { %v9244_v3 = vpack.c.bf16 %v9243_v5, %v9243_v5 }
0x1a5f   : > { %10083 = vmatmul.mubr.bf16.vlgmr.msra.gmra.mrb[56].mxu1 %v9244_v3 }
0x1b32   : > { %v9344_v15 = vpop.f32.mrb[56].mxu1 }
0x1b33   : > { %v9345_v8 = vadd.f32 %v9344_v15, %v9261_v17  ;;  %v10084_v22 = vpop.f32.mrb[57].mxu1 }
0x1b34   : > { %v9347_v26 = vpop.f32.mrb[58].mxu1 }
0x1b35   : > { %10448 = vtanh.f32 %v9345_v8  ;;  %v10085_v23 = vpop.f32.mrb[59].mxu1 }
0x1b3f   : > { %v10449_v27 = vpop.eup %10448 }
0x1b40   : > { %9351 = vst [vmem:[%s720_s17] sm:$0x1] %v10449_v27 }
0x1b41   : > { %10720 = shalt.err (!%p10717_p12)
}
0x1b42   : > { %s10721_s10 = scalar_lea.hbm %s12365_s0, 16  ;;  %s10725_s25 = scalar_lea.hbm %s12495_s2, 32 }
0x1b43   : > { %p10722_p10 = scmp.ne.s32.totalorder %s12365_s0, %s10721_s10  ;;  %p10726_p13 = scmp.lt.u32.totalorder %s12365_s0, %s12495_s2 }
0x1b44   : > { %p10727_p0 = scmp.lt.u32.totalorder %s10725_s25, %s10721_s10  ;;  %p10729_p6 = scmp.lt.u32.totalorder %s10721_s10, %s12365_s0 }
0x1b45   : > { %p10723_p4 = pnand %p10722_p10, %p12496_p11 }
0x1b46   : > { %p10728_p2 = por %p10727_p0, %p10726_p13 }
0x1b47   : > { %p10724_p1 = pneg %p10723_p4 }
0x1b48   : > { %p10730_p5 = por %p10729_p6, %p10728_p2 }
0x1b4a   : > { %p10731_p9 = pnand %p10730_p5, %p10724_p1 }
0x1b4c   : > { %10734 = shalt.err (!%p10731_p9)
}
0x1b4d   : > { %10126 = dma.vmem_to_hbm [thread:$0]  (%p12496_p11), %s12367_s26, 16, %s12365_s0, %s9353_s6  }
0x1b4e PF: > { %s9377_s4 = sand.u32 1, %s10781_s27   ;;  %p12497_p3 = scmp.ne.s32.totalorder %s12472_s14, 0 }
0x1b4f   : > { %p12498_p8 = scmp.ge.s32.totalorder %s10793_s30, 2  ;;  %s9378_s11 = scalar_lea.sflag [#allocation4], %s9377_s4 }
0x1b51   : > { %p10158_p7 = pnand %p12498_p8, %p12497_p3 }
0x1b53   : > { %10776 = dma.done.wait (!%p10158_p7), %s9378_s11, 16  }
0x1b54   : > { %10778 = vsyncadd (!%p10158_p7), %s9378_s11, 4294967280  ;;  %p37_p12 = scmp.ge.s32.totalorder %s11119_s21, 4   ;;  %s12499_s27 = smov %s10785_s28 }
0x1b55   : > { %s12500_s28 = smov %s10789_s29  ;;  %s12501_s29 = smov %s11131_s8 }
0x1b56   : > { %s12502_s30 = smov %s11119_s21  ;;  %39 = sbr.rel (!%p37_p12) target bundleno = 26 (0x1a), region = 190 }
0x1b5d   :  { %9382 = vsyncpa [#allocation3], 1 }
0x1b5e   :  { %9384 = vsyncpa [#allocation3 + $0x1], 1 }
0x1b5f   :  { %9385 = vsyncpa [#allocation6], 1 }
0x1b60   :  { %9387 = vsyncpa [#allocation6 + $0x1], 1 }
0x1b61   :  { %9388 = vsyncpa [#allocation9], 1 }
0x1b62   :  { %9389 = vsyncpa [#allocation12], 1 }
0x1b63   :  { %9390 = vsyncpa [#allocation15], 1 }
0x1b64   :  { %9391 = vsyncpa [#allocation4], 1 }
0x1b65   :  { %9393 = vsyncpa [#allocation4 + $0x1], 1 }

</bundles_post_ra>
